<compile_context>
chip_gen: v7x
topology: tpu7x:2x2x1
jax: 0.10.0
libtpu: 0.0.40
codegen_flags: <defaults>
</compile_context>

<pallas_src>
import jax
import jax.numpy as jnp
from jax.experimental import pallas as pl
from jax.experimental.pallas import tpu as pltpu

C = 128          # in_channels == out_channels == 128 (fixed by the module)
EPS = 1e-5       # BatchNorm2d default eps
STRIDES = (2, 1, 1)


# ------------------------------ fused kernel --------------------------------

def _fused_block_kernel(x_ref, wdw_ref, wpw_ref, o_ref):
    """Whole block fused: 3 x (dw3x3 -> BN -> ReLU -> pw1x1 -> BN -> ReLU).

    x_ref:   (N, H, W, C)        NHWC input, f32
    wdw_ref: (27, C)             depthwise weights, row index = l*9 + kh*3 + kw
    wpw_ref: (3, C, C)           pointwise weights per layer
    o_ref:   (N, H//2, W//2, C)  final output
    """
    N, H, W, Cc = x_ref.shape
    Ho, Wo = H // 2, W // 2
    rows = N * Ho * Wo

    def wdw(l, kh, kw):
        return wdw_ref[l * 9 + kh * 3 + kw]            # (C,) lane vector

    # Column-boundary masks, hoisted once (JAX does not CSE broadcast_in_dim).
    col = jax.lax.broadcasted_iota(jnp.int32, (N, Ho, Wo, Cc), 2)
    first_col = col == 0
    last_col = col == (Wo - 1)

    def shift_w_pos(a):   # out[..., j, :] = a[..., j-1, :]; zero at j == 0  (XLU roll)
        return jnp.where(first_col, 0.0, pltpu.roll(a, 1, axis=2))

    def shift_w_neg(a):   # out[..., j, :] = a[..., j+1, :]; zero at j == Wo-1
        return jnp.where(last_col, 0.0, pltpu.roll(a, Wo - 1, axis=2))

    def shift_h_pos(a):   # out[:, i] = a[:, i-1]; zero at i == 0   (leading-axis concat)
        z = jnp.zeros_like(a[:, :1])
        return jnp.concatenate([z, a[:, :-1]], axis=1)

    def shift_h_neg(a):   # out[:, i] = a[:, i+1]; zero at i == Ho-1
        z = jnp.zeros_like(a[:, :1])
        return jnp.concatenate([a[:, 1:], z], axis=1)

    def bn_relu(a2d):
        # Batch-global BatchNorm (training stats, affine=False) + ReLU, fully in-kernel.
        cnt = float(a2d.shape[0])
        s1 = jnp.sum(a2d, axis=0, keepdims=True)            # (1, C)
        s2 = jnp.sum(a2d * a2d, axis=0, keepdims=True)       # (1, C)
        mean = s1 / cnt
        var = jnp.maximum(s2 / cnt - mean * mean, 0.0)       # biased variance
        inv = jax.lax.rsqrt(var + EPS)
        return jnp.maximum((a2d - mean) * inv, 0.0)

    # ---------------- layer 0: depthwise 3x3, stride 2, pad 1 ----------------
    # Row/column parity split: 4 strided reads total (instead of 9 strided taps);
    # every tap below is an aligned plane or a cheap shift of one.
    x_ee = x_ref[:, pl.ds(0, Ho, 2), pl.ds(0, Wo, 2), :]   # even rows, even cols
    x_eo = x_ref[:, pl.ds(0, Ho, 2), pl.ds(1, Wo, 2), :]   # even rows, odd  cols
    x_oe = x_ref[:, pl.ds(1, Ho, 2), pl.ds(0, Wo, 2), :]   # odd  rows, even cols
    x_oo = x_ref[:, pl.ds(1, Ho, 2), pl.ds(1, Wo, 2), :]   # odd  rows, odd  cols

    x_eo_l = shift_w_pos(x_eo)      # tap (kh=1, kw=0)
    x_oo_l = shift_w_pos(x_oo)      # tap (kh=2, kw=0)
    x_oe_u = shift_h_pos(x_oe)      # tap (kh=0, kw=1)
    x_oo_u = shift_h_pos(x_oo)      # tap (kh=0, kw=2)
    x_oo_ul = shift_h_pos(x_oo_l)   # tap (kh=0, kw=0)

    y = x_oo_ul * wdw(0, 0, 0)      # accumulator initialized with the first tap product
    y = y + x_oe_u * wdw(0, 0, 1)
    y = y + x_oo_u * wdw(0, 0, 2)
    y = y + x_eo_l * wdw(0, 1, 0)
    y = y + x_ee * wdw(0, 1, 1)
    y = y + x_eo * wdw(0, 1, 2)
    y = y + x_oo_l * wdw(0, 2, 0)
    y = y + x_oe * wdw(0, 2, 1)
    y = y + x_oo * wdw(0, 2, 2)

    t = bn_relu(y.reshape(rows, Cc))                                     # BN1 + ReLU
    z = jnp.dot(t, wpw_ref[0], preferred_element_type=jnp.float32)       # pw1x1, MXU M=128
    a = bn_relu(z).reshape(N, Ho, Wo, Cc)                                # BN2 + ReLU

    # ---------------- layers 1, 2: depthwise 3x3, stride 1, pad 1 ----------------
    for l in (1, 2):
        planes = (shift_w_pos(a), a, shift_w_neg(a))     # kw = 0, 1, 2 column planes
        y = None
        for kw in range(3):
            p = planes[kw]
            taps = (shift_h_pos(p), p, shift_h_neg(p))   # kh = 0, 1, 2 row taps
            for kh in range(3):
                term = taps[kh] * wdw(l, kh, kw)
                y = term if y is None else y + term
        t = bn_relu(y.reshape(rows, Cc))
        z = jnp.dot(t, wpw_ref[l], preferred_element_type=jnp.float32)
        a = bn_relu(z).reshape(N, Ho, Wo, Cc)

    o_ref[...] = a


# ------------------------------ JAX wrapper ---------------------------------

def block4_sf_forward(x_nchw, params):
    N, Cc, H, W = x_nchw.shape
    assert Cc == C and H % 2 == 0 and W % 2 == 0
    Ho, Wo = H // 2, W // 2

    x = jnp.transpose(x_nchw, (0, 2, 3, 1))                       # NCHW -> NHWC (C lane-dense)
    wdw = jnp.stack([w for w, _ in params]).reshape(3 * 3 * 3, C)  # (27, C)
    wpw = jnp.stack([w for _, w in params])                        # (3, C, C)

    out = pl.pallas_call(
        _fused_block_kernel,
        out_shape=jax.ShapeDtypeStruct((N, Ho, Wo, C), jnp.float32),
        grid=(1,),
        in_specs=[
            pl.BlockSpec((N, H, W, C), lambda i: (0, 0, 0, 0)),
            pl.BlockSpec((27, C), lambda i: (0, 0)),
            pl.BlockSpec((3, C, C), lambda i: (0, 0, 0)),
        ],
        out_specs=pl.BlockSpec((N, Ho, Wo, C), lambda i: (0, 0, 0, 0)),
        compiler_params=pltpu.CompilerParams(dimension_semantics=("arbitrary",)),
    )(x, wdw, wpw)
    return jnp.transpose(out, (0, 3, 1, 2))                       # NHWC -> NCHW


def init_params(key):
    params = []
    for _ in range(3):
        key, k1, k2 = jax.random.split(key, 3)
        w_dw = jax.random.normal(k1, (3, 3, C), jnp.float32) * 0.1   # (kh, kw, C)
        w_pw = jax.random.normal(k2, (C, C), jnp.float32) * 0.05     # (Cin, Cout)
        params.append((w_dw, w_pw))
    return params


# ------------------------- pure-JAX reference check --------------------------

def _ref_forward(x_nchw, params):
    x = x_nchw
    for (w_dw, w_pw), s in zip(params, STRIDES):
        wd = jnp.transpose(w_dw, (2, 0, 1))[:, None, :, :]          # (C,1,3,3)
        y = jax.lax.conv_general_dilated(
            x, wd, (s, s), ((1, 1), (1, 1)),
            dimension_numbers=("NCHW", "OIHW", "NCHW"), feature_group_count=C)
        m = y.mean(axis=(0, 2, 3), keepdims=True)
        v = ((y - m) ** 2).mean(axis=(0, 2, 3), keepdims=True)
        y = jnp.maximum((y - m) * jax.lax.rsqrt(v + EPS), 0.0)
        wp = jnp.transpose(w_pw)[:, :, None, None]                  # (Cout,Cin,1,1)
        z = jax.lax.conv_general_dilated(
            y, wp, (1, 1), "VALID",
            dimension_numbers=("NCHW", "OIHW", "NCHW"))
        m = z.mean(axis=(0, 2, 3), keepdims=True)
        v = ((z - m) ** 2).mean(axis=(0, 2, 3), keepdims=True)
        x = jnp.maximum((z - m) * jax.lax.rsqrt(v + EPS), 0.0)
    return x


if __name__ == "__main__":
    key = jax.random.PRNGKey(0)
    kx, kp = jax.random.split(key)
    x = jax.random.normal(kx, (2, C, 16, 16), jnp.float32)   # NCHW input
    params = init_params(kp)

    out = jax.jit(block4_sf_forward)(x, params)
    out = jax.block_until_ready(out)
    assert out.shape == (2, C, 8, 8), out.shape

    ref = _ref_forward(x, params)
    err = float(jnp.max(jnp.abs(out - ref)))
    assert jnp.allclose(out, ref, atol=2e-3, rtol=2e-3), err

    print("KERNEL_OK")
</pallas_src>

<mosaic_0001>
module attributes {stable_mosaic.version = 11 : i64} {
  func.func @_fused_block_kernel(%arg0: i32, %arg1: memref<2x16x16x128xf32, #tpu.memory_space<vmem>>, %arg2: memref<27x128xf32, #tpu.memory_space<vmem>>, %arg3: memref<3x128x128xf32, #tpu.memory_space<vmem>>, %arg4: memref<2x8x8x128xf32, #tpu.memory_space<vmem>>) attributes {dimension_semantics = [#tpu.dimension_semantics<arbitrary>], iteration_bounds = array<i64: 1>, scalar_prefetch = 0 : i64, scratch_operands = 0 : i64, tpu.core_type = #tpu.core_type<tc>, window_params = [{pipeline_mode = #tpu.pipeline_mode<synchronous>, transform_indices = @transform_0, window_bounds = array<i64: 2, 16, 16, 128>}, {pipeline_mode = #tpu.pipeline_mode<synchronous>, transform_indices = @transform_1, window_bounds = array<i64: 27, 128>}, {pipeline_mode = #tpu.pipeline_mode<synchronous>, transform_indices = @transform_2, window_bounds = array<i64: 3, 128, 128>}, {pipeline_mode = #tpu.pipeline_mode<synchronous>, transform_indices = @transform_3, window_bounds = array<i64: 2, 8, 8, 128>}]} {
    %0 = tpu.iota {dimensions = array<i32: 2>} : vector<2x8x8x128xi32>
    %c0_i32 = arith.constant 0 : i32
    %1 = vector.broadcast %c0_i32 : i32 to vector<2x8x8x128xi32>
    %2 = arith.cmpi eq, %0, %1 : vector<2x8x8x128xi32>
    %c7_i32 = arith.constant 7 : i32
    %3 = vector.broadcast %c7_i32 : i32 to vector<2x8x8x128xi32>
    %4 = arith.cmpi eq, %0, %3 : vector<2x8x8x128xi32>
    %c0 = arith.constant 0 : index
    %c0_0 = arith.constant 0 : index
    %c0_1 = arith.constant 0 : index
    %c0_2 = arith.constant 0 : index
    %5 = tpu.strided_load %arg1[%c0, %c0_0, %c0_1, %c0_2] {strides = array<i32: 1, 2, 2, 1>} : memref<2x16x16x128xf32, #tpu.memory_space<vmem>>, vector<2x8x8x128xf32>
    %c0_3 = arith.constant 0 : index
    %c0_4 = arith.constant 0 : index
    %c1 = arith.constant 1 : index
    %c0_5 = arith.constant 0 : index
    %6 = tpu.strided_load %arg1[%c0_3, %c0_4, %c1, %c0_5] {strides = array<i32: 1, 2, 2, 1>} : memref<2x16x16x128xf32, #tpu.memory_space<vmem>>, vector<2x8x8x128xf32>
    %c0_6 = arith.constant 0 : index
    %c1_7 = arith.constant 1 : index
    %c0_8 = arith.constant 0 : index
    %c0_9 = arith.constant 0 : index
    %7 = tpu.strided_load %arg1[%c0_6, %c1_7, %c0_8, %c0_9] {strides = array<i32: 1, 2, 2, 1>} : memref<2x16x16x128xf32, #tpu.memory_space<vmem>>, vector<2x8x8x128xf32>
    %c0_10 = arith.constant 0 : index
    %c1_11 = arith.constant 1 : index
    %c1_12 = arith.constant 1 : index
    %c0_13 = arith.constant 0 : index
    %8 = tpu.strided_load %arg1[%c0_10, %c1_11, %c1_12, %c0_13] {strides = array<i32: 1, 2, 2, 1>} : memref<2x16x16x128xf32, #tpu.memory_space<vmem>>, vector<2x8x8x128xf32>
    %c1_i32 = arith.constant 1 : i32
    %9 = tpu.dynamic_rotate %6 by %c1_i32 dim 2 : vector<2x8x8x128xf32>, i32 -> vector<2x8x8x128xf32>
    %cst = arith.constant 0.000000e+00 : f32
    %10 = vector.broadcast %cst : f32 to vector<2x8x8x128xf32>
    %11 = arith.select %2, %10, %9 : vector<2x8x8x128xi1>, vector<2x8x8x128xf32>
    %c1_i32_14 = arith.constant 1 : i32
    %12 = tpu.dynamic_rotate %8 by %c1_i32_14 dim 2 : vector<2x8x8x128xf32>, i32 -> vector<2x8x8x128xf32>
    %cst_15 = arith.constant 0.000000e+00 : f32
    %13 = vector.broadcast %cst_15 : f32 to vector<2x8x8x128xf32>
    %14 = arith.select %2, %13, %12 : vector<2x8x8x128xi1>, vector<2x8x8x128xf32>
    %cst_16 = arith.constant 0.000000e+00 : f32
    %15 = vector.broadcast %cst_16 : f32 to vector<2x1x8x128xf32>
    %16 = vector.extract_strided_slice %7 {offsets = [0, 0, 0, 0], sizes = [2, 7, 8, 128], strides = [1, 1, 1, 1]} : vector<2x8x8x128xf32> to vector<2x7x8x128xf32>
    %17 = tpu.concatenate %15, %16 in 1 : vector<2x1x8x128xf32>, vector<2x7x8x128xf32> -> vector<2x8x8x128xf32>
    %cst_17 = arith.constant 0.000000e+00 : f32
    %18 = vector.broadcast %cst_17 : f32 to vector<2x1x8x128xf32>
    %19 = vector.extract_strided_slice %8 {offsets = [0, 0, 0, 0], sizes = [2, 7, 8, 128], strides = [1, 1, 1, 1]} : vector<2x8x8x128xf32> to vector<2x7x8x128xf32>
    %20 = tpu.concatenate %18, %19 in 1 : vector<2x1x8x128xf32>, vector<2x7x8x128xf32> -> vector<2x8x8x128xf32>
    %cst_18 = arith.constant 0.000000e+00 : f32
    %21 = vector.broadcast %cst_18 : f32 to vector<2x1x8x128xf32>
    %22 = vector.extract_strided_slice %14 {offsets = [0, 0, 0, 0], sizes = [2, 7, 8, 128], strides = [1, 1, 1, 1]} : vector<2x8x8x128xf32> to vector<2x7x8x128xf32>
    %23 = tpu.concatenate %21, %22 in 1 : vector<2x1x8x128xf32>, vector<2x7x8x128xf32> -> vector<2x8x8x128xf32>
    %c0_19 = arith.constant 0 : index
    %c0_20 = arith.constant 0 : index
    %24 = vector.load %arg2[%c0_19, %c0_20] : memref<27x128xf32, #tpu.memory_space<vmem>>, vector<1x128xf32>
    %25 = vector.shape_cast %24 : vector<1x128xf32> to vector<128xf32>
    %26 = vector.shape_cast %25 : vector<128xf32> to vector<1x1x1x128xf32>
    %27 = vector.broadcast %26 : vector<1x1x1x128xf32> to vector<2x8x8x128xf32>
    %28 = arith.mulf %23, %27 : vector<2x8x8x128xf32>
    %c1_21 = arith.constant 1 : index
    %c0_22 = arith.constant 0 : index
    %29 = vector.load %arg2[%c1_21, %c0_22] : memref<27x128xf32, #tpu.memory_space<vmem>>, vector<1x128xf32>
    %30 = vector.shape_cast %29 : vector<1x128xf32> to vector<128xf32>
    %31 = vector.shape_cast %30 : vector<128xf32> to vector<1x1x1x128xf32>
    %32 = vector.broadcast %31 : vector<1x1x1x128xf32> to vector<2x8x8x128xf32>
    %33 = arith.mulf %17, %32 : vector<2x8x8x128xf32>
    %34 = arith.addf %28, %33 : vector<2x8x8x128xf32>
    %c2 = arith.constant 2 : index
    %c0_23 = arith.constant 0 : index
    %35 = vector.load %arg2[%c2, %c0_23] : memref<27x128xf32, #tpu.memory_space<vmem>>, vector<1x128xf32>
    %36 = vector.shape_cast %35 : vector<1x128xf32> to vector<128xf32>
    %37 = vector.shape_cast %36 : vector<128xf32> to vector<1x1x1x128xf32>
    %38 = vector.broadcast %37 : vector<1x1x1x128xf32> to vector<2x8x8x128xf32>
    %39 = arith.mulf %20, %38 : vector<2x8x8x128xf32>
    %40 = arith.addf %34, %39 : vector<2x8x8x128xf32>
    %c3 = arith.constant 3 : index
    %c0_24 = arith.constant 0 : index
    %41 = vector.load %arg2[%c3, %c0_24] : memref<27x128xf32, #tpu.memory_space<vmem>>, vector<1x128xf32>
    %42 = vector.shape_cast %41 : vector<1x128xf32> to vector<128xf32>
    %43 = vector.shape_cast %42 : vector<128xf32> to vector<1x1x1x128xf32>
    %44 = vector.broadcast %43 : vector<1x1x1x128xf32> to vector<2x8x8x128xf32>
    %45 = arith.mulf %11, %44 : vector<2x8x8x128xf32>
    %46 = arith.addf %40, %45 : vector<2x8x8x128xf32>
    %c4 = arith.constant 4 : index
    %c0_25 = arith.constant 0 : index
    %47 = vector.load %arg2[%c4, %c0_25] : memref<27x128xf32, #tpu.memory_space<vmem>>, vector<1x128xf32>
    %48 = vector.shape_cast %47 : vector<1x128xf32> to vector<128xf32>
    %49 = vector.shape_cast %48 : vector<128xf32> to vector<1x1x1x128xf32>
    %50 = vector.broadcast %49 : vector<1x1x1x128xf32> to vector<2x8x8x128xf32>
    %51 = arith.mulf %5, %50 : vector<2x8x8x128xf32>
    %52 = arith.addf %46, %51 : vector<2x8x8x128xf32>
    %c5 = arith.constant 5 : index
    %c0_26 = arith.constant 0 : index
    %53 = vector.load %arg2[%c5, %c0_26] : memref<27x128xf32, #tpu.memory_space<vmem>>, vector<1x128xf32>
    %54 = vector.shape_cast %53 : vector<1x128xf32> to vector<128xf32>
    %55 = vector.shape_cast %54 : vector<128xf32> to vector<1x1x1x128xf32>
    %56 = vector.broadcast %55 : vector<1x1x1x128xf32> to vector<2x8x8x128xf32>
    %57 = arith.mulf %6, %56 : vector<2x8x8x128xf32>
    %58 = arith.addf %52, %57 : vector<2x8x8x128xf32>
    %c6 = arith.constant 6 : index
    %c0_27 = arith.constant 0 : index
    %59 = vector.load %arg2[%c6, %c0_27] : memref<27x128xf32, #tpu.memory_space<vmem>>, vector<1x128xf32>
    %60 = vector.shape_cast %59 : vector<1x128xf32> to vector<128xf32>
    %61 = vector.shape_cast %60 : vector<128xf32> to vector<1x1x1x128xf32>
    %62 = vector.broadcast %61 : vector<1x1x1x128xf32> to vector<2x8x8x128xf32>
    %63 = arith.mulf %14, %62 : vector<2x8x8x128xf32>
    %64 = arith.addf %58, %63 : vector<2x8x8x128xf32>
    %c7 = arith.constant 7 : index
    %c0_28 = arith.constant 0 : index
    %65 = vector.load %arg2[%c7, %c0_28] : memref<27x128xf32, #tpu.memory_space<vmem>>, vector<1x128xf32>
    %66 = vector.shape_cast %65 : vector<1x128xf32> to vector<128xf32>
    %67 = vector.shape_cast %66 : vector<128xf32> to vector<1x1x1x128xf32>
    %68 = vector.broadcast %67 : vector<1x1x1x128xf32> to vector<2x8x8x128xf32>
    %69 = arith.mulf %7, %68 : vector<2x8x8x128xf32>
    %70 = arith.addf %64, %69 : vector<2x8x8x128xf32>
    %c8 = arith.constant 8 : index
    %c0_29 = arith.constant 0 : index
    %71 = vector.load %arg2[%c8, %c0_29] : memref<27x128xf32, #tpu.memory_space<vmem>>, vector<1x128xf32>
    %72 = vector.shape_cast %71 : vector<1x128xf32> to vector<128xf32>
    %73 = vector.shape_cast %72 : vector<128xf32> to vector<1x1x1x128xf32>
    %74 = vector.broadcast %73 : vector<1x1x1x128xf32> to vector<2x8x8x128xf32>
    %75 = arith.mulf %8, %74 : vector<2x8x8x128xf32>
    %76 = arith.addf %70, %75 : vector<2x8x8x128xf32>
    %77 = vector.shape_cast %76 : vector<2x8x8x128xf32> to vector<128x128xf32>
    %cst_30 = arith.constant dense<0.000000e+00> : vector<128xf32>
    %78 = vector.multi_reduction <add>, %77, %cst_30 [0] : vector<128x128xf32> to vector<128xf32>
    %79 = vector.shape_cast %78 : vector<128xf32> to vector<1x128xf32>
    %80 = arith.mulf %77, %77 : vector<128x128xf32>
    %cst_31 = arith.constant dense<0.000000e+00> : vector<128xf32>
    %81 = vector.multi_reduction <add>, %80, %cst_31 [0] : vector<128x128xf32> to vector<128xf32>
    %82 = vector.shape_cast %81 : vector<128xf32> to vector<1x128xf32>
    %cst_32 = arith.constant 1.280000e+02 : f32
    %83 = vector.broadcast %cst_32 : f32 to vector<1x128xf32>
    %84 = arith.divf %79, %83 : vector<1x128xf32>
    %cst_33 = arith.constant 1.280000e+02 : f32
    %85 = vector.broadcast %cst_33 : f32 to vector<1x128xf32>
    %86 = arith.divf %82, %85 : vector<1x128xf32>
    %87 = arith.mulf %84, %84 : vector<1x128xf32>
    %88 = arith.subf %86, %87 : vector<1x128xf32>
    %cst_34 = arith.constant 0.000000e+00 : f32
    %89 = vector.broadcast %cst_34 : f32 to vector<1x128xf32>
    %90 = arith.maximumf %88, %89 : vector<1x128xf32>
    %cst_35 = arith.constant 9.99999974E-6 : f32
    %91 = vector.broadcast %cst_35 : f32 to vector<1x128xf32>
    %92 = arith.addf %90, %91 : vector<1x128xf32>
    %93 = math.rsqrt %92 : vector<1x128xf32>
    %94 = vector.broadcast %84 : vector<1x128xf32> to vector<128x128xf32>
    %95 = arith.subf %77, %94 : vector<128x128xf32>
    %96 = vector.broadcast %93 : vector<1x128xf32> to vector<128x128xf32>
    %97 = arith.mulf %95, %96 : vector<128x128xf32>
    %cst_36 = arith.constant 0.000000e+00 : f32
    %98 = vector.broadcast %cst_36 : f32 to vector<128x128xf32>
    %99 = arith.maximumf %97, %98 : vector<128x128xf32>
    %c0_37 = arith.constant 0 : index
    %c0_38 = arith.constant 0 : index
    %c0_39 = arith.constant 0 : index
    %100 = vector.load %arg3[%c0_37, %c0_38, %c0_39] : memref<3x128x128xf32, #tpu.memory_space<vmem>>, vector<1x128x128xf32>
    %101 = vector.shape_cast %100 : vector<1x128x128xf32> to vector<128x128xf32>
    %cst_40 = arith.constant dense<0.000000e+00> : vector<128x128xf32>
    %102 = tpu.matmul %99, %101, %cst_40 {dimension_numbers = #tpu.dot_dimension_numbers<[1], [0], [0], [1], [0, 0, 1, 1], [], []>} : vector<128x128xf32>, vector<128x128xf32>, vector<128x128xf32> -> vector<128x128xf32>
    %cst_41 = arith.constant dense<0.000000e+00> : vector<128xf32>
    %103 = vector.multi_reduction <add>, %102, %cst_41 [0] : vector<128x128xf32> to vector<128xf32>
    %104 = vector.shape_cast %103 : vector<128xf32> to vector<1x128xf32>
    %105 = arith.mulf %102, %102 : vector<128x128xf32>
    %cst_42 = arith.constant dense<0.000000e+00> : vector<128xf32>
    %106 = vector.multi_reduction <add>, %105, %cst_42 [0] : vector<128x128xf32> to vector<128xf32>
    %107 = vector.shape_cast %106 : vector<128xf32> to vector<1x128xf32>
    %cst_43 = arith.constant 1.280000e+02 : f32
    %108 = vector.broadcast %cst_43 : f32 to vector<1x128xf32>
    %109 = arith.divf %104, %108 : vector<1x128xf32>
    %cst_44 = arith.constant 1.280000e+02 : f32
    %110 = vector.broadcast %cst_44 : f32 to vector<1x128xf32>
    %111 = arith.divf %107, %110 : vector<1x128xf32>
    %112 = arith.mulf %109, %109 : vector<1x128xf32>
    %113 = arith.subf %111, %112 : vector<1x128xf32>
    %cst_45 = arith.constant 0.000000e+00 : f32
    %114 = vector.broadcast %cst_45 : f32 to vector<1x128xf32>
    %115 = arith.maximumf %113, %114 : vector<1x128xf32>
    %cst_46 = arith.constant 9.99999974E-6 : f32
    %116 = vector.broadcast %cst_46 : f32 to vector<1x128xf32>
    %117 = arith.addf %115, %116 : vector<1x128xf32>
    %118 = math.rsqrt %117 : vector<1x128xf32>
    %119 = vector.broadcast %109 : vector<1x128xf32> to vector<128x128xf32>
    %120 = arith.subf %102, %119 : vector<128x128xf32>
    %121 = vector.broadcast %118 : vector<1x128xf32> to vector<128x128xf32>
    %122 = arith.mulf %120, %121 : vector<128x128xf32>
    %cst_47 = arith.constant 0.000000e+00 : f32
    %123 = vector.broadcast %cst_47 : f32 to vector<128x128xf32>
    %124 = arith.maximumf %122, %123 : vector<128x128xf32>
    %125 = vector.shape_cast %124 : vector<128x128xf32> to vector<2x8x8x128xf32>
    %c1_i32_48 = arith.constant 1 : i32
    %126 = tpu.dynamic_rotate %125 by %c1_i32_48 dim 2 : vector<2x8x8x128xf32>, i32 -> vector<2x8x8x128xf32>
    %cst_49 = arith.constant 0.000000e+00 : f32
    %127 = vector.broadcast %cst_49 : f32 to vector<2x8x8x128xf32>
    %128 = arith.select %2, %127, %126 : vector<2x8x8x128xi1>, vector<2x8x8x128xf32>
    %c7_i32_50 = arith.constant 7 : i32
    %129 = tpu.dynamic_rotate %125 by %c7_i32_50 dim 2 : vector<2x8x8x128xf32>, i32 -> vector<2x8x8x128xf32>
    %cst_51 = arith.constant 0.000000e+00 : f32
    %130 = vector.broadcast %cst_51 : f32 to vector<2x8x8x128xf32>
    %131 = arith.select %4, %130, %129 : vector<2x8x8x128xi1>, vector<2x8x8x128xf32>
    %cst_52 = arith.constant 0.000000e+00 : f32
    %132 = vector.broadcast %cst_52 : f32 to vector<2x1x8x128xf32>
    %133 = vector.extract_strided_slice %128 {offsets = [0, 0, 0, 0], sizes = [2, 7, 8, 128], strides = [1, 1, 1, 1]} : vector<2x8x8x128xf32> to vector<2x7x8x128xf32>
    %134 = tpu.concatenate %132, %133 in 1 : vector<2x1x8x128xf32>, vector<2x7x8x128xf32> -> vector<2x8x8x128xf32>
    %cst_53 = arith.constant 0.000000e+00 : f32
    %135 = vector.broadcast %cst_53 : f32 to vector<2x1x8x128xf32>
    %136 = vector.extract_strided_slice %128 {offsets = [0, 1, 0, 0], sizes = [2, 7, 8, 128], strides = [1, 1, 1, 1]} : vector<2x8x8x128xf32> to vector<2x7x8x128xf32>
    %137 = tpu.concatenate %136, %135 in 1 : vector<2x7x8x128xf32>, vector<2x1x8x128xf32> -> vector<2x8x8x128xf32>
    %c9 = arith.constant 9 : index
    %c0_54 = arith.constant 0 : index
    %138 = vector.load %arg2[%c9, %c0_54] : memref<27x128xf32, #tpu.memory_space<vmem>>, vector<1x128xf32>
    %139 = vector.shape_cast %138 : vector<1x128xf32> to vector<128xf32>
    %140 = vector.shape_cast %139 : vector<128xf32> to vector<1x1x1x128xf32>
    %141 = vector.broadcast %140 : vector<1x1x1x128xf32> to vector<2x8x8x128xf32>
    %142 = arith.mulf %134, %141 : vector<2x8x8x128xf32>
    %c12 = arith.constant 12 : index
    %c0_55 = arith.constant 0 : index
    %143 = vector.load %arg2[%c12, %c0_55] : memref<27x128xf32, #tpu.memory_space<vmem>>, vector<1x128xf32>
    %144 = vector.shape_cast %143 : vector<1x128xf32> to vector<128xf32>
    %145 = vector.shape_cast %144 : vector<128xf32> to vector<1x1x1x128xf32>
    %146 = vector.broadcast %145 : vector<1x1x1x128xf32> to vector<2x8x8x128xf32>
    %147 = arith.mulf %128, %146 : vector<2x8x8x128xf32>
    %148 = arith.addf %142, %147 : vector<2x8x8x128xf32>
    %c15 = arith.constant 15 : index
    %c0_56 = arith.constant 0 : index
    %149 = vector.load %arg2[%c15, %c0_56] : memref<27x128xf32, #tpu.memory_space<vmem>>, vector<1x128xf32>
    %150 = vector.shape_cast %149 : vector<1x128xf32> to vector<128xf32>
    %151 = vector.shape_cast %150 : vector<128xf32> to vector<1x1x1x128xf32>
    %152 = vector.broadcast %151 : vector<1x1x1x128xf32> to vector<2x8x8x128xf32>
    %153 = arith.mulf %137, %152 : vector<2x8x8x128xf32>
    %154 = arith.addf %148, %153 : vector<2x8x8x128xf32>
    %cst_57 = arith.constant 0.000000e+00 : f32
    %155 = vector.broadcast %cst_57 : f32 to vector<2x1x8x128xf32>
    %156 = vector.extract_strided_slice %125 {offsets = [0, 0, 0, 0], sizes = [2, 7, 8, 128], strides = [1, 1, 1, 1]} : vector<2x8x8x128xf32> to vector<2x7x8x128xf32>
    %157 = tpu.concatenate %155, %156 in 1 : vector<2x1x8x128xf32>, vector<2x7x8x128xf32> -> vector<2x8x8x128xf32>
    %cst_58 = arith.constant 0.000000e+00 : f32
    %158 = vector.broadcast %cst_58 : f32 to vector<2x1x8x128xf32>
    %159 = vector.extract_strided_slice %125 {offsets = [0, 1, 0, 0], sizes = [2, 7, 8, 128], strides = [1, 1, 1, 1]} : vector<2x8x8x128xf32> to vector<2x7x8x128xf32>
    %160 = tpu.concatenate %159, %158 in 1 : vector<2x7x8x128xf32>, vector<2x1x8x128xf32> -> vector<2x8x8x128xf32>
    %c10 = arith.constant 10 : index
    %c0_59 = arith.constant 0 : index
    %161 = vector.load %arg2[%c10, %c0_59] : memref<27x128xf32, #tpu.memory_space<vmem>>, vector<1x128xf32>
    %162 = vector.shape_cast %161 : vector<1x128xf32> to vector<128xf32>
    %163 = vector.shape_cast %162 : vector<128xf32> to vector<1x1x1x128xf32>
    %164 = vector.broadcast %163 : vector<1x1x1x128xf32> to vector<2x8x8x128xf32>
    %165 = arith.mulf %157, %164 : vector<2x8x8x128xf32>
    %166 = arith.addf %154, %165 : vector<2x8x8x128xf32>
    %c13 = arith.constant 13 : index
    %c0_60 = arith.constant 0 : index
    %167 = vector.load %arg2[%c13, %c0_60] : memref<27x128xf32, #tpu.memory_space<vmem>>, vector<1x128xf32>
    %168 = vector.shape_cast %167 : vector<1x128xf32> to vector<128xf32>
    %169 = vector.shape_cast %168 : vector<128xf32> to vector<1x1x1x128xf32>
    %170 = vector.broadcast %169 : vector<1x1x1x128xf32> to vector<2x8x8x128xf32>
    %171 = arith.mulf %125, %170 : vector<2x8x8x128xf32>
    %172 = arith.addf %166, %171 : vector<2x8x8x128xf32>
    %c16 = arith.constant 16 : index
    %c0_61 = arith.constant 0 : index
    %173 = vector.load %arg2[%c16, %c0_61] : memref<27x128xf32, #tpu.memory_space<vmem>>, vector<1x128xf32>
    %174 = vector.shape_cast %173 : vector<1x128xf32> to vector<128xf32>
    %175 = vector.shape_cast %174 : vector<128xf32> to vector<1x1x1x128xf32>
    %176 = vector.broadcast %175 : vector<1x1x1x128xf32> to vector<2x8x8x128xf32>
    %177 = arith.mulf %160, %176 : vector<2x8x8x128xf32>
    %178 = arith.addf %172, %177 : vector<2x8x8x128xf32>
    %cst_62 = arith.constant 0.000000e+00 : f32
    %179 = vector.broadcast %cst_62 : f32 to vector<2x1x8x128xf32>
    %180 = vector.extract_strided_slice %131 {offsets = [0, 0, 0, 0], sizes = [2, 7, 8, 128], strides = [1, 1, 1, 1]} : vector<2x8x8x128xf32> to vector<2x7x8x128xf32>
    %181 = tpu.concatenate %179, %180 in 1 : vector<2x1x8x128xf32>, vector<2x7x8x128xf32> -> vector<2x8x8x128xf32>
    %cst_63 = arith.constant 0.000000e+00 : f32
    %182 = vector.broadcast %cst_63 : f32 to vector<2x1x8x128xf32>
    %183 = vector.extract_strided_slice %131 {offsets = [0, 1, 0, 0], sizes = [2, 7, 8, 128], strides = [1, 1, 1, 1]} : vector<2x8x8x128xf32> to vector<2x7x8x128xf32>
    %184 = tpu.concatenate %183, %182 in 1 : vector<2x7x8x128xf32>, vector<2x1x8x128xf32> -> vector<2x8x8x128xf32>
    %c11 = arith.constant 11 : index
    %c0_64 = arith.constant 0 : index
    %185 = vector.load %arg2[%c11, %c0_64] : memref<27x128xf32, #tpu.memory_space<vmem>>, vector<1x128xf32>
    %186 = vector.shape_cast %185 : vector<1x128xf32> to vector<128xf32>
    %187 = vector.shape_cast %186 : vector<128xf32> to vector<1x1x1x128xf32>
    %188 = vector.broadcast %187 : vector<1x1x1x128xf32> to vector<2x8x8x128xf32>
    %189 = arith.mulf %181, %188 : vector<2x8x8x128xf32>
    %190 = arith.addf %178, %189 : vector<2x8x8x128xf32>
    %c14 = arith.constant 14 : index
    %c0_65 = arith.constant 0 : index
    %191 = vector.load %arg2[%c14, %c0_65] : memref<27x128xf32, #tpu.memory_space<vmem>>, vector<1x128xf32>
    %192 = vector.shape_cast %191 : vector<1x128xf32> to vector<128xf32>
    %193 = vector.shape_cast %192 : vector<128xf32> to vector<1x1x1x128xf32>
    %194 = vector.broadcast %193 : vector<1x1x1x128xf32> to vector<2x8x8x128xf32>
    %195 = arith.mulf %131, %194 : vector<2x8x8x128xf32>
    %196 = arith.addf %190, %195 : vector<2x8x8x128xf32>
    %c17 = arith.constant 17 : index
    %c0_66 = arith.constant 0 : index
    %197 = vector.load %arg2[%c17, %c0_66] : memref<27x128xf32, #tpu.memory_space<vmem>>, vector<1x128xf32>
    %198 = vector.shape_cast %197 : vector<1x128xf32> to vector<128xf32>
    %199 = vector.shape_cast %198 : vector<128xf32> to vector<1x1x1x128xf32>
    %200 = vector.broadcast %199 : vector<1x1x1x128xf32> to vector<2x8x8x128xf32>
    %201 = arith.mulf %184, %200 : vector<2x8x8x128xf32>
    %202 = arith.addf %196, %201 : vector<2x8x8x128xf32>
    %203 = vector.shape_cast %202 : vector<2x8x8x128xf32> to vector<128x128xf32>
    %cst_67 = arith.constant dense<0.000000e+00> : vector<128xf32>
    %204 = vector.multi_reduction <add>, %203, %cst_67 [0] : vector<128x128xf32> to vector<128xf32>
    %205 = vector.shape_cast %204 : vector<128xf32> to vector<1x128xf32>
    %206 = arith.mulf %203, %203 : vector<128x128xf32>
    %cst_68 = arith.constant dense<0.000000e+00> : vector<128xf32>
    %207 = vector.multi_reduction <add>, %206, %cst_68 [0] : vector<128x128xf32> to vector<128xf32>
    %208 = vector.shape_cast %207 : vector<128xf32> to vector<1x128xf32>
    %cst_69 = arith.constant 1.280000e+02 : f32
    %209 = vector.broadcast %cst_69 : f32 to vector<1x128xf32>
    %210 = arith.divf %205, %209 : vector<1x128xf32>
    %cst_70 = arith.constant 1.280000e+02 : f32
    %211 = vector.broadcast %cst_70 : f32 to vector<1x128xf32>
    %212 = arith.divf %208, %211 : vector<1x128xf32>
    %213 = arith.mulf %210, %210 : vector<1x128xf32>
    %214 = arith.subf %212, %213 : vector<1x128xf32>
    %cst_71 = arith.constant 0.000000e+00 : f32
    %215 = vector.broadcast %cst_71 : f32 to vector<1x128xf32>
    %216 = arith.maximumf %214, %215 : vector<1x128xf32>
    %cst_72 = arith.constant 9.99999974E-6 : f32
    %217 = vector.broadcast %cst_72 : f32 to vector<1x128xf32>
    %218 = arith.addf %216, %217 : vector<1x128xf32>
    %219 = math.rsqrt %218 : vector<1x128xf32>
    %220 = vector.broadcast %210 : vector<1x128xf32> to vector<128x128xf32>
    %221 = arith.subf %203, %220 : vector<128x128xf32>
    %222 = vector.broadcast %219 : vector<1x128xf32> to vector<128x128xf32>
    %223 = arith.mulf %221, %222 : vector<128x128xf32>
    %cst_73 = arith.constant 0.000000e+00 : f32
    %224 = vector.broadcast %cst_73 : f32 to vector<128x128xf32>
    %225 = arith.maximumf %223, %224 : vector<128x128xf32>
    %c1_74 = arith.constant 1 : index
    %c0_75 = arith.constant 0 : index
    %c0_76 = arith.constant 0 : index
    %226 = vector.load %arg3[%c1_74, %c0_75, %c0_76] : memref<3x128x128xf32, #tpu.memory_space<vmem>>, vector<1x128x128xf32>
    %227 = vector.shape_cast %226 : vector<1x128x128xf32> to vector<128x128xf32>
    %cst_77 = arith.constant dense<0.000000e+00> : vector<128x128xf32>
    %228 = tpu.matmul %225, %227, %cst_77 {dimension_numbers = #tpu.dot_dimension_numbers<[1], [0], [0], [1], [0, 0, 1, 1], [], []>} : vector<128x128xf32>, vector<128x128xf32>, vector<128x128xf32> -> vector<128x128xf32>
    %cst_78 = arith.constant dense<0.000000e+00> : vector<128xf32>
    %229 = vector.multi_reduction <add>, %228, %cst_78 [0] : vector<128x128xf32> to vector<128xf32>
    %230 = vector.shape_cast %229 : vector<128xf32> to vector<1x128xf32>
    %231 = arith.mulf %228, %228 : vector<128x128xf32>
    %cst_79 = arith.constant dense<0.000000e+00> : vector<128xf32>
    %232 = vector.multi_reduction <add>, %231, %cst_79 [0] : vector<128x128xf32> to vector<128xf32>
    %233 = vector.shape_cast %232 : vector<128xf32> to vector<1x128xf32>
    %cst_80 = arith.constant 1.280000e+02 : f32
    %234 = vector.broadcast %cst_80 : f32 to vector<1x128xf32>
    %235 = arith.divf %230, %234 : vector<1x128xf32>
    %cst_81 = arith.constant 1.280000e+02 : f32
    %236 = vector.broadcast %cst_81 : f32 to vector<1x128xf32>
    %237 = arith.divf %233, %236 : vector<1x128xf32>
    %238 = arith.mulf %235, %235 : vector<1x128xf32>
    %239 = arith.subf %237, %238 : vector<1x128xf32>
    %cst_82 = arith.constant 0.000000e+00 : f32
    %240 = vector.broadcast %cst_82 : f32 to vector<1x128xf32>
    %241 = arith.maximumf %239, %240 : vector<1x128xf32>
    %cst_83 = arith.constant 9.99999974E-6 : f32
    %242 = vector.broadcast %cst_83 : f32 to vector<1x128xf32>
    %243 = arith.addf %241, %242 : vector<1x128xf32>
    %244 = math.rsqrt %243 : vector<1x128xf32>
    %245 = vector.broadcast %235 : vector<1x128xf32> to vector<128x128xf32>
    %246 = arith.subf %228, %245 : vector<128x128xf32>
    %247 = vector.broadcast %244 : vector<1x128xf32> to vector<128x128xf32>
    %248 = arith.mulf %246, %247 : vector<128x128xf32>
    %cst_84 = arith.constant 0.000000e+00 : f32
    %249 = vector.broadcast %cst_84 : f32 to vector<128x128xf32>
    %250 = arith.maximumf %248, %249 : vector<128x128xf32>
    %251 = vector.shape_cast %250 : vector<128x128xf32> to vector<2x8x8x128xf32>
    %c1_i32_85 = arith.constant 1 : i32
    %252 = tpu.dynamic_rotate %251 by %c1_i32_85 dim 2 : vector<2x8x8x128xf32>, i32 -> vector<2x8x8x128xf32>
    %cst_86 = arith.constant 0.000000e+00 : f32
    %253 = vector.broadcast %cst_86 : f32 to vector<2x8x8x128xf32>
    %254 = arith.select %2, %253, %252 : vector<2x8x8x128xi1>, vector<2x8x8x128xf32>
    %c7_i32_87 = arith.constant 7 : i32
    %255 = tpu.dynamic_rotate %251 by %c7_i32_87 dim 2 : vector<2x8x8x128xf32>, i32 -> vector<2x8x8x128xf32>
    %cst_88 = arith.constant 0.000000e+00 : f32
    %256 = vector.broadcast %cst_88 : f32 to vector<2x8x8x128xf32>
    %257 = arith.select %4, %256, %255 : vector<2x8x8x128xi1>, vector<2x8x8x128xf32>
    %cst_89 = arith.constant 0.000000e+00 : f32
    %258 = vector.broadcast %cst_89 : f32 to vector<2x1x8x128xf32>
    %259 = vector.extract_strided_slice %254 {offsets = [0, 0, 0, 0], sizes = [2, 7, 8, 128], strides = [1, 1, 1, 1]} : vector<2x8x8x128xf32> to vector<2x7x8x128xf32>
    %260 = tpu.concatenate %258, %259 in 1 : vector<2x1x8x128xf32>, vector<2x7x8x128xf32> -> vector<2x8x8x128xf32>
    %cst_90 = arith.constant 0.000000e+00 : f32
    %261 = vector.broadcast %cst_90 : f32 to vector<2x1x8x128xf32>
    %262 = vector.extract_strided_slice %254 {offsets = [0, 1, 0, 0], sizes = [2, 7, 8, 128], strides = [1, 1, 1, 1]} : vector<2x8x8x128xf32> to vector<2x7x8x128xf32>
    %263 = tpu.concatenate %262, %261 in 1 : vector<2x7x8x128xf32>, vector<2x1x8x128xf32> -> vector<2x8x8x128xf32>
    %c18 = arith.constant 18 : index
    %c0_91 = arith.constant 0 : index
    %264 = vector.load %arg2[%c18, %c0_91] : memref<27x128xf32, #tpu.memory_space<vmem>>, vector<1x128xf32>
    %265 = vector.shape_cast %264 : vector<1x128xf32> to vector<128xf32>
    %266 = vector.shape_cast %265 : vector<128xf32> to vector<1x1x1x128xf32>
    %267 = vector.broadcast %266 : vector<1x1x1x128xf32> to vector<2x8x8x128xf32>
    %268 = arith.mulf %260, %267 : vector<2x8x8x128xf32>
    %c21 = arith.constant 21 : index
    %c0_92 = arith.constant 0 : index
    %269 = vector.load %arg2[%c21, %c0_92] : memref<27x128xf32, #tpu.memory_space<vmem>>, vector<1x128xf32>
    %270 = vector.shape_cast %269 : vector<1x128xf32> to vector<128xf32>
    %271 = vector.shape_cast %270 : vector<128xf32> to vector<1x1x1x128xf32>
    %272 = vector.broadcast %271 : vector<1x1x1x128xf32> to vector<2x8x8x128xf32>
    %273 = arith.mulf %254, %272 : vector<2x8x8x128xf32>
    %274 = arith.addf %268, %273 : vector<2x8x8x128xf32>
    %c24 = arith.constant 24 : index
    %c0_93 = arith.constant 0 : index
    %275 = vector.load %arg2[%c24, %c0_93] : memref<27x128xf32, #tpu.memory_space<vmem>>, vector<1x128xf32>
    %276 = vector.shape_cast %275 : vector<1x128xf32> to vector<128xf32>
    %277 = vector.shape_cast %276 : vector<128xf32> to vector<1x1x1x128xf32>
    %278 = vector.broadcast %277 : vector<1x1x1x128xf32> to vector<2x8x8x128xf32>
    %279 = arith.mulf %263, %278 : vector<2x8x8x128xf32>
    %280 = arith.addf %274, %279 : vector<2x8x8x128xf32>
    %cst_94 = arith.constant 0.000000e+00 : f32
    %281 = vector.broadcast %cst_94 : f32 to vector<2x1x8x128xf32>
    %282 = vector.extract_strided_slice %251 {offsets = [0, 0, 0, 0], sizes = [2, 7, 8, 128], strides = [1, 1, 1, 1]} : vector<2x8x8x128xf32> to vector<2x7x8x128xf32>
    %283 = tpu.concatenate %281, %282 in 1 : vector<2x1x8x128xf32>, vector<2x7x8x128xf32> -> vector<2x8x8x128xf32>
    %cst_95 = arith.constant 0.000000e+00 : f32
    %284 = vector.broadcast %cst_95 : f32 to vector<2x1x8x128xf32>
    %285 = vector.extract_strided_slice %251 {offsets = [0, 1, 0, 0], sizes = [2, 7, 8, 128], strides = [1, 1, 1, 1]} : vector<2x8x8x128xf32> to vector<2x7x8x128xf32>
    %286 = tpu.concatenate %285, %284 in 1 : vector<2x7x8x128xf32>, vector<2x1x8x128xf32> -> vector<2x8x8x128xf32>
    %c19 = arith.constant 19 : index
    %c0_96 = arith.constant 0 : index
    %287 = vector.load %arg2[%c19, %c0_96] : memref<27x128xf32, #tpu.memory_space<vmem>>, vector<1x128xf32>
    %288 = vector.shape_cast %287 : vector<1x128xf32> to vector<128xf32>
    %289 = vector.shape_cast %288 : vector<128xf32> to vector<1x1x1x128xf32>
    %290 = vector.broadcast %289 : vector<1x1x1x128xf32> to vector<2x8x8x128xf32>
    %291 = arith.mulf %283, %290 : vector<2x8x8x128xf32>
    %292 = arith.addf %280, %291 : vector<2x8x8x128xf32>
    %c22 = arith.constant 22 : index
    %c0_97 = arith.constant 0 : index
    %293 = vector.load %arg2[%c22, %c0_97] : memref<27x128xf32, #tpu.memory_space<vmem>>, vector<1x128xf32>
    %294 = vector.shape_cast %293 : vector<1x128xf32> to vector<128xf32>
    %295 = vector.shape_cast %294 : vector<128xf32> to vector<1x1x1x128xf32>
    %296 = vector.broadcast %295 : vector<1x1x1x128xf32> to vector<2x8x8x128xf32>
    %297 = arith.mulf %251, %296 : vector<2x8x8x128xf32>
    %298 = arith.addf %292, %297 : vector<2x8x8x128xf32>
    %c25 = arith.constant 25 : index
    %c0_98 = arith.constant 0 : index
    %299 = vector.load %arg2[%c25, %c0_98] : memref<27x128xf32, #tpu.memory_space<vmem>>, vector<1x128xf32>
    %300 = vector.shape_cast %299 : vector<1x128xf32> to vector<128xf32>
    %301 = vector.shape_cast %300 : vector<128xf32> to vector<1x1x1x128xf32>
    %302 = vector.broadcast %301 : vector<1x1x1x128xf32> to vector<2x8x8x128xf32>
    %303 = arith.mulf %286, %302 : vector<2x8x8x128xf32>
    %304 = arith.addf %298, %303 : vector<2x8x8x128xf32>
    %cst_99 = arith.constant 0.000000e+00 : f32
    %305 = vector.broadcast %cst_99 : f32 to vector<2x1x8x128xf32>
    %306 = vector.extract_strided_slice %257 {offsets = [0, 0, 0, 0], sizes = [2, 7, 8, 128], strides = [1, 1, 1, 1]} : vector<2x8x8x128xf32> to vector<2x7x8x128xf32>
    %307 = tpu.concatenate %305, %306 in 1 : vector<2x1x8x128xf32>, vector<2x7x8x128xf32> -> vector<2x8x8x128xf32>
    %cst_100 = arith.constant 0.000000e+00 : f32
    %308 = vector.broadcast %cst_100 : f32 to vector<2x1x8x128xf32>
    %309 = vector.extract_strided_slice %257 {offsets = [0, 1, 0, 0], sizes = [2, 7, 8, 128], strides = [1, 1, 1, 1]} : vector<2x8x8x128xf32> to vector<2x7x8x128xf32>
    %310 = tpu.concatenate %309, %308 in 1 : vector<2x7x8x128xf32>, vector<2x1x8x128xf32> -> vector<2x8x8x128xf32>
    %c20 = arith.constant 20 : index
    %c0_101 = arith.constant 0 : index
    %311 = vector.load %arg2[%c20, %c0_101] : memref<27x128xf32, #tpu.memory_space<vmem>>, vector<1x128xf32>
    %312 = vector.shape_cast %311 : vector<1x128xf32> to vector<128xf32>
    %313 = vector.shape_cast %312 : vector<128xf32> to vector<1x1x1x128xf32>
    %314 = vector.broadcast %313 : vector<1x1x1x128xf32> to vector<2x8x8x128xf32>
    %315 = arith.mulf %307, %314 : vector<2x8x8x128xf32>
    %316 = arith.addf %304, %315 : vector<2x8x8x128xf32>
    %c23 = arith.constant 23 : index
    %c0_102 = arith.constant 0 : index
    %317 = vector.load %arg2[%c23, %c0_102] : memref<27x128xf32, #tpu.memory_space<vmem>>, vector<1x128xf32>
    %318 = vector.shape_cast %317 : vector<1x128xf32> to vector<128xf32>
    %319 = vector.shape_cast %318 : vector<128xf32> to vector<1x1x1x128xf32>
    %320 = vector.broadcast %319 : vector<1x1x1x128xf32> to vector<2x8x8x128xf32>
    %321 = arith.mulf %257, %320 : vector<2x8x8x128xf32>
    %322 = arith.addf %316, %321 : vector<2x8x8x128xf32>
    %c26 = arith.constant 26 : index
    %c0_103 = arith.constant 0 : index
    %323 = vector.load %arg2[%c26, %c0_103] : memref<27x128xf32, #tpu.memory_space<vmem>>, vector<1x128xf32>
    %324 = vector.shape_cast %323 : vector<1x128xf32> to vector<128xf32>
    %325 = vector.shape_cast %324 : vector<128xf32> to vector<1x1x1x128xf32>
    %326 = vector.broadcast %325 : vector<1x1x1x128xf32> to vector<2x8x8x128xf32>
    %327 = arith.mulf %310, %326 : vector<2x8x8x128xf32>
    %328 = arith.addf %322, %327 : vector<2x8x8x128xf32>
    %329 = vector.shape_cast %328 : vector<2x8x8x128xf32> to vector<128x128xf32>
    %cst_104 = arith.constant dense<0.000000e+00> : vector<128xf32>
    %330 = vector.multi_reduction <add>, %329, %cst_104 [0] : vector<128x128xf32> to vector<128xf32>
    %331 = vector.shape_cast %330 : vector<128xf32> to vector<1x128xf32>
    %332 = arith.mulf %329, %329 : vector<128x128xf32>
    %cst_105 = arith.constant dense<0.000000e+00> : vector<128xf32>
    %333 = vector.multi_reduction <add>, %332, %cst_105 [0] : vector<128x128xf32> to vector<128xf32>
    %334 = vector.shape_cast %333 : vector<128xf32> to vector<1x128xf32>
    %cst_106 = arith.constant 1.280000e+02 : f32
    %335 = vector.broadcast %cst_106 : f32 to vector<1x128xf32>
    %336 = arith.divf %331, %335 : vector<1x128xf32>
    %cst_107 = arith.constant 1.280000e+02 : f32
    %337 = vector.broadcast %cst_107 : f32 to vector<1x128xf32>
    %338 = arith.divf %334, %337 : vector<1x128xf32>
    %339 = arith.mulf %336, %336 : vector<1x128xf32>
    %340 = arith.subf %338, %339 : vector<1x128xf32>
    %cst_108 = arith.constant 0.000000e+00 : f32
    %341 = vector.broadcast %cst_108 : f32 to vector<1x128xf32>
    %342 = arith.maximumf %340, %341 : vector<1x128xf32>
    %cst_109 = arith.constant 9.99999974E-6 : f32
    %343 = vector.broadcast %cst_109 : f32 to vector<1x128xf32>
    %344 = arith.addf %342, %343 : vector<1x128xf32>
    %345 = math.rsqrt %344 : vector<1x128xf32>
    %346 = vector.broadcast %336 : vector<1x128xf32> to vector<128x128xf32>
    %347 = arith.subf %329, %346 : vector<128x128xf32>
    %348 = vector.broadcast %345 : vector<1x128xf32> to vector<128x128xf32>
    %349 = arith.mulf %347, %348 : vector<128x128xf32>
    %cst_110 = arith.constant 0.000000e+00 : f32
    %350 = vector.broadcast %cst_110 : f32 to vector<128x128xf32>
    %351 = arith.maximumf %349, %350 : vector<128x128xf32>
    %c2_111 = arith.constant 2 : index
    %c0_112 = arith.constant 0 : index
    %c0_113 = arith.constant 0 : index
    %352 = vector.load %arg3[%c2_111, %c0_112, %c0_113] : memref<3x128x128xf32, #tpu.memory_space<vmem>>, vector<1x128x128xf32>
    %353 = vector.shape_cast %352 : vector<1x128x128xf32> to vector<128x128xf32>
    %cst_114 = arith.constant dense<0.000000e+00> : vector<128x128xf32>
    %354 = tpu.matmul %351, %353, %cst_114 {dimension_numbers = #tpu.dot_dimension_numbers<[1], [0], [0], [1], [0, 0, 1, 1], [], []>} : vector<128x128xf32>, vector<128x128xf32>, vector<128x128xf32> -> vector<128x128xf32>
    %cst_115 = arith.constant dense<0.000000e+00> : vector<128xf32>
    %355 = vector.multi_reduction <add>, %354, %cst_115 [0] : vector<128x128xf32> to vector<128xf32>
    %356 = vector.shape_cast %355 : vector<128xf32> to vector<1x128xf32>
    %357 = arith.mulf %354, %354 : vector<128x128xf32>
    %cst_116 = arith.constant dense<0.000000e+00> : vector<128xf32>
    %358 = vector.multi_reduction <add>, %357, %cst_116 [0] : vector<128x128xf32> to vector<128xf32>
    %359 = vector.shape_cast %358 : vector<128xf32> to vector<1x128xf32>
    %cst_117 = arith.constant 1.280000e+02 : f32
    %360 = vector.broadcast %cst_117 : f32 to vector<1x128xf32>
    %361 = arith.divf %356, %360 : vector<1x128xf32>
    %cst_118 = arith.constant 1.280000e+02 : f32
    %362 = vector.broadcast %cst_118 : f32 to vector<1x128xf32>
    %363 = arith.divf %359, %362 : vector<1x128xf32>
    %364 = arith.mulf %361, %361 : vector<1x128xf32>
    %365 = arith.subf %363, %364 : vector<1x128xf32>
    %cst_119 = arith.constant 0.000000e+00 : f32
    %366 = vector.broadcast %cst_119 : f32 to vector<1x128xf32>
    %367 = arith.maximumf %365, %366 : vector<1x128xf32>
    %cst_120 = arith.constant 9.99999974E-6 : f32
    %368 = vector.broadcast %cst_120 : f32 to vector<1x128xf32>
    %369 = arith.addf %367, %368 : vector<1x128xf32>
    %370 = math.rsqrt %369 : vector<1x128xf32>
    %371 = vector.broadcast %361 : vector<1x128xf32> to vector<128x128xf32>
    %372 = arith.subf %354, %371 : vector<128x128xf32>
    %373 = vector.broadcast %370 : vector<1x128xf32> to vector<128x128xf32>
    %374 = arith.mulf %372, %373 : vector<128x128xf32>
    %cst_121 = arith.constant 0.000000e+00 : f32
    %375 = vector.broadcast %cst_121 : f32 to vector<128x128xf32>
    %376 = arith.maximumf %374, %375 : vector<128x128xf32>
    %377 = vector.shape_cast %376 : vector<128x128xf32> to vector<2x8x8x128xf32>
    %c0_122 = arith.constant 0 : index
    %c0_123 = arith.constant 0 : index
    %c0_124 = arith.constant 0 : index
    %c0_125 = arith.constant 0 : index
    %378 = vector.load %arg4[%c0_122, %c0_123, %c0_124, %c0_125] : memref<2x8x8x128xf32, #tpu.memory_space<vmem>>, vector<2x8x8x128xf32>
    tpu.vector_store %arg4[%c0_122, %c0_123, %c0_124, %c0_125], %377 {strides = array<i32>} : memref<2x8x8x128xf32, #tpu.memory_space<vmem>>, vector<2x8x8x128xf32>,
    return
  }
  func.func @transform_0(%arg0: i32) -> (i32, i32, i32, i32) {
    %c0_i32 = arith.constant 0 : i32
    %c0_i32_0 = arith.constant 0 : i32
    %c0_i32_1 = arith.constant 0 : i32
    %c0_i32_2 = arith.constant 0 : i32
    %c0_i32_3 = arith.constant 0 : i32
    return %c0_i32, %c0_i32_0, %c0_i32_1, %c0_i32_2 : i32, i32, i32, i32
  }
  func.func @transform_1(%arg0: i32) -> (i32, i32) {
    %c0_i32 = arith.constant 0 : i32
    %c0_i32_0 = arith.constant 0 : i32
    %c0_i32_1 = arith.constant 0 : i32
    return %c0_i32, %c0_i32_0 : i32, i32
  }
  func.func @transform_2(%arg0: i32) -> (i32, i32, i32) {
    %c0_i32 = arith.constant 0 : i32
    %c0_i32_0 = arith.constant 0 : i32
    %c0_i32_1 = arith.constant 0 : i32
    %c0_i32_2 = arith.constant 0 : i32
    return %c0_i32, %c0_i32_0, %c0_i32_1 : i32, i32, i32
  }
  func.func @transform_3(%arg0: i32) -> (i32, i32, i32, i32) {
    %c0_i32 = arith.constant 0 : i32
    %c0_i32_0 = arith.constant 0 : i32
    %c0_i32_1 = arith.constant 0 : i32
    %c0_i32_2 = arith.constant 0 : i32
    %c0_i32_3 = arith.constant 0 : i32
    return %c0_i32, %c0_i32_0, %c0_i32_1, %c0_i32_2 : i32, i32, i32, i32
  }
}

</mosaic_0001>

<bundles_post_ra>
// kernel: block4_sf_forward.1
= control target key start
LH: loop header
LB: loop body
LE: loop exit
PB: predicated region body
PF: predicated region fallthrough
CT: control target
= control target key end

     0   :  { %v15_v24 = vlaneseq  ;;  %s5525_s0 = inlined_call_operand.vmem [shape: f32[2,16,16,128], index: 0, kind: input, shape index: {}]   ;;  %s5526_s1 = inlined_call_operand.vmem [shape: f32[27,128], index: 1, kind: input, shape index: {}]   ;;  %s5527_s2 = inlined_call_operand.vmem [shape: f32[3,128,128], index: 2, kind: input, shape index: {}]   ;;  %s5528_s3 = inlined_call_operand.hbm [shape: f32[2,8,8,128], index: 3, kind: output, shape index: {}]  }
   0x1   :  { %v636_v0 = vld [vmem:[%s5527_s2] sm:$0xff]  ;;  %v637_v1 = vld [vmem:[%s5527_s2 + $0x8] sm:$0xff]  ;;  %v638_v2 = vld [vmem:[%s5527_s2 + $0x10] sm:$0xff] }
   0x2   :  { %v2885_v3 = vpack.c.bf16 %v637_v1, %v636_v0  ;;  %v639_v4 = vld [vmem:[%s5527_s2 + $0x18] sm:$0xff]  ;;  %v640_v6 = vld [vmem:[%s5527_s2 + $0x20] sm:$0xff]  ;;  %v641_v7 = vld [vmem:[%s5527_s2 + $0x28] sm:$0xff]  ;;  %v3107_v25 = vshrl.u32 %v15_v24, 7 }
   0x3   :  { %v2889_v5 = vpack.c.bf16 %v639_v4, %v638_v2  ;;  %v2893_v8 = vpack.c.bf16 %v641_v7, %v640_v6  ;;  %v642_v9 = vld [vmem:[%s5527_s2 + $0x30] sm:$0xff]  ;;  %v643_v10 = vld [vmem:[%s5527_s2 + $0x38] sm:$0xff]  ;;  %v644_v12 = vld [vmem:[%s5527_s2 + $0x40] sm:$0xff] }
   0x4   :  { %2886 = vmatprep.subr.bf16.mxu0 %v2885_v3  ;;  %v2897_v11 = vpack.c.bf16 %v643_v10, %v642_v9  ;;  %v645_v13 = vld [vmem:[%s5527_s2 + $0x48] sm:$0xff]  ;;  %v646_v15 = vld [vmem:[%s5527_s2 + $0x50] sm:$0xff]  ;;  %v647_v16 = vld [vmem:[%s5527_s2 + $0x58] sm:$0xff]  ;;  %5627 = vst [vmem:[#allocation5_spill] sm:$0xff] %v3107_v25 }
   0x5   :  { %2888 = vmatpush3.bf16.msra.mxu0 %v2885_v3  ;;  %v2901_v14 = vpack.c.bf16 %v645_v13, %v644_v12  ;;  %v2905_v17 = vpack.c.bf16 %v647_v16, %v646_v15  ;;  %v648_v18 = vld [vmem:[%s5527_s2 + $0x60] sm:$0xff]  ;;  %v649_v19 = vld [vmem:[%s5527_s2 + $0x68] sm:$0xff]  ;;  %v650_v21 = vld [vmem:[%s5527_s2 + $0x70] sm:$0xff] }
   0x6   :  { %2890 = vmatprep.subr.bf16.mxu0 %v2889_v5  ;;  %v2909_v20 = vpack.c.bf16 %v649_v19, %v648_v18  ;;  %v651_v22 = vld [vmem:[%s5527_s2 + $0x78] sm:$0xff]  ;;  %v3112_v26 = vld [vmem:[%s5525_s0 + $0x1] ss:$2 sm:$0xff] }
   0x7   :  { %v2913_v23 = vpack.c.bf16 %v651_v22, %v650_v21  ;;  %5628 = vst [vmem:[#allocation6_spill] sm:$0xff] %v3112_v26  ;;  %v3117_v27 = vld [vmem:[%s5525_s0 + $0x21] ss:$2 sm:$0xff] }
   0x8   :  { %5629 = vst [vmem:[#allocation7_spill] sm:$0xff] %v3117_v27  ;;  %v3122_v28 = vld [vmem:[%s5525_s0 + $0x41] ss:$2 sm:$0xff] }
   0x9   :  { %2892 = vmatpush3.bf16.msra.mxu0 %v2889_v5  ;;  %5630 = vst [vmem:[#allocation8_spill] sm:$0xff] %v3122_v28  ;;  %v3127_v29 = vld [vmem:[%s5525_s0 + $0x61] ss:$2 sm:$0xff] }
   0xa   :  { %2894 = vmatprep.subr.bf16.mxu0 %v2893_v8  ;;  %5631 = vst [vmem:[#allocation9_spill] sm:$0xff] %v3127_v29  ;;  %v3132_v30 = vld [vmem:[%s5525_s0 + $0x81] ss:$2 sm:$0xff] }
   0xb   :  { %5632 = vst [vmem:[#allocation10_spill] sm:$0xff] %v3132_v30  ;;  %v3137_v31 = vld [vmem:[%s5525_s0 + $0xa1] ss:$2 sm:$0xff] }
   0xc   :  { %5633 = vst [vmem:[#allocation11_spill] sm:$0xff] %v3137_v31  ;;  %v3142_v32 = vld [vmem:[%s5525_s0 + $0xc1] ss:$2 sm:$0xff] }
   0xd   :  { %2896 = vmatpush3.bf16.msra.mxu0 %v2893_v8  ;;  %5634 = vst [vmem:[#allocation12_spill] sm:$0xff] %v3142_v32  ;;  %v3147_v33 = vld [vmem:[%s5525_s0 + $0xe1] ss:$2 sm:$0xff] }
   0xe   :  { %2898 = vmatprep.subr.bf16.mxu0 %v2897_v11  ;;  %5635 = vst [vmem:[#allocation13_spill] sm:$0xff] %v3147_v33 }
  0x11   :  { %2900 = vmatpush3.bf16.msra.mxu0 %v2897_v11 }
  0x12   :  { %2902 = vmatprep.subr.bf16.mxu0 %v2901_v14 }
  0x15   :  { %2904 = vmatpush3.bf16.msra.mxu0 %v2901_v14 }
  0x16   :  { %2906 = vmatprep.subr.bf16.mxu0 %v2905_v17 }
  0x19   :  { %2908 = vmatpush3.bf16.msra.mxu0 %v2905_v17 }
  0x1a   :  { %2910 = vmatprep.subr.bf16.mxu0 %v2909_v20 }
  0x1d   :  { %2912 = vmatpush3.bf16.msra.mxu0 %v2909_v20 }
  0x1e   :  { %2914 = vmatprep.subr.bf16.mxu0 %v2913_v23 }
  0x21   :  { %2916 = vmatpush3.bf16.msra.mxu0 %v2913_v23 }
  0x22   :  { %8 = vsyncpa [#allocation3], 0  ;;  %v3152_v34 = vld [vmem:[%s5525_s0 + $0x101] ss:$2 sm:$0xff]  ;;  %vm17_vm0 = vcmp.eq.s32.totalorder %v3107_v25, 0  ;;  %v146_v41 = vrot.slane %v3112_v26, 7 }
  0x23   :  { %5636 = vst [vmem:[#allocation14_spill] sm:$0xff] %v3152_v34  ;;  %v3157_v35 = vld [vmem:[%s5525_s0 + $0x121] ss:$2 sm:$0xff]  ;;  %v147_v42 = vrot.slane %v3117_v27, 7  ;;  %v148_v43 = vrot.slane %v3122_v28, 7  ;;  %v149_v45 = vrot.slane %v3127_v29, 7 }
  0x24   :  { %5637 = vst [vmem:[#allocation15_spill] sm:$0xff] %v3157_v35  ;;  %v3162_v36 = vld [vmem:[%s5525_s0 + $0x141] ss:$2 sm:$0xff]  ;;  %v150_v46 = vrot.slane %v3132_v30, 7  ;;  %v151_v47 = vrot.slane %v3137_v31, 7  ;;  %v152_v48 = vrot.slane %v3142_v32, 7 }
  0x25   :  { %5638 = vst [vmem:[#allocation16_spill] sm:$0xff] %v3162_v36  ;;  %v3167_v37 = vld [vmem:[%s5525_s0 + $0x161] ss:$2 sm:$0xff]  ;;  %v153_v49 = vrot.slane %v3147_v33, 7  ;;  %v154_v50 = vrot.slane %v3152_v34, 7  ;;  %v155_v51 = vrot.slane %v3157_v35, 7 }
  0x26   :  { %5639 = vst [vmem:[#allocation17_spill] sm:$0xff] %v3167_v37  ;;  %v3172_v38 = vld [vmem:[%s5525_s0 + $0x181] ss:$2 sm:$0xff]  ;;  %v156_v52 = vrot.slane %v3162_v36, 7  ;;  %v3204_v53 = vld [vmem:[%s5525_s0 + $0x11] ss:$2 sm:$0xff] }
  0x27   :  { %5640 = vst [vmem:[#allocation18_spill] sm:$0xff] %v3172_v38  ;;  %v3177_v39 = vld [vmem:[%s5525_s0 + $0x1a1] ss:$2 sm:$0xff]  ;;  %v3209_v54 = vld [vmem:[%s5525_s0 + $0x31] ss:$2 sm:$0xff]  ;;  %v157_v56 = vrot.slane %v3167_v37, 7 }
  0x28   :  { %5641 = vst [vmem:[#allocation19_spill] sm:$0xff] %v3177_v39  ;;  %v3183_v40 = vld [vmem:[%s5525_s0 + $0x1c1] ss:$2 sm:$0xff]  ;;  %v3214_v55 = vld [vmem:[%s5525_s0 + $0x51] ss:$2 sm:$0xff]  ;;  %v158_v57 = vrot.slane %v3172_v38, 7 }
  0x29   :  { %5642 = vst [vmem:[#allocation20_spill] sm:$0xff] %v3183_v40  ;;  %v3191_v44 = vld [vmem:[%s5525_s0 + $0x1e1] ss:$2 sm:$0xff]  ;;  %v159_v58 = vrot.slane %v3177_v39, 7  ;;  %v160_v59 = vrot.slane %v3183_v40, 7  ;;  %v3243_v1 = vsel %vm17_vm0, 0.0, %v146_v41 }
  0x2a   :  { %5643 = vst [vmem:[#allocation21_spill] sm:$0xff] %v3191_v44  ;;  %v3223_v60 = vld [vmem:[%s5525_s0 + $0x71] ss:$2 sm:$0xff]  ;;  %v161_v0 = vrot.slane %v3191_v44, 7  ;;  %5644 = vst [vmem:[#allocation22_spill] sm:$0xff] %v3243_v1  ;;  %v3247_v2 = vsel %vm17_vm0, 0.0, %v147_v42 }
  0x2b   :  { %v3228_v61 = vld [vmem:[%s5525_s0 + $0x91] ss:$2 sm:$0xff]  ;;  %5645 = vst [vmem:[#allocation23_spill] sm:$0xff] %v3247_v2  ;;  %v3251_v3 = vsel %vm17_vm0, 0.0, %v148_v43  ;;  %v3275_v8 = vsel %vm17_vm0, 0.0, %v149_v45  ;;  %v3279_v9 = vsel %vm17_vm0, 0.0, %v150_v46 }
  0x2c   :  { %v3233_v62 = vld [vmem:[%s5525_s0 + $0xb1] ss:$2 sm:$0xff]  ;;  %5646 = vst [vmem:[#allocation24_spill] sm:$0xff] %v3251_v3  ;;  %5648 = vst [vmem:[#allocation26_spill] sm:$0xff] %v3275_v8  ;;  %v3283_v10 = vsel %vm17_vm0, 0.0, %v151_v47  ;;  %v3287_v11 = vsel %vm17_vm0, 0.0, %v152_v48 }
  0x2d   :  { %v3238_v63 = vld [vmem:[%s5525_s0 + $0xd1] ss:$2 sm:$0xff]  ;;  %5649 = vst [vmem:[#allocation27_spill] sm:$0xff] %v3279_v9  ;;  %5650 = vst [vmem:[#allocation28_spill] sm:$0xff] %v3283_v10  ;;  %v3301_v14 = vsel %vm17_vm0, 0.0, %v153_v49  ;;  %v3305_v15 = vsel %vm17_vm0, 0.0, %v154_v50 }
  0x2e   :  { %v3256_v4 = vld [vmem:[%s5525_s0 + $0xf1] ss:$2 sm:$0xff]  ;;  %5651 = vst [vmem:[#allocation29_spill] sm:$0xff] %v3287_v11  ;;  %5654 = vst [vmem:[#allocation32_spill] sm:$0xff] %v3301_v14  ;;  %v3309_v16 = vsel %vm17_vm0, 0.0, %v155_v51  ;;  %v3313_v17 = vsel %vm17_vm0, 0.0, %v156_v52 }
  0x2f   :  { %5647 = vst [vmem:[#allocation25_spill] sm:$0xff] %v3256_v4  ;;  %v3261_v5 = vld [vmem:[%s5525_s0 + $0x111] ss:$2 sm:$0xff]  ;;  %5655 = vst [vmem:[#allocation33_spill] sm:$0xff] %v3305_v15  ;;  %v3322_v19 = vsel %vm17_vm0, 0.0, %v157_v56  ;;  %v3326_v20 = vsel %vm17_vm0, 0.0, %v158_v57 }
  0x30   :  { %v3266_v6 = vld [vmem:[%s5525_s0 + $0x131] ss:$2 sm:$0xff]  ;;  %5656 = vst [vmem:[#allocation34_spill] sm:$0xff] %v3309_v16  ;;  %5657 = vst [vmem:[#allocation35_spill] sm:$0xff] %v3313_v17  ;;  %v3330_v21 = vsel %vm17_vm0, 0.0, %v159_v58  ;;  %v3334_v22 = vsel %vm17_vm0, 0.0, %v160_v59 }
  0x31   :  { %v3271_v7 = vld [vmem:[%s5525_s0 + $0x151] ss:$2 sm:$0xff]  ;;  %5659 = vst [vmem:[#allocation37_spill] sm:$0xff] %v3322_v19  ;;  %5660 = vst [vmem:[#allocation38_spill] sm:$0xff] %v3326_v20  ;;  %v3343_v24 = vsel %vm17_vm0, 0.0, %v161_v0  ;;  %v178_v41 = vrot.slane %v3204_v53, 7 }
  0x32   :  { %v3292_v12 = vld [vmem:[%s5525_s0 + $0x171] ss:$2 sm:$0xff]  ;;  %5661 = vst [vmem:[#allocation39_spill] sm:$0xff] %v3330_v21  ;;  %5662 = vst [vmem:[#allocation40_spill] sm:$0xff] %v3334_v22  ;;  %v179_v42 = vrot.slane %v3209_v54, 7  ;;  %v180_v43 = vrot.slane %v3214_v55, 7 }
  0x33   :  { %5652 = vst [vmem:[#allocation30_spill] sm:$0xff] %v3292_v12  ;;  %v3297_v13 = vld [vmem:[%s5525_s0 + $0x191] ss:$2 sm:$0xff]  ;;  %5664 = vst [vmem:[#allocation42_spill] sm:$0xff] %v3343_v24  ;;  %v181_v46 = vrot.slane %v3223_v60, 7  ;;  %v182_v47 = vrot.slane %v3228_v61, 7 }
  0x34   :  { %5653 = vst [vmem:[#allocation31_spill] sm:$0xff] %v3297_v13  ;;  %v3318_v18 = vld [vmem:[%s5525_s0 + $0x1b1] ss:$2 sm:$0xff]  ;;  %v183_v48 = vrot.slane %v3233_v62, 7  ;;  %v184_v49 = vrot.slane %v3238_v63, 7  ;;  %v185_v50 = vrot.slane %v3256_v4, 7 }
  0x35   :  { %5658 = vst [vmem:[#allocation36_spill] sm:$0xff] %v3318_v18  ;;  %v3339_v23 = vld [vmem:[%s5525_s0 + $0x1d1] ss:$2 sm:$0xff]  ;;  %v186_v51 = vrot.slane %v3261_v5, 7  ;;  %v187_v52 = vrot.slane %v3266_v6, 7  ;;  %v188_v56 = vrot.slane %v3271_v7, 7 }
  0x36   :  { %5663 = vst [vmem:[#allocation41_spill] sm:$0xff] %v3339_v23  ;;  %v3351_v45 = vld [vmem:[%s5525_s0 + $0x1f1] ss:$2 sm:$0xff]  ;;  %v189_v57 = vrot.slane %v3292_v12, 7  ;;  %v190_v58 = vrot.slane %v3297_v13, 7  ;;  %v191_v59 = vrot.slane %v3318_v18, 7 }
  0x37   :  { %5665 = vst [vmem:[#allocation43_spill] sm:$0xff] %v3351_v45  ;;  %v192_v0 = vrot.slane %v3339_v23, 7  ;;  %v3368_v40 = vsel %vm17_vm0, 0.0, %v178_v41  ;;  %v3372_v4 = vsel %vm17_vm0, 0.0, %v179_v42  ;;  %v3376_v39 = vsel %vm17_vm0, 0.0, %v180_v43  ;;  %v5696_v25 = vld [vmem:[#allocation22_spill] sm:$0xff] }
  0x38   :  { %5666 = vst [vmem:[#allocation44_spill] sm:$0xff] %v3368_v40  ;;  %5667 = vst [vmem:[#allocation45_spill] sm:$0xff] %v3372_v4  ;;  %v3380_v38 = vsel %vm17_vm0, 0.0, %v181_v46  ;;  %v3384_v37 = vsel %vm17_vm0, 0.0, %v182_v47  ;;  %v3388_v41 = vsel %vm17_vm0, 0.0, %v183_v48  ;;  %v3392_v42 = vsel %vm17_vm0, 0.0, %v184_v49 }
  0x39   :  { %5668 = vst [vmem:[#allocation46_spill] sm:$0xff] %v3376_v39  ;;  %5669 = vst [vmem:[#allocation47_spill] sm:$0xff] %v3380_v38  ;;  %v2562_v43 = vld [vmem:[%s5526_s1] ss:$0 sm:$0xff]  ;;  %v3400_v46 = vld [vmem:[%s5525_s0 + $0x10] ss:$2 sm:$0xff] }
  0x3a   :  { %5670 = vst [vmem:[#allocation48_spill] sm:$0xff] %v3384_v37  ;;  %5671 = vst [vmem:[#allocation49_spill] sm:$0xff] %v3388_v41  ;;  %v3404_v47 = vsel %vm17_vm0, 0.0, %v185_v50  ;;  %v3408_v48 = vsel %vm17_vm0, 0.0, %v186_v51  ;;  %v3412_v49 = vsel %vm17_vm0, 0.0, %v187_v52  ;;  %v3416_v44 = vsel %vm17_vm0, 0.0, %v188_v56 }
  0x3b   :  { %5672 = vst [vmem:[#allocation50_spill] sm:$0xff] %v3392_v42  ;;  %5673 = vst [vmem:[#allocation51_spill] sm:$0xff] %v3400_v46  ;;  %v3421_v36 = vld [vmem:[%s5525_s0 + $0x30] ss:$2 sm:$0xff]  ;;  %v3435_v52 = vsel %vm17_vm0, 0.0, %v189_v57  ;;  %v3439_v56 = vsel %vm17_vm0, 0.0, %v190_v58  ;;  %v216_v57 = vmul.f32 %v2562_v43, %v3368_v40  ;;  %v217_v32 = vmul.f32 %v2562_v43, %v3372_v4 }
  0x3c   :  { %5674 = vst [vmem:[#allocation52_spill] sm:$0xff] %v3404_v47  ;;  %5675 = vst [vmem:[#allocation53_spill] sm:$0xff] %v3408_v48  ;;  %v3426_v50 = vld [vmem:[%s5525_s0 + $0x50] ss:$2 sm:$0xff]  ;;  %v3443_v47 = vsel %vm17_vm0, 0.0, %v191_v59  ;;  %v3447_v35 = vsel %vm17_vm0, 0.0, %v192_v0  ;;  %v218_v58 = vmul.f32 %v2562_v43, %v3376_v39  ;;  %v219_v39 = vmul.f32 %v2562_v43, %v3380_v38 }
  0x3d   :  { %5676 = vst [vmem:[#allocation54_spill] sm:$0xff] %v3412_v49  ;;  %5677 = vst [vmem:[#allocation55_spill] sm:$0xff] %v3416_v44  ;;  %v3431_v51 = vld [vmem:[%s5525_s0 + $0x70] ss:$2 sm:$0xff]  ;;  %v215_v33 = vmul.f32 0.0, %v2562_v43  ;;  %v220_v40 = vmul.f32 %v2562_v43, %v3384_v37  ;;  %v221_v30 = vmul.f32 %v2562_v43, %v3388_v41  ;;  %v222_v29 = vmul.f32 %v2562_v43, %v3392_v42 }
  0x3e   :  { %5678 = vst [vmem:[#allocation56_spill] sm:$0xff] %v3421_v36  ;;  %5679 = vst [vmem:[#allocation57_spill] sm:$0xff] %v3426_v50  ;;  %v3452_v34 = vld [vmem:[%s5525_s0 + $0x90] ss:$2 sm:$0xff]  ;;  %v2563_v59 = vld [vmem:[%s5526_s1 + $0x1] ss:$0 sm:$0xff]  ;;  %v223_v37 = vmul.f32 %v2562_v43, %v3408_v48  ;;  %v224_v41 = vmul.f32 %v2562_v43, %v3412_v49  ;;  %v225_v42 = vmul.f32 %v2562_v43, %v3416_v44 }
  0x3f   :  { %5680 = vst [vmem:[#allocation58_spill] sm:$0xff] %v3431_v51  ;;  %5681 = vst [vmem:[#allocation59_spill] sm:$0xff] %v3435_v52  ;;  %v3463_v0 = vld [vmem:[%s5525_s0 + $0xb0] ss:$2 sm:$0xff]  ;;  %v226_v26 = vmul.f32 %v2562_v43, %v3435_v52  ;;  %v227_v21 = vmul.f32 %v2562_v43, %v3439_v56  ;;  %v228_v48 = vmul.f32 %v2562_v43, %v3443_v47  ;;  %v235_v20 = vmul.f32 0.0, %v2563_v59 }
  0x40   :  { %5682 = vst [vmem:[#allocation60_spill] sm:$0xff] %v3439_v56  ;;  %5683 = vst [vmem:[#allocation61_spill] sm:$0xff] %v3443_v47  ;;  %v3468_v31 = vld [vmem:[%s5525_s0 + $0xd0] ss:$2 sm:$0xff]  ;;  %v236_v49 = vmul.f32 %v2563_v59, %v3400_v46  ;;  %v237_v44 = vmul.f32 %v2563_v59, %v3421_v36  ;;  %v238_v19 = vmul.f32 %v2563_v59, %v3426_v50 }
  0x41   :  { %5684 = vst [vmem:[#allocation62_spill] sm:$0xff] %v3447_v35  ;;  %5685 = vst [vmem:[#allocation63_spill] sm:$0xff] %v3452_v34  ;;  %v3473_v4 = vld [vmem:[%s5525_s0 + $0x110] ss:$2 sm:$0xff]  ;;  %v239_v17 = vmul.f32 %v2563_v59, %v3431_v51  ;;  %v240_v16 = vmul.f32 %v2563_v59, %v3452_v34  ;;  %v241_v56 = vmul.f32 %v2563_v59, %v3463_v0 }
  0x42   :  { %5686 = vst [vmem:[#allocation64_spill] sm:$0xff] %v3463_v0  ;;  %5687 = vst [vmem:[#allocation65_spill] sm:$0xff] %v3468_v31  ;;  %v3482_v28 = vld [vmem:[%s5525_s0 + $0x130] ss:$2 sm:$0xff]  ;;  %v242_v47 = vmul.f32 %v2563_v59, %v3468_v31  ;;  %v243_v15 = vmul.f32 %v2563_v59, %v3473_v4  ;;  %v229_v51 = vmul.f32 %v2562_v43, %v3447_v35 }
  0x43   :  { %5688 = vst [vmem:[#allocation66_spill] sm:$0xff] %v3473_v4  ;;  %5689 = vst [vmem:[#allocation67_spill] sm:$0xff] %v3482_v28  ;;  %v3487_v27 = vld [vmem:[%s5525_s0 + $0x150] ss:$2 sm:$0xff]  ;;  %v244_v46 = vmul.f32 %v2563_v59, %v3482_v28  ;;  %v250_v10 = vadd.f32 %v235_v20, %v215_v33  ;;  %v251_v0 = vadd.f32 %v236_v49, %v216_v57 }
  0x44   :  { %5690 = vst [vmem:[#allocation68_spill] sm:$0xff] %v3487_v27  ;;  %v3492_v38 = vld [vmem:[%s5525_s0 + $0x170] ss:$2 sm:$0xff]  ;;  %v245_v14 = vmul.f32 %v2563_v59, %v3487_v27  ;;  %v252_v9 = vadd.f32 %v237_v44, %v217_v32  ;;  %v253_v31 = vadd.f32 %v238_v19, %v218_v58  ;;  %v254_v8 = vadd.f32 %v239_v17, %v219_v39  ;;  %v2564_v27 = vld [vmem:[%s5526_s1 + $0x2] ss:$0 sm:$0xff] }
  0x45   :  { %5691 = vst [vmem:[#allocation69_spill] sm:$0xff] %v3492_v38  ;;  %v3501_v24 = vld [vmem:[%s5525_s0 + $0x190] ss:$2 sm:$0xff]  ;;  %v246_v11 = vmul.f32 %v2563_v59, %v3492_v38  ;;  %v255_v4 = vadd.f32 %v240_v16, %v220_v40  ;;  %v256_v28 = vadd.f32 %v241_v56, %v221_v30  ;;  %v257_v38 = vadd.f32 %v242_v47, %v222_v29 }
  0x46   :  { %5692 = vst [vmem:[#allocation70_spill] sm:$0xff] %v3501_v24  ;;  %v3506_v22 = vld [vmem:[%s5525_s0 + $0x1b0] ss:$2 sm:$0xff]  ;;  %v247_v36 = vmul.f32 %v2563_v59, %v3501_v24  ;;  %v258_v3 = vadd.f32 %v243_v15, %v223_v37  ;;  %v259_v24 = vadd.f32 %v244_v46, %v224_v41  ;;  %v260_v2 = vadd.f32 %v245_v14, %v225_v42 }
  0x47   :  { %5693 = vst [vmem:[#allocation71_spill] sm:$0xff] %v3506_v22  ;;  %v3514_v52 = vld [vmem:[%s5525_s0 + $0x1d0] ss:$2 sm:$0xff]  ;;  %v248_v50 = vmul.f32 %v2563_v59, %v3506_v22  ;;  %v261_v22 = vadd.f32 %v246_v11, %v226_v26  ;;  %v271_v33 = vmul.f32 %v2564_v27, %v3204_v53  ;;  %v272_v32 = vmul.f32 %v2564_v27, %v3209_v54 }
  0x48   :  { %5694 = vst [vmem:[#allocation72_spill] sm:$0xff] %v3514_v52  ;;  %v249_v34 = vmul.f32 %v2563_v59, %v3514_v52  ;;  %v262_v1 = vadd.f32 %v247_v36, %v227_v21  ;;  %v270_v59 = vmul.f32 0.0, %v2564_v27  ;;  %v273_v39 = vmul.f32 %v2564_v27, %v3214_v55 }
  0x49   :  { %v263_v43 = vadd.f32 %v248_v50, %v228_v48  ;;  %v274_v40 = vmul.f32 %v2564_v27, %v3223_v60  ;;  %v275_v44 = vmul.f32 %v2564_v27, %v3228_v61  ;;  %v276_v29 = vmul.f32 %v2564_v27, %v3233_v62  ;;  %v2565_v48 = vld [vmem:[%s5526_s1 + $0x3] ss:$0 sm:$0xff] }
  0x4a   :  { %v264_v35 = vadd.f32 %v249_v34, %v229_v51  ;;  %v277_v30 = vmul.f32 %v2564_v27, %v3238_v63  ;;  %v278_v26 = vmul.f32 %v2564_v27, %v3261_v5  ;;  %v279_v36 = vmul.f32 %v2564_v27, %v3266_v6 }
  0x4b   :  { %v280_v34 = vmul.f32 %v2564_v27, %v3271_v7  ;;  %v281_v37 = vmul.f32 %v2564_v27, %v3292_v12  ;;  %v282_v11 = vmul.f32 %v2564_v27, %v3297_v13  ;;  %v283_v14 = vmul.f32 %v2564_v27, %v3318_v18 }
  0x4c   :  { %v284_v15 = vmul.f32 %v2564_v27, %v3339_v23  ;;  %v5695_v16 = vrot.slane %v3351_v45, 7  ;;  %v285_v19 = vadd.f32 %v270_v59, %v250_v10  ;;  %v286_v20 = vadd.f32 %v271_v33, %v251_v0  ;;  %v5697_v0 = vld [vmem:[#allocation23_spill] sm:$0xff] }
  0x4d   :  { %v287_v21 = vadd.f32 %v272_v32, %v252_v9  ;;  %v288_v41 = vadd.f32 %v273_v39, %v253_v31  ;;  %v289_v42 = vadd.f32 %v274_v40, %v254_v8  ;;  %v290_v46 = vadd.f32 %v275_v44, %v255_v4  ;;  %v5698_v31 = vld [vmem:[#allocation24_spill] sm:$0xff]  ;;  %v5699_v4 = vld [vmem:[#allocation26_spill] sm:$0xff]  ;;  %v5700_v59 = vld [vmem:[#allocation27_spill] sm:$0xff] }
  0x4e   :  { %v3551_v17 = vsel %vm17_vm0, 0.0, %v5695_v16  ;;  %v291_v47 = vadd.f32 %v276_v29, %v256_v28  ;;  %v292_v49 = vadd.f32 %v277_v30, %v257_v38  ;;  %v293_v50 = vadd.f32 %v278_v26, %v258_v3  ;;  %v5701_v32 = vld [vmem:[#allocation28_spill] sm:$0xff]  ;;  %v5702_v38 = vld [vmem:[#allocation29_spill] sm:$0xff]  ;;  %v5706_v40 = vld [vmem:[#allocation35_spill] sm:$0xff] }
  0x4f   :  { %v294_v27 = vadd.f32 %v279_v36, %v259_v24  ;;  %v295_v51 = vadd.f32 %v280_v34, %v260_v2  ;;  %v296_v56 = vadd.f32 %v281_v37, %v261_v22  ;;  %v297_v57 = vadd.f32 %v282_v11, %v262_v1  ;;  %v5703_v24 = vld [vmem:[#allocation32_spill] sm:$0xff]  ;;  %v5704_v22 = vld [vmem:[#allocation33_spill] sm:$0xff]  ;;  %v5708_v36 = vld [vmem:[#allocation38_spill] sm:$0xff] }
  0x50   :  { %v298_v58 = vadd.f32 %v283_v14, %v263_v43  ;;  %v299_v16 = vadd.f32 %v284_v15, %v264_v35  ;;  %v305_v10 = vmul.f32 %v2565_v48, %v5696_v25  ;;  %v306_v9 = vmul.f32 %v2565_v48, %v5697_v0  ;;  %v5705_v43 = vld [vmem:[#allocation34_spill] sm:$0xff]  ;;  %v5707_v44 = vld [vmem:[#allocation37_spill] sm:$0xff]  ;;  %v5709_v37 = vld [vmem:[#allocation39_spill] sm:$0xff] }
  0x51   :  { %v307_v8 = vmul.f32 %v2565_v48, %v5698_v31  ;;  %v308_v28 = vmul.f32 %v2565_v48, %v5699_v4  ;;  %v309_v33 = vmul.f32 %v2565_v48, %v5700_v59  ;;  %v310_v39 = vmul.f32 %v2565_v48, %v5701_v32  ;;  %v19_v30 = vld [vmem:[%s5525_s0] ss:$2 sm:$0xff]  ;;  %v5710_v14 = vld [vmem:[#allocation40_spill] sm:$0xff] }
  0x52   :  { %v311_v3 = vmul.f32 %v2565_v48, %v5702_v38  ;;  %v312_v2 = vmul.f32 %v2565_v48, %v5703_v24  ;;  %v313_v1 = vmul.f32 %v2565_v48, %v5704_v22  ;;  %v314_v35 = vmul.f32 %v2565_v48, %v5705_v43  ;;  %v2499_v26 = vld [vmem:[%s5525_s0 + $0x20] ss:$2 sm:$0xff] }
  0x53   :  { %v315_v25 = vmul.f32 %v2565_v48, %v5706_v40  ;;  %v316_v29 = vmul.f32 %v2565_v48, %v5707_v44  ;;  %v317_v34 = vmul.f32 %v2565_v48, %v5708_v36  ;;  %v318_v11 = vmul.f32 %v2565_v48, %v5709_v37  ;;  %v5711_v0 = vld [vmem:[#allocation42_spill] sm:$0xff] }
  0x54   :  { %v319_v15 = vmul.f32 %v2565_v48, %v5710_v14  ;;  %v320_v31 = vmul.f32 %v2565_v48, %v5711_v0  ;;  %v2500_v4 = vld [vmem:[%s5525_s0 + $0x40] ss:$2 sm:$0xff]  ;;  %v321_v38 = vadd.f32 %v305_v10, %v285_v19  ;;  %v322_v24 = vadd.f32 %v306_v9, %v286_v20 }
  0x55   :  { %v2501_v59 = vld [vmem:[%s5525_s0 + $0x60] ss:$2 sm:$0xff]  ;;  %v323_v22 = vadd.f32 %v307_v8, %v287_v21  ;;  %v324_v43 = vadd.f32 %v308_v28, %v288_v41  ;;  %v325_v44 = vadd.f32 %v309_v33, %v289_v42  ;;  %v326_v36 = vadd.f32 %v310_v39, %v290_v46 }
  0x56   :  { %v2502_v32 = vld [vmem:[%s5525_s0 + $0x80] ss:$2 sm:$0xff]  ;;  %v327_v37 = vadd.f32 %v311_v3, %v291_v47  ;;  %v328_v14 = vadd.f32 %v312_v2, %v292_v49  ;;  %v329_v42 = vadd.f32 %v313_v1, %v285_v19  ;;  %v330_v46 = vadd.f32 %v314_v35, %v293_v50 }
  0x57   :  { %v2503_v48 = vld [vmem:[%s5525_s0 + $0xa0] ss:$2 sm:$0xff]  ;;  %v331_v47 = vadd.f32 %v315_v25, %v294_v27  ;;  %v332_v49 = vadd.f32 %v316_v29, %v295_v51  ;;  %v333_v28 = vadd.f32 %v317_v34, %v296_v56  ;;  %v334_v33 = vadd.f32 %v318_v11, %v297_v57 }
  0x58   :  { %v2504_v40 = vld [vmem:[%s5525_s0 + $0xc0] ss:$2 sm:$0xff]  ;;  %v335_v39 = vadd.f32 %v319_v15, %v298_v58  ;;  %v336_v3 = vadd.f32 %v320_v31, %v299_v16 }
  0x59   :  { %v2566_v0 = vld [vmem:[%s5526_s1 + $0x4] ss:$0 sm:$0xff] }
  0x5a   :  { %v2505_v20 = vld [vmem:[%s5525_s0 + $0xe0] ss:$2 sm:$0xff]  ;;  %v342_v51 = vmul.f32 %v2566_v0, %v19_v30  ;;  %v343_v2 = vmul.f32 %v2566_v0, %v2499_v26  ;;  %v344_v1 = vmul.f32 %v2566_v0, %v2500_v4  ;;  %v345_v35 = vmul.f32 %v2566_v0, %v2501_v59  ;;  %v2567_v30 = vld [vmem:[%s5526_s1 + $0x5] ss:$0 sm:$0xff] }
  0x5b   :  { %v2506_v21 = vld [vmem:[%s5525_s0 + $0x100] ss:$2 sm:$0xff]  ;;  %v346_v56 = vmul.f32 %v2566_v0, %v2502_v32  ;;  %v347_v57 = vmul.f32 %v2566_v0, %v2503_v48  ;;  %v348_v58 = vmul.f32 %v2566_v0, %v2504_v40  ;;  %v349_v16 = vmul.f32 %v2566_v0, %v2505_v20 }
  0x5c   :  { %v2507_v41 = vld [vmem:[%s5525_s0 + $0x120] ss:$2 sm:$0xff]  ;;  %v350_v25 = vmul.f32 %v2566_v0, %v2506_v21  ;;  %v358_v18 = vadd.f32 %v342_v51, %v321_v38  ;;  %v359_v13 = vadd.f32 %v343_v2, %v322_v24  ;;  %v360_v52 = vadd.f32 %v344_v1, %v323_v22  ;;  %v5713_v38 = vld [vmem:[#allocation7_spill] sm:$0xff] }
  0x5d   :  { %v2508_v10 = vld [vmem:[%s5525_s0 + $0x140] ss:$2 sm:$0xff]  ;;  %v351_v29 = vmul.f32 %v2566_v0, %v2507_v41  ;;  %v361_v12 = vadd.f32 %v345_v35, %v324_v43  ;;  %v362_v26 = vadd.f32 %v346_v56, %v325_v44  ;;  %v363_v4 = vadd.f32 %v347_v57, %v326_v36  ;;  %v5724_v57 = vld [vmem:[#allocation44_spill] sm:$0xff] }
  0x5e   :  { %v2509_v9 = vld [vmem:[%s5525_s0 + $0x160] ss:$2 sm:$0xff]  ;;  %v352_v34 = vmul.f32 %v2566_v0, %v2508_v10  ;;  %v364_v59 = vadd.f32 %v348_v58, %v327_v37  ;;  %v365_v32 = vadd.f32 %v349_v16, %v328_v14  ;;  %v366_v48 = vadd.f32 %v350_v25, %v329_v42  ;;  %v5717_v14 = vld [vmem:[#allocation11_spill] sm:$0xff] }
  0x5f   :  { %v2510_v8 = vld [vmem:[%s5525_s0 + $0x180] ss:$2 sm:$0xff]  ;;  %v353_v11 = vmul.f32 %v2566_v0, %v2509_v9  ;;  %v367_v40 = vadd.f32 %v351_v29, %v330_v46  ;;  %v380_v24 = vmul.f32 %v2567_v30, %v5713_v38  ;;  %v384_v42 = vmul.f32 %v2567_v30, %v5717_v14  ;;  %v5718_v46 = vld [vmem:[#allocation12_spill] sm:$0xff] }
  0x60   :  { %v2511_v19 = vld [vmem:[%s5525_s0 + $0x1a0] ss:$2 sm:$0xff]  ;;  %v354_v15 = vmul.f32 %v2566_v0, %v2510_v8  ;;  %v368_v20 = vadd.f32 %v352_v34, %v331_v47  ;;  %v5714_v8 = vld [vmem:[#allocation8_spill] sm:$0xff]  ;;  %v385_v47 = vmul.f32 %v2567_v30, %v5718_v46 }
  0x61   :  { %v2512_v50 = vld [vmem:[%s5525_s0 + $0x1c0] ss:$2 sm:$0xff]  ;;  %v355_v31 = vmul.f32 %v2566_v0, %v2511_v19  ;;  %v369_v21 = vadd.f32 %v353_v11, %v332_v49  ;;  %v381_v19 = vmul.f32 %v2567_v30, %v5714_v8  ;;  %v396_v56 = vadd.f32 %v380_v24, %v359_v13  ;;  %v5727_v11 = vld [vmem:[#allocation19_spill] sm:$0xff] }
  0x62   :  { %v2513_v27 = vld [vmem:[%s5525_s0 + $0x1e0] ss:$2 sm:$0xff]  ;;  %v356_v45 = vmul.f32 %v2566_v0, %v2512_v50  ;;  %v370_v41 = vadd.f32 %v354_v15, %v333_v28  ;;  %v392_v15 = vmul.f32 %v2567_v30, %v5727_v11  ;;  %v400_v14 = vadd.f32 %v384_v42, %v363_v4 }
  0x63   :  { %v357_v23 = vmul.f32 %v2566_v0, %v2513_v27  ;;  %v371_v10 = vadd.f32 %v355_v31, %v334_v33  ;;  %v5712_v9 = vld [vmem:[#allocation6_spill] sm:$0xff]  ;;  %v5715_v50 = vld [vmem:[#allocation9_spill] sm:$0xff]  ;;  %v5728_v31 = vld [vmem:[#allocation20_spill] sm:$0xff]  ;;  %v397_v13 = vadd.f32 %v381_v19, %v360_v52  ;;  %v401_v46 = vadd.f32 %v385_v47, %v364_v59 }
  0x64   :  { %v379_v0 = vmul.f32 %v2567_v30, %v5712_v9  ;;  %v372_v22 = vadd.f32 %v356_v45, %v335_v39  ;;  %v382_v27 = vmul.f32 %v2567_v30, %v5715_v50  ;;  %v3633_v44 = vld [vmem:[%s5526_s1 + $0x6] ss:$0 sm:$0xff]  ;;  %v5716_v36 = vld [vmem:[#allocation10_spill] sm:$0xff]  ;;  %v393_v9 = vmul.f32 %v2567_v30, %v5728_v31  ;;  %v3654_v50 = vld [vmem:[%s5526_s1 + $0x7] ss:$0 sm:$0xff] }
  0x65   :  { %v373_v43 = vadd.f32 %v357_v23, %v336_v3  ;;  %v383_v37 = vmul.f32 %v2567_v30, %v5716_v36  ;;  %v5719_v49 = vld [vmem:[#allocation13_spill] sm:$0xff]  ;;  %v5720_v33 = vld [vmem:[#allocation14_spill] sm:$0xff]  ;;  %v5721_v23 = vld [vmem:[#allocation15_spill] sm:$0xff]  ;;  %v416_v58 = vmul.f32 %v3633_v44, %v5724_v57 }
  0x66   :  { %v386_v28 = vmul.f32 %v2567_v30, %v5719_v49  ;;  %v387_v45 = vmul.f32 %v2567_v30, %v5720_v33  ;;  %v388_v39 = vmul.f32 %v2567_v30, %v5721_v23  ;;  %v5722_v3 = vld [vmem:[#allocation16_spill] sm:$0xff]  ;;  %v5723_v2 = vld [vmem:[#allocation17_spill] sm:$0xff]  ;;  %v395_v35 = vadd.f32 %v379_v0, %v358_v18  ;;  %v5726_v29 = vld [vmem:[#allocation18_spill] sm:$0xff] }
  0x67   :  { %v389_v51 = vmul.f32 %v2567_v30, %v5722_v3  ;;  %v390_v1 = vmul.f32 %v2567_v30, %v5723_v2  ;;  %v5725_v16 = vld [vmem:[#allocation45_spill] sm:$0xff]  ;;  %v391_v34 = vmul.f32 %v2567_v30, %v5726_v29  ;;  %v398_v18 = vadd.f32 %v382_v27, %v361_v12  ;;  %v5730_v24 = vld [vmem:[#allocation46_spill] sm:$0xff]  ;;  %v5731_v33 = vld [vmem:[#allocation47_spill] sm:$0xff] }
  0x68   :  { %v417_v25 = vmul.f32 %v3633_v44, %v5725_v16  ;;  %v5729_v38 = vld [vmem:[#allocation21_spill] sm:$0xff]  ;;  %v399_v0 = vadd.f32 %v383_v37, %v362_v26  ;;  %v418_v36 = vmul.f32 %v3633_v44, %v5730_v24  ;;  %v402_v49 = vadd.f32 %v386_v28, %v365_v32  ;;  %v5733_v16 = vld [vmem:[#allocation56_spill] sm:$0xff]  ;;  %v3671_v4 = vld [vmem:[%s5526_s1 + $0x8] ss:$0 sm:$0xff] }
  0x69   :  { %v394_v8 = vmul.f32 %v2567_v30, %v5729_v38  ;;  %v419_v23 = vmul.f32 %v3633_v44, %v5731_v33  ;;  %v432_v3 = vadd.f32 %v416_v58, %v395_v35  ;;  %v5732_v30 = vld [vmem:[#allocation51_spill] sm:$0xff]  ;;  %v454_v29 = vmul.f32 %v3654_v50, %v5733_v16  ;;  %v5734_v32 = vld [vmem:[#allocation48_spill] sm:$0xff]  ;;  %v5735_v42 = vld [vmem:[#allocation57_spill] sm:$0xff] }
  0x6a   :  { %v433_v2 = vadd.f32 %v417_v25, %v396_v56  ;;  %v453_v57 = vmul.f32 %v3654_v50, %v5732_v30  ;;  %v403_v52 = vadd.f32 %v387_v45, %v366_v48  ;;  %v404_v12 = vadd.f32 %v388_v39, %v367_v40  ;;  %v5736_v40 = vld [vmem:[#allocation49_spill] sm:$0xff]  ;;  %v5737_v28 = vld [vmem:[#allocation58_spill] sm:$0xff]  ;;  %v5739_v25 = vld [vmem:[#allocation52_spill] sm:$0xff] }
  0x6b   :  { %v3664_v26 = vadd.f32 %v389_v51, %v368_v20  ;;  %v3666_v19 = vadd.f32 %v390_v1, %v369_v21  ;;  %v3673_v59 = vadd.f32 %v391_v34, %v370_v41  ;;  %v420_v27 = vmul.f32 %v3633_v44, %v5734_v32  ;;  %v5746_v30 = vld [vmem:[#allocation60_spill] sm:$0xff] }
  0x6c   :  { %v434_v37 = vadd.f32 %v418_v36, %v397_v13  ;;  %v455_v47 = vmul.f32 %v3654_v50, %v5735_v42  ;;  %v3679_v48 = vadd.f32 %v392_v15, %v371_v10  ;;  %v421_v20 = vmul.f32 %v3633_v44, %v5736_v40  ;;  %v5738_v10 = vld [vmem:[#allocation50_spill] sm:$0xff]  ;;  %v5740_v15 = vld [vmem:[#allocation63_spill] sm:$0xff]  ;;  %v5741_v13 = vld [vmem:[#allocation53_spill] sm:$0xff] }
  0x6d   :  { %v435_v21 = vadd.f32 %v419_v23, %v398_v18  ;;  %v456_v45 = vmul.f32 %v3654_v50, %v5737_v28  ;;  %v469_v39 = vadd.f32 %v453_v57, %v432_v3  ;;  %v470_v51 = vadd.f32 %v454_v29, %v433_v2  ;;  %v5744_v23 = vld [vmem:[#allocation55_spill] sm:$0xff]  ;;  %v5747_v29 = vld [vmem:[#allocation65_spill] sm:$0xff]  ;;  %v5749_v40 = vld [vmem:[#allocation62_spill] sm:$0xff] }
  0x6e   :  { %v490_v41 = vmul.f32 %v3671_v4, %v3204_v53  ;;  %v491_v1 = vmul.f32 %v3671_v4, %v3209_v54  ;;  %v3689_v35 = vadd.f32 %v393_v9, %v372_v22  ;;  %v3691_v56 = vadd.f32 %v394_v8, %v373_v43  ;;  %v5742_v22 = vld [vmem:[#allocation54_spill] sm:$0xff]  ;;  %v5743_v8 = vld [vmem:[#allocation64_spill] sm:$0xff]  ;;  %v5745_v2 = vld [vmem:[#allocation59_spill] sm:$0xff] }
  0x6f   :  { %v422_v58 = vmul.f32 %v3633_v44, %v5738_v10  ;;  %v423_v34 = vmul.f32 %v3633_v44, %v5739_v25  ;;  %v436_v11 = vadd.f32 %v420_v27, %v399_v0  ;;  %v457_v31 = vmul.f32 %v3654_v50, %v5740_v15  ;;  %v2537_v0 = vld [vmem:[%s5525_s0 + $0xf0] ss:$2 sm:$0xff]  ;;  %v5748_v42 = vld [vmem:[#allocation61_spill] sm:$0xff] }
  0x70   :  { %v471_v38 = vadd.f32 %v455_v47, %v434_v37  ;;  %v492_v53 = vmul.f32 %v3671_v4, %v3214_v55  ;;  %v424_v54 = vmul.f32 %v3633_v44, %v5741_v13  ;;  %v425_v43 = vmul.f32 %v3633_v44, %v5742_v22  ;;  %v5751_v15 = vld [vmem:[#allocation67_spill] sm:$0xff]  ;;  %v5752_v13 = vld [vmem:[#allocation25_spill] sm:$0xff] }
  0x71   :  { %v437_v9 = vadd.f32 %v421_v20, %v400_v14  ;;  %v458_v18 = vmul.f32 %v3654_v50, %v5743_v8  ;;  %v472_v24 = vadd.f32 %v456_v45, %v435_v21  ;;  %v493_v36 = vmul.f32 %v3671_v4, %v3223_v60  ;;  %v5753_v8 = vld [vmem:[#allocation68_spill] sm:$0xff] }
  0x72   :  { %v3712_v33 = vadd.f32 %v490_v41, %v469_v39  ;;  %v3714_v55 = vadd.f32 %v491_v1, %v470_v51  ;;  %v426_v3 = vmul.f32 %v3633_v44, %v5744_v23  ;;  %v427_v14 = vmul.f32 %v3633_v44, %v5745_v2  ;;  %v5750_v41 = vld [vmem:[#allocation66_spill] sm:$0xff]  ;;  %v5754_v23 = vld [vmem:[#allocation69_spill] sm:$0xff] }
  0x73   :  { %v428_v57 = vmul.f32 %v3633_v44, %v5746_v30  ;;  %v438_v16 = vadd.f32 %v422_v58, %v401_v46  ;;  %v459_v32 = vmul.f32 %v3654_v50, %v5747_v29  ;;  %v473_v27 = vadd.f32 %v457_v31, %v436_v11 }
  0x74   :  { %v494_v60 = vmul.f32 %v3671_v4, %v3228_v61  ;;  %v3726_v37 = vadd.f32 %v492_v53, %v471_v38  ;;  %v429_v47 = vmul.f32 %v3633_v44, %v5748_v42  ;;  %v430_v20 = vmul.f32 %v3633_v44, %v5749_v40 }
  0x75   :  { %v439_v21 = vadd.f32 %v423_v34, %v402_v49  ;;  %v460_v28 = vmul.f32 %v3654_v50, %v2537_v0  ;;  %v474_v45 = vadd.f32 %v458_v18, %v437_v9  ;;  %v495_v46 = vmul.f32 %v3671_v4, %v3233_v62 }
  0x76   :  { %v3735_v39 = vadd.f32 %v493_v36, %v472_v24  ;;  %v522_v61 = vadd.f32 %v3714_v55, %v3712_v33  ;;  %v440_v51 = vadd.f32 %v424_v54, %v403_v52  ;;  %v461_v1 = vmul.f32 %v3654_v50, %v5750_v41  ;;  %v5757_v41 = vld [vmem:[#allocation30_spill] sm:$0xff] }
  0x77   :  { %v543_v10 = vmul.f32 %v3712_v33, %v3712_v33  ;;  %v544_v49 = vmul.f32 %v3714_v55, %v3714_v55  ;;  %v475_v58 = vadd.f32 %v459_v32, %v438_v16  ;;  %v496_v25 = vmul.f32 %v3671_v4, %v3238_v63 }
  0x78   :  { %v3747_v62 = vadd.f32 %v494_v60, %v473_v27  ;;  %v523_v34 = vadd.f32 %v522_v61, %v3726_v37  ;;  %v431_v52 = vmul.f32 %v3633_v44, %v3551_v17  ;;  %v441_v11 = vadd.f32 %v425_v43, %v404_v12  ;;  %v5755_v27 = vld [vmem:[#allocation70_spill] sm:$0xff]  ;;  %v2545_v61 = vld [vmem:[%s5525_s0 + $0x1f0] ss:$2 sm:$0xff] }
  0x79   :  { %v462_v31 = vmul.f32 %v3654_v50, %v5751_v15  ;;  %v545_v38 = vmul.f32 %v3726_v37, %v3726_v37  ;;  %v476_v53 = vadd.f32 %v460_v28, %v439_v21  ;;  %v497_v54 = vmul.f32 %v3671_v4, %v5752_v13 }
  0x7a   :  { %v3758_v22 = vadd.f32 %v495_v46, %v474_v45  ;;  %v524_v63 = vadd.f32 %v523_v34, %v3735_v39  ;;  %v442_v9 = vadd.f32 %v426_v3, %v3664_v26  ;;  %v463_v17 = vmul.f32 %v3654_v50, %v5753_v8  ;;  %v5756_v45 = vld [vmem:[#allocation71_spill] sm:$0xff] }
  0x7b   :  { %v546_v44 = vmul.f32 %v3735_v39, %v3735_v39  ;;  %v559_v12 = vadd.f32 %v544_v49, %v543_v10  ;;  %v477_v43 = vadd.f32 %v461_v1, %v440_v51  ;;  %v498_v18 = vmul.f32 %v3671_v4, %v3261_v5 }
  0x7c   :  { %v3768_v0 = vadd.f32 %v496_v25, %v475_v58  ;;  %v525_v24 = vadd.f32 %v524_v63, %v3747_v62  ;;  %v443_v36 = vadd.f32 %v427_v14, %v3666_v19  ;;  %v464_v26 = vmul.f32 %v3654_v50, %v5754_v23  ;;  %v5760_v63 = vld [vmem:[#allocation36_spill] sm:$0xff] }
  0x7d   :  { %v547_v3 = vmul.f32 %v3747_v62, %v3747_v62  ;;  %v560_v2 = vadd.f32 %v559_v12, %v545_v38  ;;  %v478_v30 = vadd.f32 %v462_v31, %v441_v11  ;;  %v499_v16 = vmul.f32 %v3671_v4, %v3266_v6  ;;  %v5759_v11 = vld [vmem:[#allocation31_spill] sm:$0xff] }
  0x7e   :  { %v3778_v29 = vadd.f32 %v497_v54, %v476_v53  ;;  %v526_v5 = vadd.f32 %v525_v24, %v3758_v22  ;;  %v444_v32 = vadd.f32 %v428_v57, %v3673_v59  ;;  %v465_v19 = vmul.f32 %v3654_v50, %v5755_v27 }
  0x7f   :  { %v548_v14 = vmul.f32 %v3758_v22, %v3758_v22  ;;  %v561_v60 = vadd.f32 %v560_v2, %v546_v44  ;;  %v479_v42 = vadd.f32 %v463_v17, %v442_v9  ;;  %v500_v40 = vmul.f32 %v3671_v4, %v3271_v7 }
  0x80   :  { %v3788_v21 = vadd.f32 %v498_v18, %v477_v43  ;;  %v527_v6 = vadd.f32 %v526_v5, %v3768_v0  ;;  %v445_v28 = vadd.f32 %v429_v47, %v3679_v48  ;;  %v466_v59 = vmul.f32 %v3654_v50, %v5756_v45  ;;  %v5758_v47 = vld [vmem:[#allocation72_spill] sm:$0xff] }
  0x81   :  { %v549_v57 = vmul.f32 %v3768_v0, %v3768_v0  ;;  %v562_v46 = vadd.f32 %v561_v60, %v547_v3  ;;  %v480_v51 = vadd.f32 %v464_v26, %v443_v36  ;;  %v501_v7 = vmul.f32 %v3671_v4, %v5757_v41  ;;  %v5762_v26 = vld [vmem:[#allocation43_spill] sm:$0xff] }
  0x82   :  { %v3801_v1 = vadd.f32 %v499_v16, %v478_v30  ;;  %v528_v10 = vadd.f32 %v527_v6, %v3778_v29  ;;  %v446_v48 = vadd.f32 %v430_v20, %v3689_v35  ;;  %v467_v49 = vmul.f32 %v3654_v50, %v5758_v47 }
  0x83   :  { %v550_v58 = vmul.f32 %v3778_v29, %v3778_v29  ;;  %v563_v25 = vadd.f32 %v562_v46, %v548_v14  ;;  %v481_v34 = vadd.f32 %v465_v19, %v444_v32  ;;  %v502_v15 = vmul.f32 %v3671_v4, %v5759_v11 }
  0x84   :  { %v3811_v31 = vadd.f32 %v500_v40, %v479_v42  ;;  %v529_v38 = vadd.f32 %v528_v10, %v3788_v21  ;;  %v447_v53 = vadd.f32 %v431_v52, %v3691_v56  ;;  %v468_v13 = vmul.f32 %v3654_v50, %v2545_v61  ;;  %v5761_v56 = vld [vmem:[#allocation41_spill] sm:$0xff] }
  0x85   :  { %v551_v35 = vmul.f32 %v3788_v21, %v3788_v21  ;;  %v564_v20 = vadd.f32 %v563_v25, %v549_v57  ;;  %v482_v54 = vadd.f32 %v466_v59, %v445_v28  ;;  %v503_v9 = vmul.f32 %v3671_v4, %v5760_v63 }
  0x86   :  { %v3820_v8 = vadd.f32 %v501_v7, %v480_v51  ;;  %v530_v17 = vadd.f32 %v529_v38, %v3801_v1  ;;  %v552_v44 = vmul.f32 %v3801_v1, %v3801_v1  ;;  %v483_v43 = vadd.f32 %v467_v49, %v446_v48 }
  0x87   :  { %v565_v12 = vadd.f32 %v564_v20, %v550_v58  ;;  %v504_v50 = vmul.f32 %v3671_v4, %v5761_v56  ;;  %v3827_v52 = vadd.f32 %v502_v15, %v481_v34  ;;  %v553_v24 = vmul.f32 %v3811_v31, %v3811_v31 }
  0x88   :  { %v531_v18 = vadd.f32 %v530_v17, %v3811_v31  ;;  %v484_v23 = vadd.f32 %v468_v13, %v447_v53  ;;  %v505_v3 = vmul.f32 %v3671_v4, %v5762_v26  ;;  %v3834_v2 = vadd.f32 %v503_v9, %v482_v54 }
  0x89   :  { %v566_v36 = vadd.f32 %v565_v12, %v551_v35  ;;  %v554_v16 = vmul.f32 %v3820_v8, %v3820_v8  ;;  %v3839_v32 = vadd.f32 %v504_v50, %v483_v43  ;;  %v555_v19 = vmul.f32 %v3827_v52, %v3827_v52 }
  0x8a   :  { %v532_v30 = vadd.f32 %v531_v18, %v3820_v8  ;;  %v3844_v60 = vadd.f32 %v505_v3, %v484_v23  ;;  %v556_v42 = vmul.f32 %v3834_v2, %v3834_v2 }
  0x8b   :  { %v567_v5 = vadd.f32 %v566_v36, %v552_v44  ;;  %v557_v28 = vmul.f32 %v3839_v32, %v3839_v32 }
  0x8c   :  { %v533_v27 = vadd.f32 %v532_v30, %v3827_v52  ;;  %v558_v57 = vmul.f32 %v3844_v60, %v3844_v60 }
  0x8d   :  { %v568_v14 = vadd.f32 %v567_v5, %v553_v24 }
  0x8e   :  { %v534_v4 = vadd.f32 %v533_v27, %v3834_v2 }
  0x8f   :  { %v569_v40 = vadd.f32 %v568_v14, %v554_v16 }
  0x90   :  { %v535_v6 = vadd.f32 %v534_v4, %v3839_v32 }
  0x91   :  { %v570_v45 = vadd.f32 %v569_v40, %v555_v19 }
  0x92   :  { %v536_v59 = vadd.f32 %v535_v6, %v3844_v60 }
  0x93   :  { %v571_v46 = vadd.f32 %v570_v45, %v556_v42 }
  0x94   :  { %v537_v61 = vrot.slane %v536_v59, 4 }
  0x95   :  { %v572_v51 = vadd.f32 %v571_v46, %v557_v28 }
  0x96   :  { %v538_v41 = vadd.f32 %v537_v61, %v536_v59 }
  0x97   :  { %v573_v7 = vadd.f32 %v572_v51, %v558_v57 }
  0x98   :  { %v539_v10 = vrot.slane %v538_v41, 2 }
  0x99   :  { %v574_v48 = vrot.slane %v573_v7, 4 }
  0x9a   :  { %v540_v47 = vadd.f32 %v539_v10, %v538_v41 }
  0x9b   :  { %v575_v49 = vadd.f32 %v574_v48, %v573_v7 }
  0x9c   :  { %v541_v58 = vrot.slane %v540_v47, 1 }
  0x9d   :  { %v576_v25 = vrot.slane %v575_v49, 2 }
  0x9e   :  { %v542_v34 = vadd.f32 %v541_v58, %v540_v47 }
  0x9f   :  { %v577_v11 = vadd.f32 %v576_v25, %v575_v49  ;;  %v2582_v49 = vld [vmem:[%s5527_s2 + $0x90] sm:$0xff]  ;;  %v2583_v25 = vld [vmem:[%s5527_s2 + $0x98] sm:$0xff] }
  0xa0   :  { %v3855_v15 = vmul.f32 0.0078125, %v542_v34  ;;  %v2921_v34 = vpack.c.bf16 %v2583_v25, %v2582_v49 }
  0xa1   :  { %v578_v38 = vrot.slane %v577_v11, 1 }
  0xa2   :  { %v583_v13 = vmul.f32 %v3855_v15, %v3855_v15  ;;  %v588_v9 = vsub.f32 %v3712_v33, %v3855_v15  ;;  %v589_v17 = vsub.f32 %v3714_v55, %v3855_v15  ;;  %v590_v44 = vsub.f32 %v3726_v37, %v3855_v15 }
  0xa3   :  { %v579_v53 = vadd.f32 %v578_v38, %v577_v11  ;;  %v591_v12 = vsub.f32 %v3735_v39, %v3855_v15  ;;  %v592_v43 = vsub.f32 %v3747_v62, %v3855_v15  ;;  %v593_v33 = vsub.f32 %v3758_v22, %v3855_v15  ;;  %v2584_v11 = vld [vmem:[%s5527_s2 + $0xa0] sm:$0xff] }
  0xa4   :  { %v594_v55 = vsub.f32 %v3768_v0, %v3855_v15  ;;  %v595_v62 = vsub.f32 %v3778_v29, %v3855_v15  ;;  %v596_v22 = vsub.f32 %v3788_v21, %v3855_v15  ;;  %v597_v19 = vsub.f32 %v3801_v1, %v3855_v15 }
  0xa5   :  { %v582_v35 = vmul.f32 0.0078125, %v579_v53  ;;  %v598_v42 = vsub.f32 %v3811_v31, %v3855_v15  ;;  %v599_v6 = vsub.f32 %v3820_v8, %v3855_v15  ;;  %v600_v45 = vsub.f32 %v3827_v52, %v3855_v15  ;;  %v2586_v53 = vld [vmem:[%s5527_s2 + $0xb0] sm:$0xff] }
  0xa6   :  { %v601_v57 = vsub.f32 %v3834_v2, %v3855_v15  ;;  %v602_v61 = vsub.f32 %v3839_v32, %v3855_v15  ;;  %v603_v41 = vsub.f32 %v3844_v60, %v3855_v15  ;;  %v2580_v32 = vld [vmem:[%s5527_s2 + $0x80] sm:$0xff]  ;;  %v2581_v60 = vld [vmem:[%s5527_s2 + $0x88] sm:$0xff] }
  0xa7   :  { %v584_v20 = vsub.f32 %v582_v35, %v583_v13  ;;  %v2917_v58 = vpack.c.bf16 %v2581_v60, %v2580_v32  ;;  %v2585_v15 = vld [vmem:[%s5527_s2 + $0xa8] sm:$0xff]  ;;  %v2587_v13 = vld [vmem:[%s5527_s2 + $0xb8] sm:$0xff] }
  0xa8   :  { %v2925_v38 = vpack.c.bf16 %v2585_v15, %v2584_v11  ;;  %v2929_v35 = vpack.c.bf16 %v2587_v13, %v2586_v53 }
  0xa9   :  { %v585_v54 = vmax.f32 %v584_v20, 0.0  ;;  %2918 = vmatprep.subr.bf16.mxu1 %v2917_v58  ;;  %v2588_v20 = vld [vmem:[%s5527_s2 + $0xc0] sm:$0xff] }
  0xaa   :  { %2920 = vmatpush3.bf16.msra.mxu1 %v2917_v58 }
  0xab   :  { %v586_v63 = vadd.f32 1e-05, %v585_v54  ;;  %2922 = vmatprep.subr.bf16.mxu1 %v2921_v34  ;;  %v2589_v54 = vld [vmem:[%s5527_s2 + $0xc8] sm:$0xff] }
  0xad   :  { %3000 = vrsqrt.f32 %v586_v63  ;;  %v2933_v63 = vpack.c.bf16 %v2589_v54, %v2588_v20 }
  0xae   :  { %2924 = vmatpush3.bf16.msra.mxu1 %v2921_v34 }
  0xaf   :  { %2926 = vmatprep.subr.bf16.mxu1 %v2925_v38 }
  0xb2   :  { %2928 = vmatpush3.bf16.msra.mxu1 %v2925_v38 }
  0xb3   :  { %2930 = vmatprep.subr.bf16.mxu1 %v2929_v35 }
  0xb6   :  { %2932 = vmatpush3.bf16.msra.mxu1 %v2929_v35 }
  0xb7   :  { %v3001_v56 = vpop.eup %3000  ;;  %2934 = vmatprep.subr.bf16.mxu1 %v2933_v63 }
  0xb8   :  { %v604_v50 = vmul.f32 %v3001_v56, %v588_v9  ;;  %v605_v18 = vmul.f32 %v3001_v56, %v589_v17  ;;  %v606_v24 = vmul.f32 %v3001_v56, %v590_v44  ;;  %v607_v36 = vmul.f32 %v3001_v56, %v591_v12  ;;  %v2590_v9 = vld [vmem:[%s5527_s2 + $0xd0] sm:$0xff]  ;;  %v2591_v17 = vld [vmem:[%s5527_s2 + $0xd8] sm:$0xff]  ;;  %v2592_v12 = vld [vmem:[%s5527_s2 + $0xe0] sm:$0xff] }
  0xb9   :  { %v608_v3 = vmul.f32 %v3001_v56, %v592_v43  ;;  %v609_v30 = vmul.f32 %v3001_v56, %v593_v33  ;;  %v610_v5 = vmul.f32 %v3001_v56, %v594_v55  ;;  %v611_v0 = vmul.f32 %v3001_v56, %v595_v62  ;;  %v2593_v43 = vld [vmem:[%s5527_s2 + $0xe8] sm:$0xff] }
  0xba   :  { %v620_v23 = vmax.f32 %v604_v50, 0.0  ;;  %v621_v26 = vmax.f32 %v605_v18, 0.0  ;;  %v622_v37 = vmax.f32 %v606_v24, 0.0  ;;  %v623_v39 = vmax.f32 %v607_v36, 0.0  ;;  %2936 = vmatpush3.bf16.msra.mxu1 %v2933_v63  ;;  %v2594_v50 = vld [vmem:[%s5527_s2 + $0xf0] sm:$0xff]  ;;  %v2595_v18 = vld [vmem:[%s5527_s2 + $0xf8] sm:$0xff] }
  0xbb   :  { %v624_v16 = vmax.f32 %v608_v3, 0.0  ;;  %v625_v27 = vmax.f32 %v609_v30, 0.0  ;;  %v626_v14 = vmax.f32 %v610_v5, 0.0  ;;  %v612_v4 = vmul.f32 %v3001_v56, %v596_v22 }
  0xbc   :  { %2749 = vmatprep.mubr.f32.mxu0 %v620_v23  ;;  %v627_v29 = vmax.f32 %v611_v0, 0.0  ;;  %v613_v40 = vmul.f32 %v3001_v56, %v597_v19  ;;  %v614_v28 = vmul.f32 %v3001_v56, %v598_v42  ;;  %v615_v59 = vmul.f32 %v3001_v56, %v599_v6 }
  0xbd   :  { %2750 = vmatmul.mubr.f32.vlgmr.msra.gmra.mrb[0].mxu0 %v621_v26  ;;  %v628_v21 = vmax.f32 %v612_v4, 0.0  ;;  %v616_v46 = vmul.f32 %v3001_v56, %v600_v45  ;;  %v617_v51 = vmul.f32 %v3001_v56, %v601_v57  ;;  %v618_v7 = vmul.f32 %v3001_v56, %v602_v61 }
  0xbe   :  { %2752 = vmatprep.mubr.f32.mxu0 %v622_v37  ;;  %v629_v1 = vmax.f32 %v613_v40, 0.0  ;;  %v630_v31 = vmax.f32 %v614_v28, 0.0  ;;  %v631_v8 = vmax.f32 %v615_v59, 0.0  ;;  %v619_v48 = vmul.f32 %v3001_v56, %v603_v41 }
  0xbf   :  { %v632_v52 = vmax.f32 %v616_v46, 0.0  ;;  %v633_v10 = vmax.f32 %v617_v51, 0.0  ;;  %v634_v2 = vmax.f32 %v618_v7, 0.0  ;;  %v2937_v44 = vpack.c.bf16 %v2591_v17, %v2590_v9 }
  0xc0   :  { %v635_v47 = vmax.f32 %v619_v48, 0.0  ;;  %v2941_v56 = vpack.c.bf16 %v2593_v43, %v2592_v12  ;;  %v2945_v26 = vpack.c.bf16 %v2595_v18, %v2594_v50 }
  0xc1   :  { %2753 = vmatmul.mubr.f32.gmra.mrb[2].mxu0 %v623_v39  ;;  %2938 = vmatprep.subr.bf16.mxu1 %v2937_v44 }
  0xc2   :  { %2755 = vmatprep.mubr.f32.mxu0 %v624_v16  ;;  %2940 = vmatpush3.bf16.msra.mxu1 %v2937_v44 }
  0xc3   :  { %2942 = vmatprep.subr.bf16.mxu1 %v2941_v56 }
  0xc5   :  { %2756 = vmatmul.mubr.f32.gmra.mrb[4].mxu0 %v625_v27 }
  0xc6   :  { %2758 = vmatprep.mubr.f32.mxu0 %v626_v14  ;;  %2944 = vmatpush3.bf16.msra.mxu1 %v2941_v56 }
  0xc7   :  { %2946 = vmatprep.subr.bf16.mxu1 %v2945_v26 }
  0xc9   :  { %2759 = vmatmul.mubr.f32.gmra.mrb[6].mxu0 %v627_v29 }
  0xca   :  { %2761 = vmatprep.mubr.f32.mxu0 %v628_v21  ;;  %2948 = vmatpush3.bf16.msra.mxu1 %v2945_v26 }
  0xcd   :  { %2762 = vmatmul.mubr.f32.gmra.mrb[8].mxu0 %v629_v1 }
  0xce   :  { %2764 = vmatprep.mubr.f32.mxu0 %v630_v31 }
  0xd1   :  { %2765 = vmatmul.mubr.f32.gmra.mrb[10].mxu0 %v631_v8 }
  0xd2   :  { %2767 = vmatprep.mubr.f32.mxu0 %v632_v52 }
  0xd5   :  { %2768 = vmatmul.mubr.f32.gmra.mrb[12].mxu0 %v633_v10 }
  0xd6   :  { %2770 = vmatprep.mubr.f32.mxu0 %v634_v2 }
  0xd9   :  { %2771 = vmatmul.mubr.f32.gmra.mrb[14].mxu0 %v635_v47 }
 0x190   :  { %v3939_v24 = vpop.f32.mrb[0].mxu0 }
 0x191   :  { %v819_v36 = vmul.f32 %v3939_v24, %v3939_v24  ;;  %v3943_v33 = vpop.f32.mrb[1].mxu0 }
 0x192   :  { %v797_v55 = vadd.f32 %v3939_v24, %v3943_v33  ;;  %v818_v23 = vmul.f32 %v3943_v33, %v3943_v33 }
 0x194   :  { %v834_v37 = vadd.f32 %v819_v36, %v818_v23  ;;  %v3949_v3 = vpop.f32.mrb[2].mxu0 }
 0x195   :  { %v3951_v39 = vpop.f32.mrb[3].mxu0  ;;  %v821_v16 = vmul.f32 %v3949_v3, %v3949_v3 }
 0x196   :  { %v798_v30 = vadd.f32 %v797_v55, %v3951_v39  ;;  %v820_v62 = vmul.f32 %v3951_v39, %v3951_v39 }
 0x198   :  { %v835_v5 = vadd.f32 %v834_v37, %v820_v62  ;;  %v3958_v22 = vpop.f32.mrb[4].mxu0  ;;  %v799_v27 = vadd.f32 %v3949_v3, %v798_v30 }
 0x199   :  { %v3961_v0 = vpop.f32.mrb[5].mxu0  ;;  %v823_v42 = vmul.f32 %v3958_v22, %v3958_v22 }
 0x19a   :  { %v800_v19 = vadd.f32 %v799_v27, %v3961_v0  ;;  %v822_v14 = vmul.f32 %v3961_v0, %v3961_v0  ;;  %v836_v4 = vadd.f32 %v835_v5, %v821_v16 }
 0x19c   :  { %v837_v29 = vadd.f32 %v836_v4, %v822_v14  ;;  %v3968_v40 = vpop.f32.mrb[6].mxu0  ;;  %v801_v6 = vadd.f32 %v3958_v22, %v800_v19 }
 0x19d   :  { %v3971_v21 = vpop.f32.mrb[7].mxu0  ;;  %v825_v59 = vmul.f32 %v3968_v40, %v3968_v40 }
 0x19e   :  { %v802_v28 = vadd.f32 %v801_v6, %v3971_v21  ;;  %v824_v45 = vmul.f32 %v3971_v21, %v3971_v21  ;;  %v838_v1 = vadd.f32 %v837_v29, %v823_v42 }
 0x1a0   :  { %v839_v57 = vadd.f32 %v838_v1, %v824_v45  ;;  %v3978_v31 = vpop.f32.mrb[8].mxu0  ;;  %v803_v46 = vadd.f32 %v3968_v40, %v802_v28 }
 0x1a1   :  { %v3981_v61 = vpop.f32.mrb[9].mxu0  ;;  %v827_v52 = vmul.f32 %v3978_v31, %v3978_v31 }
 0x1a2   :  { %v804_v8 = vadd.f32 %v803_v46, %v3981_v61  ;;  %v826_v51 = vmul.f32 %v3981_v61, %v3981_v61  ;;  %v840_v41 = vadd.f32 %v839_v57, %v825_v59 }
 0x1a4   :  { %v841_v7 = vadd.f32 %v840_v41, %v826_v51  ;;  %v3988_v10 = vpop.f32.mrb[10].mxu0  ;;  %v805_v48 = vadd.f32 %v3978_v31, %v804_v8  ;;  %v4180_v51 = vld [vmem:[%s5526_s1 + $0xa] ss:$0 sm:$0xff] }
 0x1a5   :  { %v3991_v2 = vpop.f32.mrb[11].mxu0  ;;  %v829_v49 = vmul.f32 %v3988_v10, %v3988_v10 }
 0x1a6   :  { %v806_v47 = vadd.f32 %v805_v48, %v3991_v2  ;;  %v828_v32 = vmul.f32 %v3991_v2, %v3991_v2  ;;  %v842_v60 = vadd.f32 %v841_v7, %v827_v52 }
 0x1a8   :  { %v843_v58 = vadd.f32 %v842_v60, %v828_v32  ;;  %v3998_v25 = vpop.f32.mrb[12].mxu0  ;;  %v807_v34 = vadd.f32 %v3988_v10, %v806_v47  ;;  %v4040_v47 = vld [vmem:[%s5526_s1 + $0xf] ss:$0 sm:$0xff] }
 0x1a9   :  { %v778_v11 = vpop.f32.mrb[13].mxu0  ;;  %v831_v13 = vmul.f32 %v3998_v25, %v3998_v25  ;;  %v4045_v60 = vmul.f32 0.0, %v4040_v47 }
 0x1aa   :  { %v808_v15 = vadd.f32 %v807_v34, %v778_v11  ;;  %v830_v38 = vmul.f32 %v778_v11, %v778_v11  ;;  %v844_v53 = vadd.f32 %v843_v58, %v829_v49  ;;  %v5763_v49 = vld [vmem:[#allocation5_spill] sm:$0xff] }
 0x1ab   :  { %vm18_vm1 = vcmp.eq.s32.totalorder %v5763_v49, 7 }
 0x1ac   :  { %v845_v35 = vadd.f32 %v844_v53, %v830_v38  ;;  %v2772_v20 = vpop.f32.mrb[14].mxu0  ;;  %v809_v54 = vadd.f32 %v3998_v25, %v808_v15 }
 0x1ad   :  { %v788_v63 = vpop.f32.mrb[15].mxu0  ;;  %v833_v12 = vmul.f32 %v2772_v20, %v2772_v20 }
 0x1ae   :  { %v810_v9 = vadd.f32 %v809_v54, %v788_v63  ;;  %v832_v17 = vmul.f32 %v788_v63, %v788_v63  ;;  %v846_v44 = vadd.f32 %v845_v35, %v831_v13 }
 0x1b0   :  { %v811_v43 = vadd.f32 %v2772_v20, %v810_v9  ;;  %v847_v56 = vadd.f32 %v846_v44, %v832_v17 }
 0x1b2   :  { %v812_v50 = vrot.slane %v811_v43, 4  ;;  %v848_v18 = vadd.f32 %v847_v56, %v833_v12 }
 0x1b4   :  { %v813_v36 = vadd.f32 %v812_v50, %v811_v43  ;;  %v849_v55 = vrot.slane %v848_v18, 4 }
 0x1b6   :  { %v814_v23 = vrot.slane %v813_v36, 2  ;;  %v850_v26 = vadd.f32 %v849_v55, %v848_v18 }
 0x1b8   :  { %v815_v37 = vadd.f32 %v814_v23, %v813_v36  ;;  %v851_v30 = vrot.slane %v850_v26, 2  ;;  %v4080_v36 = vld [vmem:[%s5526_s1 + $0x9] ss:$0 sm:$0xff] }
 0x1ba   :  { %v816_v62 = vrot.slane %v815_v37, 1  ;;  %v852_v16 = vadd.f32 %v851_v30, %v850_v26  ;;  %v4089_v30 = vld [vmem:[%s5526_s1 + $0x10] ss:$0 sm:$0xff] }
 0x1bc   :  { %v817_v5 = vadd.f32 %v816_v62, %v815_v37  ;;  %v853_v27 = vrot.slane %v852_v16, 1 }
 0x1be   :  { %v854_v19 = vadd.f32 %v853_v27, %v852_v16  ;;  %v4004_v14 = vmul.f32 0.0078125, %v817_v5  ;;  %v4095_v27 = vmul.f32 0.0, %v4089_v30 }
 0x1c0   :  { %v856_v4 = vmul.f32 0.0078125, %v854_v19  ;;  %v857_v42 = vmul.f32 %v4004_v14, %v4004_v14  ;;  %v867_v29 = vsub.f32 %v3958_v22, %v4004_v14  ;;  %v868_v6 = vsub.f32 %v3971_v21, %v4004_v14 }
 0x1c1   :  { %v869_v28 = vsub.f32 %v3968_v40, %v4004_v14  ;;  %v872_v45 = vsub.f32 %v3991_v2, %v4004_v14  ;;  %v873_v1 = vsub.f32 %v3988_v10, %v4004_v14  ;;  %v874_v59 = vsub.f32 %v778_v11, %v4004_v14 }
 0x1c2   :  { %v858_v57 = vsub.f32 %v856_v4, %v857_v42  ;;  %v875_v46 = vsub.f32 %v3998_v25, %v4004_v14  ;;  %v876_v22 = vsub.f32 %v788_v63, %v4004_v14  ;;  %v877_v8 = vsub.f32 %v2772_v20, %v4004_v14 }
 0x1c4   :  { %v859_v52 = vmax.f32 %v858_v57, 0.0 }
 0x1c6   :  { %v860_v2 = vadd.f32 1e-05, %v859_v52 }
 0x1c8   :  { %3002 = vrsqrt.f32 %v860_v2 }
 0x1d2   :  { %v4042_v32 = vpop.eup %3002 }
 0x1d3   :  { %v883_v58 = vmul.f32 %v4042_v32, %v867_v29  ;;  %v884_v25 = vmul.f32 %v4042_v32, %v868_v6  ;;  %v885_v34 = vmul.f32 %v4042_v32, %v869_v28  ;;  %v888_v11 = vmul.f32 %v4042_v32, %v872_v45 }
 0x1d4   :  { %v889_v15 = vmul.f32 %v4042_v32, %v873_v1  ;;  %v890_v38 = vmul.f32 %v4042_v32, %v874_v59  ;;  %v891_v53 = vmul.f32 %v4042_v32, %v875_v46  ;;  %v892_v13 = vmul.f32 %v4042_v32, %v876_v22 }
 0x1d5   :  { %v893_v35 = vmul.f32 %v4042_v32, %v877_v8  ;;  %v4057_v20 = vmax.f32 %v883_v58, 0.0  ;;  %v4059_v54 = vmax.f32 %v884_v25, 0.0  ;;  %v4061_v63 = vmax.f32 %v885_v34, 0.0  ;;  %v4135_v25 = vld [vmem:[%s5526_s1 + $0xc] ss:$0 sm:$0xff] }
 0x1d6   :  { %v4063_v9 = vmax.f32 %v888_v11, 0.0  ;;  %v4065_v17 = vmax.f32 %v889_v15, 0.0  ;;  %v4067_v44 = vmax.f32 %v890_v38, 0.0  ;;  %v4069_v12 = vmax.f32 %v891_v53, 0.0 }
 0x1d7   :  { %v4071_v43 = vmax.f32 %v892_v13, 0.0  ;;  %v4073_v56 = vmax.f32 %v893_v35, 0.0  ;;  %v915_v50 = vrot.slane %v4057_v20, 7  ;;  %v916_v18 = vrot.slane %v4059_v54, 7 }
 0x1d8   :  { %v917_v55 = vrot.slane %v4061_v63, 7  ;;  %v920_v23 = vrot.slane %v4063_v9, 7  ;;  %v921_v26 = vrot.slane %v4065_v17, 7  ;;  %v922_v37 = vrot.slane %v4067_v44, 7 }
 0x1d9   :  { %v923_v62 = vrot.slane %v4069_v12, 7  ;;  %v924_v16 = vrot.slane %v4071_v43, 7  ;;  %v925_v5 = vrot.slane %v4073_v56, 7  ;;  %v4099_v19 = vsel %vm17_vm0, 0.0, %v915_v50 }
 0x1da   :  { %v4103_v4 = vsel %vm17_vm0, 0.0, %v916_v18  ;;  %v933_v42 = vsel %vm17_vm0, 0.0, %v917_v55  ;;  %v4108_v29 = vmul.f32 0.0, %v4080_v36  ;;  %v4112_v6 = vsel %vm17_vm0, 0.0, %v920_v23 }
 0x1db   :  { %v4116_v28 = vsel %vm17_vm0, 0.0, %v921_v26  ;;  %v938_v45 = vsel %vm17_vm0, 0.0, %v922_v37  ;;  %v939_v1 = vsel %vm17_vm0, 0.0, %v923_v62  ;;  %v952_v59 = vrot.slane %v4063_v9, 1 }
 0x1dc   :  { %5764 = vst [vmem:[#allocation22_spill] sm:$0xff] %v4108_v29  ;;  %5765 = vst [vmem:[#allocation23_spill] sm:$0xff] %v4116_v28  ;;  %v953_v57 = vrot.slane %v4065_v17, 1  ;;  %v954_v46 = vrot.slane %v4067_v44, 1  ;;  %v955_v22 = vrot.slane %v4069_v12, 1  ;;  %v940_v8 = vsel %vm17_vm0, 0.0, %v924_v16 }
 0x1dd   :  { %v941_v52 = vsel %vm17_vm0, 0.0, %v925_v5  ;;  %v956_v2 = vrot.slane %v4071_v43, 1  ;;  %v4139_v34 = vsel %vm18_vm1, 0.0, %v952_v59  ;;  %v985_v15 = vmul.f32 %v4080_v36, %v4099_v19 }
 0x1de   :  { %5766 = vst [vmem:[#allocation24_spill] sm:$0xff] %v4139_v34  ;;  %v4143_v11 = vsel %vm18_vm1, 0.0, %v953_v57  ;;  %v986_v38 = vmul.f32 %v4080_v36, %v4103_v4  ;;  %v4151_v53 = vsel %vm18_vm1, 0.0, %v954_v46  ;;  %v4155_v13 = vsel %vm18_vm1, 0.0, %v955_v22 }
 0x1df   :  { %5767 = vst [vmem:[#allocation26_spill] sm:$0xff] %v4143_v11  ;;  %v989_v35 = vmul.f32 %v4080_v36, %v4112_v6  ;;  %v990_v50 = vmul.f32 %v4080_v36, %v4116_v28  ;;  %v991_v18 = vmul.f32 %v4080_v36, %v938_v45  ;;  %v992_v55 = vmul.f32 %v4080_v36, %v939_v1 }
 0x1e0   :  { %v993_v23 = vmul.f32 %v4080_v36, %v940_v8  ;;  %v1005_v26 = vmul.f32 %v4135_v25, %v4103_v4  ;;  %v1006_v37 = vmul.f32 %v4135_v25, %v933_v42  ;;  %v1010_v62 = vmul.f32 %v4135_v25, %v4116_v28 }
 0x1e1   :  { %v1011_v16 = vmul.f32 %v4135_v25, %v938_v45  ;;  %v1012_v5 = vmul.f32 %v4135_v25, %v939_v1  ;;  %v4173_v59 = vsel %vm18_vm1, 0.0, %v956_v2  ;;  %v1013_v57 = vmul.f32 %v4135_v25, %v940_v8 }
 0x1e2   :  { %v1014_v46 = vmul.f32 %v4135_v25, %v941_v52  ;;  %v1021_v22 = vadd.f32 %v1005_v26, %v985_v15  ;;  %v1022_v48 = vadd.f32 %v1006_v37, %v986_v38  ;;  %v1026_v10 = vadd.f32 %v1010_v62, %v989_v35 }
 0x1e3   :  { %v1027_v7 = vadd.f32 %v1011_v16, %v990_v50  ;;  %v1028_v41 = vadd.f32 %v1012_v5, %v991_v18  ;;  %v1029_v40 = vadd.f32 %v1013_v57, %v992_v55  ;;  %v1042_v58 = vmul.f32 %v4040_v47, %v933_v42  ;;  %v4196_v42 = vld [vmem:[%s5526_s1 + $0xd] ss:$0 sm:$0xff] }
 0x1e4   :  { %v1030_v21 = vadd.f32 %v1014_v46, %v993_v23  ;;  %v1047_v2 = vmul.f32 %v4040_v47, %v938_v45  ;;  %v1048_v28 = vmul.f32 %v4040_v47, %v939_v1  ;;  %v1049_v29 = vmul.f32 %v4040_v47, %v940_v8 }
 0x1e5   :  { %v1050_v15 = vmul.f32 %v4040_v47, %v941_v52  ;;  %v1058_v38 = vadd.f32 %v4045_v60, %v1022_v48  ;;  %v4188_v35 = vadd.f32 %v1042_v58, %v1021_v22  ;;  %v1079_v55 = vmul.f32 %v4180_v51, %v4059_v54 }
 0x1e6   :  { %v1062_v50 = vadd.f32 %v1047_v2, %v1026_v10  ;;  %v1066_v18 = vadd.f32 %v4045_v60, %v1030_v21  ;;  %v1063_v45 = vadd.f32 %v1048_v28, %v1027_v7  ;;  %v1064_v1 = vadd.f32 %v1049_v29, %v1028_v41 }
 0x1e7   :  { %v1065_v8 = vadd.f32 %v1050_v15, %v1029_v40  ;;  %v1082_v52 = vmul.f32 %v4180_v51, %v4063_v9  ;;  %v1083_v48 = vmul.f32 %v4180_v51, %v4065_v17  ;;  %v1084_v21 = vmul.f32 %v4180_v51, %v4067_v44  ;;  %v4227_v15 = vld [vmem:[%s5526_s1 + $0xb] ss:$0 sm:$0xff] }
 0x1e8   :  { %v1085_v10 = vmul.f32 %v4180_v51, %v4069_v12  ;;  %v1086_v60 = vmul.f32 %v4180_v51, %v4071_v43  ;;  %v1094_v58 = vadd.f32 %v1079_v55, %v1058_v38  ;;  %v1115_v40 = vmul.f32 %v4196_v42, %v4061_v63 }
 0x1e9   :  { %v1098_v23 = vadd.f32 %v1082_v52, %v1062_v50  ;;  %v1119_v41 = vmul.f32 %v4196_v42, %v4065_v17  ;;  %v1099_v7 = vadd.f32 %v1083_v48, %v1063_v45  ;;  %v1100_v29 = vadd.f32 %v1084_v21, %v1064_v1  ;;  %v4240_v52 = vld [vmem:[%s5526_s1 + $0xe] ss:$0 sm:$0xff] }
 0x1ea   :  { %v1101_v28 = vadd.f32 %v1085_v10, %v1065_v8  ;;  %v1102_v26 = vadd.f32 %v1086_v60, %v1066_v18  ;;  %v1120_v37 = vmul.f32 %v4196_v42, %v4067_v44  ;;  %v1121_v62 = vmul.f32 %v4196_v42, %v4069_v12  ;;  %5769 = vst [vmem:[#allocation27_spill] sm:$0xff] %v4240_v52 }
 0x1eb   :  { %v1122_v16 = vmul.f32 %v4196_v42, %v4071_v43  ;;  %v1123_v5 = vmul.f32 %v4196_v42, %v4073_v56  ;;  %v1131_v57 = vadd.f32 %v1115_v40, %v1094_v58  ;;  %v1135_v46 = vadd.f32 %v1119_v41, %v1098_v23 }
 0x1ec   :  { %v1156_v22 = vmul.f32 %v4089_v30, %v4067_v44  ;;  %v1157_v2 = vmul.f32 %v4089_v30, %v4069_v12  ;;  %v1136_v38 = vadd.f32 %v1120_v37, %v1099_v7  ;;  %v1137_v50 = vadd.f32 %v1121_v62, %v1100_v29 }
 0x1ed   :  { %v1138_v18 = vadd.f32 %v1122_v16, %v1101_v28  ;;  %v1139_v55 = vadd.f32 %v1123_v5, %v1102_v26  ;;  %v5768_v45 = vrot.slane %v4073_v56, 1  ;;  %v1158_v44 = vmul.f32 %v4089_v30, %v4071_v43  ;;  %v4258_v28 = vld [vmem:[%s5526_s1 + $0x11] ss:$0 sm:$0xff] }
 0x1ee   :  { %v1159_v12 = vmul.f32 %v4089_v30, %v4073_v56  ;;  %v1171_v8 = vadd.f32 %v1156_v22, %v1135_v46  ;;  %v1172_v48 = vadd.f32 %v1157_v2, %v1136_v38  ;;  %v1191_v10 = vmul.f32 %v4227_v15, %v4139_v34  ;;  %5770 = vst [vmem:[#allocation28_spill] sm:$0xff] %v4258_v28 }
 0x1ef   :  { %v973_v1 = vsel %vm18_vm1, 0.0, %v5768_v45  ;;  %v1175_v21 = vadd.f32 %v4095_v27, %v1139_v55  ;;  %v1192_v60 = vmul.f32 %v4227_v15, %v4143_v11  ;;  %v1173_v58 = vadd.f32 %v1158_v44, %v1137_v50 }
 0x1f0   :  { %v1174_v43 = vadd.f32 %v1159_v12, %v1138_v18  ;;  %v1193_v56 = vmul.f32 %v4227_v15, %v4151_v53  ;;  %v1194_v23 = vmul.f32 %v4227_v15, %v4155_v13  ;;  %v1195_v40 = vmul.f32 %v4227_v15, %v4173_v59 }
 0x1f1   :  { %v1207_v41 = vadd.f32 %v1191_v10, %v1171_v8  ;;  %v1208_v7 = vadd.f32 %v1192_v60, %v1172_v48  ;;  %v1228_v29 = vmul.f32 %v4240_v52, %v4143_v11  ;;  %v1229_v62 = vmul.f32 %v4240_v52, %v4151_v53 }
 0x1f2   :  { %v1209_v26 = vadd.f32 %v1193_v56, %v1173_v58  ;;  %v1210_v37 = vadd.f32 %v1194_v23, %v1174_v43  ;;  %v1230_v16 = vmul.f32 %v4240_v52, %v4155_v13  ;;  %v1211_v5 = vadd.f32 %v1195_v40, %v1175_v21 }
 0x1f3   :  { %v1231_v46 = vmul.f32 %v4240_v52, %v4173_v59  ;;  %v1232_v22 = vmul.f32 %v4240_v52, %v973_v1  ;;  %v1244_v2 = vadd.f32 %v1228_v29, %v1207_v41  ;;  %v1245_v38 = vadd.f32 %v1229_v62, %v1208_v7 }
 0x1f4   :  { %v1246_v50 = vadd.f32 %v1230_v16, %v1209_v26  ;;  %v1265_v18 = vmul.f32 %v4258_v28, %v4151_v53  ;;  %v1266_v55 = vmul.f32 %v4258_v28, %v4155_v13  ;;  %v1267_v12 = vmul.f32 %v4258_v28, %v4173_v59 }
 0x1f5   :  { %v1247_v45 = vadd.f32 %v1231_v46, %v1210_v37  ;;  %v4271_v44 = vadd.f32 %v1232_v22, %v1211_v5  ;;  %v1268_v8 = vmul.f32 %v4258_v28, %v973_v1  ;;  %v5774_v10 = vsub.f32 %v3943_v33, %v4004_v14 }
 0x1f6   :  { %v4276_v48 = vadd.f32 %v1265_v18, %v1244_v2  ;;  %v4278_v21 = vadd.f32 %v1266_v55, %v1245_v38  ;;  %v5775_v13 = vsub.f32 %v3939_v24, %v4004_v14  ;;  %v4288_v58 = vadd.f32 %v1267_v12, %v1246_v50 }
 0x1f7   :  { %5771 = vst [vmem:[#allocation29_spill] sm:$0xff] %v4271_v44  ;;  %v878_v53 = vmul.f32 %v4042_v32, %v5774_v10  ;;  %v4290_v43 = vadd.f32 %v1268_v8, %v1247_v45  ;;  %v5778_v59 = vsub.f32 %v3951_v39, %v4004_v14  ;;  %v4297_v56 = vmul.f32 0.0, %v4180_v51 }
 0x1f8   :  { %5772 = vst [vmem:[#allocation32_spill] sm:$0xff] %v4276_v48  ;;  %5773 = vst [vmem:[#allocation33_spill] sm:$0xff] %v4278_v21  ;;  %v879_v60 = vmul.f32 %v4042_v32, %v5775_v13  ;;  %v5779_v33 = vsub.f32 %v3949_v3, %v4004_v14  ;;  %v5780_v24 = vsub.f32 %v3961_v0, %v4004_v14  ;;  %v4325_v37 = vmul.f32 0.0, %v4227_v15  ;;  %v5789_v21 = vld [vmem:[#allocation22_spill] sm:$0xff] }
 0x1f9   :  { %5776 = vst [vmem:[#allocation34_spill] sm:$0xff] %v4288_v58  ;;  %5777 = vst [vmem:[#allocation35_spill] sm:$0xff] %v4290_v43  ;;  %v880_v1 = vmul.f32 %v4042_v32, %v5778_v59  ;;  %v5781_v41 = vsub.f32 %v3981_v61, %v4004_v14  ;;  %v5782_v7 = vsub.f32 %v3978_v31, %v4004_v14  ;;  %v4322_v0 = vmax.f32 %v878_v53, 0.0 }
 0x1fa   :  { %v881_v23 = vmul.f32 %v4042_v32, %v5779_v33  ;;  %v882_v40 = vmul.f32 %v4042_v32, %v5780_v24  ;;  %v4317_v3 = vmul.f32 %v4040_v47, %v4103_v4  ;;  %v4320_v26 = vadd.f32 %v4095_v27, %v1131_v57  ;;  %5784 = vst [vmem:[#allocation38_spill] sm:$0xff] %v4325_v37 }
 0x1fb   :  { %v886_v39 = vmul.f32 %v4042_v32, %v5781_v41  ;;  %v887_v29 = vmul.f32 %v4042_v32, %v5782_v7  ;;  %v4327_v61 = vmax.f32 %v879_v60, 0.0  ;;  %v4329_v62 = vmax.f32 %v880_v1, 0.0 }
 0x1fc   :  { %5783 = vst [vmem:[#allocation37_spill] sm:$0xff] %v4320_v26  ;;  %v4331_v16 = vmax.f32 %v881_v23, 0.0  ;;  %v4333_v31 = vmax.f32 %v882_v40, 0.0  ;;  %v910_v27 = vrot.slane %v4322_v0, 7  ;;  %v942_v4 = vrot.slane %v4322_v0, 1 }
 0x1fd   :  { %v4335_v14 = vmax.f32 %v886_v39, 0.0  ;;  %v4337_v32 = vmax.f32 %v887_v29, 0.0  ;;  %v911_v57 = vrot.slane %v4327_v61, 7  ;;  %v912_v5 = vrot.slane %v4329_v62, 7 }
 0x1fe   :  { %v913_v46 = vrot.slane %v4331_v16, 7  ;;  %v914_v22 = vrot.slane %v4333_v31, 7  ;;  %v926_v50 = vsel %vm17_vm0, 0.0, %v910_v27  ;;  %v943_v18 = vrot.slane %v4327_v61, 1 }
 0x1ff   :  { %v918_v2 = vrot.slane %v4335_v14, 7  ;;  %v919_v38 = vrot.slane %v4337_v32, 7  ;;  %v927_v55 = vsel %vm17_vm0, 0.0, %v911_v57  ;;  %v928_v45 = vsel %vm17_vm0, 0.0, %v912_v5 }
 0x200   :  { %v929_v12 = vsel %vm17_vm0, 0.0, %v913_v46  ;;  %v930_v8 = vsel %vm17_vm0, 0.0, %v914_v22  ;;  %v944_v13 = vrot.slane %v4329_v62, 1  ;;  %v945_v60 = vrot.slane %v4331_v16, 1 }
 0x201   :  { %v934_v10 = vsel %vm17_vm0, 0.0, %v918_v2  ;;  %v935_v53 = vsel %vm17_vm0, 0.0, %v919_v38  ;;  %v946_v59 = vrot.slane %v4333_v31, 1  ;;  %v947_v1 = vrot.slane %v4057_v20, 1 }
 0x202   :  { %v948_v33 = vrot.slane %v4059_v54, 1  ;;  %v949_v23 = vrot.slane %v4061_v63, 1  ;;  %v950_v24 = vrot.slane %v4335_v14, 1  ;;  %v951_v40 = vrot.slane %v4337_v32, 1 }
 0x203   :  { %v4372_v41 = vsel %vm18_vm1, 0.0, %v942_v4  ;;  %v4376_v39 = vsel %vm18_vm1, 0.0, %v943_v18  ;;  %v4380_v7 = vsel %vm18_vm1, 0.0, %v944_v13  ;;  %v4384_v29 = vsel %vm18_vm1, 0.0, %v945_v60 }
 0x204   :  { %v4388_v27 = vsel %vm18_vm1, 0.0, %v946_v59  ;;  %v4392_v4 = vsel %vm18_vm1, 0.0, %v947_v1  ;;  %v4396_v57 = vsel %vm18_vm1, 0.0, %v948_v33  ;;  %v4400_v5 = vsel %vm18_vm1, 0.0, %v949_v23 }
 0x205   :  { %5785 = vst [vmem:[#allocation39_spill] sm:$0xff] %v4396_v57  ;;  %5786 = vst [vmem:[#allocation40_spill] sm:$0xff] %v4400_v5  ;;  %v4404_v46 = vsel %vm18_vm1, 0.0, %v950_v24  ;;  %v4408_v22 = vsel %vm18_vm1, 0.0, %v951_v40  ;;  %v980_v2 = vmul.f32 %v4080_v36, %v926_v50  ;;  %v981_v38 = vmul.f32 %v4080_v36, %v927_v55 }
 0x206   :  { %5787 = vst [vmem:[#allocation42_spill] sm:$0xff] %v4404_v46  ;;  %5788 = vst [vmem:[#allocation6_spill] sm:$0xff] %v4408_v22  ;;  %v982_v18 = vmul.f32 %v4080_v36, %v928_v45  ;;  %v983_v13 = vmul.f32 %v4080_v36, %v929_v12  ;;  %v984_v60 = vmul.f32 %v4080_v36, %v930_v8 }
 0x207   :  { %v987_v59 = vmul.f32 %v4080_v36, %v934_v10  ;;  %v988_v1 = vmul.f32 %v4080_v36, %v935_v53  ;;  %v999_v33 = vmul.f32 %v4135_v25, %v926_v50  ;;  %v1000_v23 = vmul.f32 %v4135_v25, %v927_v55 }
 0x208   :  { %v1001_v24 = vmul.f32 %v4135_v25, %v928_v45  ;;  %v1002_v40 = vmul.f32 %v4135_v25, %v929_v12  ;;  %v1003_v49 = vmul.f32 %v4135_v25, %v930_v8  ;;  %v1004_v43 = vmul.f32 %v4135_v25, %v4099_v19 }
 0x209   :  { %v1007_v44 = vmul.f32 %v4135_v25, %v934_v10  ;;  %v1008_v58 = vmul.f32 %v4135_v25, %v935_v53  ;;  %v1009_v36 = vmul.f32 %v4135_v25, %v4112_v6  ;;  %v1015_v50 = vadd.f32 %v999_v33, %v5789_v21 }
 0x20a   :  { %v1016_v48 = vadd.f32 %v1000_v23, %v980_v2  ;;  %v1017_v11 = vadd.f32 %v1001_v24, %v981_v38  ;;  %v1018_v28 = vadd.f32 %v1002_v40, %v982_v18  ;;  %v1019_v34 = vadd.f32 %v1003_v49, %v983_v13 }
 0x20b   :  { %v1020_v5 = vadd.f32 %v1004_v43, %v984_v60  ;;  %v1023_v52 = vadd.f32 %v1007_v44, %v5789_v21  ;;  %v1024_v26 = vadd.f32 %v1008_v58, %v987_v59  ;;  %v1025_v37 = vadd.f32 %v1009_v36, %v988_v1  ;;  %v5790_v43 = vld [vmem:[#allocation23_spill] sm:$0xff] }
 0x20c   :  { %v1036_v22 = vmul.f32 %v4040_v47, %v927_v55  ;;  %v1037_v10 = vmul.f32 %v4040_v47, %v928_v45  ;;  %v1038_v46 = vmul.f32 %v4040_v47, %v929_v12  ;;  %v1039_v57 = vmul.f32 %v4040_v47, %v930_v8 }
 0x20d   :  { %v1040_v25 = vmul.f32 %v4040_v47, %v4099_v19  ;;  %v1044_v2 = vmul.f32 %v4040_v47, %v935_v53  ;;  %v1045_v49 = vmul.f32 %v4040_v47, %v4112_v6  ;;  %v1046_v44 = vmul.f32 %v4040_v47, %v5790_v43 }
 0x20e   :  { %v1051_v21 = vadd.f32 %v1036_v22, %v1015_v50  ;;  %v1052_v58 = vadd.f32 %v1037_v10, %v1016_v48  ;;  %v1053_v55 = vadd.f32 %v1038_v46, %v1017_v11  ;;  %v1054_v38 = vadd.f32 %v1039_v57, %v1018_v28 }
 0x20f   :  { %v1055_v45 = vadd.f32 %v1040_v25, %v1019_v34  ;;  %v1056_v12 = vadd.f32 %v4317_v3, %v1020_v5  ;;  %v1059_v18 = vadd.f32 %v1044_v2, %v1023_v52  ;;  %v1060_v8 = vadd.f32 %v1045_v49, %v1024_v26 }
 0x210   :  { %v1061_v13 = vadd.f32 %v1046_v44, %v1025_v37  ;;  %v1073_v19 = vmul.f32 %v4180_v51, %v4322_v0  ;;  %v1074_v53 = vmul.f32 %v4180_v51, %v4327_v61  ;;  %v1075_v6 = vmul.f32 %v4180_v51, %v4329_v62 }
 0x211   :  { %v1076_v47 = vmul.f32 %v4180_v51, %v4331_v16  ;;  %v1077_v34 = vmul.f32 %v4180_v51, %v4333_v31  ;;  %v1078_v11 = vmul.f32 %v4180_v51, %v4057_v20  ;;  %v1080_v52 = vmul.f32 %v4180_v51, %v4335_v14 }
 0x212   :  { %v1081_v28 = vmul.f32 %v4180_v51, %v4337_v32  ;;  %v1087_v48 = vadd.f32 %v4297_v56, %v1051_v21  ;;  %v1088_v3 = vadd.f32 %v1073_v19, %v1052_v58  ;;  %v1089_v26 = vadd.f32 %v1074_v53, %v1053_v55 }
 0x213   :  { %v1090_v37 = vadd.f32 %v1075_v6, %v1054_v38  ;;  %v1091_v57 = vadd.f32 %v1076_v47, %v1055_v45  ;;  %v1092_v5 = vadd.f32 %v1077_v34, %v1056_v12  ;;  %v1093_v46 = vadd.f32 %v1078_v11, %v4188_v35 }
 0x214   :  { %v1095_v22 = vadd.f32 %v4297_v56, %v1059_v18  ;;  %v1096_v60 = vadd.f32 %v1080_v52, %v1060_v8  ;;  %v1097_v59 = vadd.f32 %v1081_v28, %v1061_v13  ;;  %v1108_v1 = vmul.f32 %v4196_v42, %v4322_v0  ;;  %v5791_v28 = vld [vmem:[#allocation39_spill] sm:$0xff] }
 0x215   :  { %v1109_v33 = vmul.f32 %v4196_v42, %v4327_v61  ;;  %v1110_v51 = vmul.f32 %v4196_v42, %v4329_v62  ;;  %v1111_v23 = vmul.f32 %v4196_v42, %v4331_v16  ;;  %v1112_v24 = vmul.f32 %v4196_v42, %v4333_v31 }
 0x216   :  { %v1113_v35 = vmul.f32 %v4196_v42, %v4057_v20  ;;  %v1114_v56 = vmul.f32 %v4196_v42, %v4059_v54  ;;  %v1116_v0 = vmul.f32 %v4196_v42, %v4335_v14  ;;  %v1117_v40 = vmul.f32 %v4196_v42, %v4337_v32 }
 0x217   :  { %v1118_v36 = vmul.f32 %v4196_v42, %v4063_v9  ;;  %v1124_v50 = vadd.f32 %v1108_v1, %v1087_v48  ;;  %v1125_v10 = vadd.f32 %v1109_v33, %v1088_v3  ;;  %v1126_v25 = vadd.f32 %v1110_v51, %v1089_v26  ;;  %v5792_v3 = vld [vmem:[#allocation42_spill] sm:$0xff] }
 0x218   :  { %v1127_v2 = vadd.f32 %v1111_v23, %v1090_v37  ;;  %v1128_v49 = vadd.f32 %v1112_v24, %v1091_v57  ;;  %v1129_v43 = vadd.f32 %v1113_v35, %v1092_v5  ;;  %v1130_v44 = vadd.f32 %v1114_v56, %v1093_v46  ;;  %v5793_v37 = vld [vmem:[#allocation6_spill] sm:$0xff]  ;;  %v5795_v23 = vld [vmem:[#allocation37_spill] sm:$0xff] }
 0x219   :  { %v1132_v21 = vadd.f32 %v1116_v0, %v1095_v22  ;;  %v1133_v58 = vadd.f32 %v1117_v40, %v1096_v60  ;;  %v1134_v55 = vadd.f32 %v1118_v36, %v1097_v59  ;;  %v1145_v38 = vmul.f32 %v4089_v30, %v4327_v61  ;;  %v5794_v5 = vld [vmem:[#allocation38_spill] sm:$0xff]  ;;  %v5796_v40 = vld [vmem:[#allocation27_spill] sm:$0xff] }
 0x21a   :  { %v1146_v14 = vmul.f32 %v4089_v30, %v4329_v62  ;;  %v1147_v45 = vmul.f32 %v4089_v30, %v4331_v16  ;;  %v1148_v42 = vmul.f32 %v4089_v30, %v4333_v31  ;;  %v1149_v12 = vmul.f32 %v4089_v30, %v4057_v20 }
 0x21b   :  { %v1150_v18 = vmul.f32 %v4089_v30, %v4059_v54  ;;  %v1151_v8 = vmul.f32 %v4089_v30, %v4061_v63  ;;  %v1153_v61 = vmul.f32 %v4089_v30, %v4337_v32  ;;  %v1154_v62 = vmul.f32 %v4089_v30, %v4063_v9 }
 0x21c   :  { %v1155_v16 = vmul.f32 %v4089_v30, %v4065_v17  ;;  %v1160_v13 = vadd.f32 %v1145_v38, %v1124_v50  ;;  %v1161_v31 = vadd.f32 %v1146_v14, %v1125_v10  ;;  %v1162_v19 = vadd.f32 %v1147_v45, %v1126_v25 }
 0x21d   :  { %v1163_v53 = vadd.f32 %v1148_v42, %v1127_v2  ;;  %v1164_v20 = vadd.f32 %v1149_v12, %v1128_v49  ;;  %v1165_v6 = vadd.f32 %v1150_v18, %v1129_v43  ;;  %v1166_v47 = vadd.f32 %v1151_v8, %v1130_v44  ;;  %v5797_v43 = vld [vmem:[#allocation40_spill] sm:$0xff] }
 0x21e   :  { %v1168_v54 = vadd.f32 %v1153_v61, %v1132_v21  ;;  %v1169_v34 = vadd.f32 %v1154_v62, %v1133_v58  ;;  %v1170_v11 = vadd.f32 %v1155_v16, %v1134_v55  ;;  %v1182_v63 = vmul.f32 %v4227_v15, %v4372_v41  ;;  %v5798_v58 = vld [vmem:[#allocation24_spill] sm:$0xff] }
 0x21f   :  { %v1183_v32 = vmul.f32 %v4227_v15, %v4376_v39  ;;  %v1184_v9 = vmul.f32 %v4227_v15, %v4380_v7  ;;  %v1185_v17 = vmul.f32 %v4227_v15, %v4384_v29  ;;  %v1186_v30 = vmul.f32 %v4227_v15, %v4388_v27 }
 0x220   :  { %v1187_v52 = vmul.f32 %v4227_v15, %v4392_v4  ;;  %v1188_v48 = vmul.f32 %v4227_v15, %v5791_v28  ;;  %v1189_v26 = vmul.f32 %v4227_v15, %v5792_v3  ;;  %v1190_v57 = vmul.f32 %v4227_v15, %v5793_v37 }
 0x221   :  { %v1196_v46 = vadd.f32 %v5794_v5, %v1160_v13  ;;  %v1197_v22 = vadd.f32 %v1182_v63, %v1161_v31  ;;  %v1198_v60 = vadd.f32 %v1183_v32, %v1162_v19  ;;  %v1199_v59 = vadd.f32 %v1184_v9, %v1163_v53  ;;  %v5799_v31 = vld [vmem:[#allocation28_spill] sm:$0xff] }
 0x222   :  { %v1200_v1 = vadd.f32 %v1185_v17, %v1164_v20  ;;  %v1201_v33 = vadd.f32 %v1186_v30, %v1165_v6  ;;  %v1202_v51 = vadd.f32 %v1187_v52, %v1166_v47  ;;  %v1203_v24 = vadd.f32 %v1188_v48, %v5795_v23 }
 0x223   :  { %v1204_v35 = vadd.f32 %v5794_v5, %v1168_v54  ;;  %v1205_v56 = vadd.f32 %v1189_v26, %v1169_v34  ;;  %v1206_v0 = vadd.f32 %v1190_v57, %v1170_v11  ;;  %v1217_v36 = vmul.f32 %v5796_v40, %v4372_v41  ;;  %v5800_v11 = vld [vmem:[#allocation26_spill] sm:$0xff] }
 0x224   :  { %v1218_v15 = vmul.f32 %v5796_v40, %v4376_v39  ;;  %v1219_v50 = vmul.f32 %v5796_v40, %v4380_v7  ;;  %v1220_v10 = vmul.f32 %v5796_v40, %v4384_v29  ;;  %v1221_v25 = vmul.f32 %v5796_v40, %v4388_v27 }
 0x225   :  { %v1222_v2 = vmul.f32 %v5796_v40, %v4392_v4  ;;  %v1223_v49 = vmul.f32 %v5796_v40, %v5791_v28  ;;  %v1224_v41 = vmul.f32 %v5796_v40, %v5797_v43  ;;  %v1225_v44 = vmul.f32 %v5796_v40, %v5792_v3 }
 0x226   :  { %v1226_v21 = vmul.f32 %v5796_v40, %v5793_v37  ;;  %v1227_v55 = vmul.f32 %v5796_v40, %v5798_v58  ;;  %v1233_v38 = vadd.f32 %v1217_v36, %v1196_v46  ;;  %v1234_v14 = vadd.f32 %v1218_v15, %v1197_v22 }
 0x227   :  { %v1235_v45 = vadd.f32 %v1219_v50, %v1198_v60  ;;  %v1236_v42 = vadd.f32 %v1220_v10, %v1199_v59  ;;  %v1237_v12 = vadd.f32 %v1221_v25, %v1200_v1  ;;  %v1238_v18 = vadd.f32 %v1222_v2, %v1201_v33 }
 0x228   :  { %v1239_v8 = vadd.f32 %v1223_v49, %v1202_v51  ;;  %v1240_v61 = vadd.f32 %v1224_v41, %v1203_v24  ;;  %v1241_v62 = vadd.f32 %v1225_v44, %v1204_v35  ;;  %v1242_v16 = vadd.f32 %v1226_v21, %v1205_v56 }
 0x229   :  { %v1243_v13 = vadd.f32 %v1227_v55, %v1206_v0  ;;  %v1254_v19 = vmul.f32 %v5799_v31, %v4376_v39  ;;  %v1255_v53 = vmul.f32 %v5799_v31, %v4380_v7  ;;  %v1256_v20 = vmul.f32 %v5799_v31, %v4384_v29  ;;  %v5801_v55 = vld [vmem:[#allocation32_spill] sm:$0xff] }
 0x22a   :  { %v1257_v6 = vmul.f32 %v5799_v31, %v4388_v27  ;;  %v1258_v47 = vmul.f32 %v5799_v31, %v4392_v4  ;;  %v1259_v54 = vmul.f32 %v5799_v31, %v5791_v28  ;;  %v1260_v34 = vmul.f32 %v5799_v31, %v5797_v43 }
 0x22b   :  { %v1262_v39 = vmul.f32 %v5799_v31, %v5793_v37  ;;  %v1263_v7 = vmul.f32 %v5799_v31, %v5798_v58  ;;  %v1264_v29 = vmul.f32 %v5799_v31, %v5800_v11  ;;  %v4564_v63 = vadd.f32 %v1254_v19, %v1233_v38 }
 0x22c   :  { %v4566_v27 = vadd.f32 %v1255_v53, %v1234_v14  ;;  %v4568_v4 = vadd.f32 %v1256_v20, %v1235_v45  ;;  %v4570_v32 = vadd.f32 %v1257_v6, %v1236_v42  ;;  %v4572_v9 = vadd.f32 %v1258_v47, %v1237_v12  ;;  %v5802_v42 = vld [vmem:[#allocation33_spill] sm:$0xff]  ;;  %v5805_v20 = vld [vmem:[#allocation35_spill] sm:$0xff] }
 0x22d   :  { %v4574_v17 = vadd.f32 %v1259_v54, %v1238_v18  ;;  %v4576_v30 = vadd.f32 %v1260_v34, %v1239_v8  ;;  %v4578_v52 = vadd.f32 %v1262_v39, %v1241_v62  ;;  %v4580_v28 = vadd.f32 %v1263_v7, %v1242_v16 }
 0x22e   :  { %v4582_v48 = vadd.f32 %v1264_v29, %v1243_v13  ;;  %v1285_v3 = vadd.f32 %v4566_v27, %v4564_v63  ;;  %v1306_v26 = vmul.f32 %v4564_v63, %v4564_v63  ;;  %v1307_v37 = vmul.f32 %v4566_v27, %v4566_v27 }
 0x22f   :  { %v1308_v46 = vmul.f32 %v4568_v4, %v4568_v4  ;;  %v1261_v60 = vmul.f32 0.0, %v5799_v31  ;;  %v1309_v1 = vmul.f32 %v4570_v32, %v4570_v32  ;;  %v1310_v23 = vmul.f32 %v4572_v9, %v4572_v9  ;;  %v5804_v31 = vld [vmem:[#allocation29_spill] sm:$0xff] }
 0x230   :  { %v1286_v57 = vadd.f32 %v1285_v3, %v4568_v4  ;;  %v1322_v22 = vadd.f32 %v1307_v37, %v1306_v26  ;;  %v1311_v0 = vmul.f32 %v4574_v17, %v4574_v17  ;;  %v1312_v15 = vmul.f32 %v4576_v30, %v4576_v30 }
 0x231   :  { %v4601_v35 = vadd.f32 %v1261_v60, %v1240_v61  ;;  %v1314_v43 = vmul.f32 %v4578_v52, %v4578_v52  ;;  %v1315_v21 = vmul.f32 %v4580_v28, %v4580_v28  ;;  %v1316_v14 = vmul.f32 %v4582_v48, %v4582_v48  ;;  %v5803_v61 = vld [vmem:[#allocation34_spill] sm:$0xff] }
 0x232   :  { %v1287_v5 = vadd.f32 %v1286_v57, %v4570_v32  ;;  %v1323_v33 = vadd.f32 %v1322_v22, %v1308_v46  ;;  %v1317_v18 = vmul.f32 %v5801_v55, %v5801_v55  ;;  %v1318_v16 = vmul.f32 %v5802_v42, %v5802_v42 }
 0x233   :  { %v1313_v25 = vmul.f32 %v4601_v35, %v4601_v35  ;;  %v4628_v19 = vadd.f32 %v1261_v60, %v5804_v31  ;;  %v1319_v53 = vmul.f32 %v5803_v61, %v5803_v61  ;;  %v1320_v54 = vmul.f32 %v5805_v20, %v5805_v20 }
 0x234   :  { %v1288_v59 = vadd.f32 %v1287_v5, %v4572_v9  ;;  %v1324_v24 = vadd.f32 %v1323_v33, %v1309_v1 }
 0x235   :  { %v1321_v7 = vmul.f32 %v4628_v19, %v4628_v19 }
 0x236   :  { %v1289_v51 = vadd.f32 %v1288_v59, %v4574_v17  ;;  %v1325_v40 = vadd.f32 %v1324_v24, %v1310_v23 }
 0x238   :  { %v1290_v56 = vadd.f32 %v1289_v51, %v4576_v30  ;;  %v1326_v50 = vadd.f32 %v1325_v40, %v1311_v0 }
 0x23a   :  { %v1291_v36 = vadd.f32 %v1290_v56, %v4601_v35  ;;  %v1327_v2 = vadd.f32 %v1326_v50, %v1312_v15 }
 0x23c   :  { %v1292_v10 = vadd.f32 %v1291_v36, %v4578_v52  ;;  %v1328_v41 = vadd.f32 %v1327_v2, %v1313_v25 }
 0x23e   :  { %v1293_v49 = vadd.f32 %v1292_v10, %v4580_v28  ;;  %v1329_v58 = vadd.f32 %v1328_v41, %v1314_v43 }
 0x240   :  { %v1294_v44 = vadd.f32 %v1293_v49, %v4582_v48  ;;  %v1330_v45 = vadd.f32 %v1329_v58, %v1315_v21 }
 0x242   :  { %v1295_v38 = vadd.f32 %v1294_v44, %v5801_v55  ;;  %v1331_v8 = vadd.f32 %v1330_v45, %v1316_v14 }
 0x244   :  { %v1296_v12 = vadd.f32 %v1295_v38, %v5802_v42  ;;  %v1332_v13 = vadd.f32 %v1331_v8, %v1317_v18 }
 0x246   :  { %v1297_v62 = vadd.f32 %v1296_v12, %v5803_v61  ;;  %v1333_v47 = vadd.f32 %v1332_v13, %v1318_v16 }
 0x248   :  { %v1298_v6 = vadd.f32 %v1297_v62, %v5805_v20  ;;  %v1334_v39 = vadd.f32 %v1333_v47, %v1319_v53 }
 0x24a   :  { %v1299_v34 = vadd.f32 %v1298_v6, %v4628_v19  ;;  %v1335_v29 = vadd.f32 %v1334_v39, %v1320_v54 }
 0x24c   :  { %v1300_v11 = vrot.slane %v1299_v34, 4  ;;  %v1336_v26 = vadd.f32 %v1335_v29, %v1321_v7 }
 0x24e   :  { %v1301_v3 = vadd.f32 %v1300_v11, %v1299_v34  ;;  %v1337_v57 = vrot.slane %v1336_v26, 4 }
 0x250   :  { %v1302_v37 = vrot.slane %v1301_v3, 2  ;;  %v1338_v46 = vadd.f32 %v1337_v57, %v1336_v26  ;;  %v2605_v57 = vld [vmem:[%s5527_s2 + $0x100] sm:$0xff] }
 0x252   :  { %v1303_v5 = vadd.f32 %v1302_v37, %v1301_v3  ;;  %v1339_v60 = vrot.slane %v1338_v46, 2 }
 0x254   :  { %v1304_v22 = vrot.slane %v1303_v5, 1  ;;  %v1340_v1 = vadd.f32 %v1339_v60, %v1338_v46  ;;  %v2607_v46 = vld [vmem:[%s5527_s2 + $0x110] sm:$0xff]  ;;  %v2608_v60 = vld [vmem:[%s5527_s2 + $0x118] sm:$0xff] }
 0x256   :  { %v1305_v59 = vadd.f32 %v1304_v22, %v1303_v5  ;;  %v1341_v33 = vrot.slane %v1340_v1, 1  ;;  %v2606_v5 = vld [vmem:[%s5527_s2 + $0x108] sm:$0xff] }
 0x257   :  { %v2949_v22 = vpack.c.bf16 %v2606_v5, %v2605_v57 }
 0x258   :  { %v1343_v51 = vmul.f32 0.0078125, %v1305_v59  ;;  %v1342_v23 = vadd.f32 %v1341_v33, %v1340_v1  ;;  %v2953_v59 = vpack.c.bf16 %v2608_v60, %v2607_v46  ;;  %v2609_v1 = vld [vmem:[%s5527_s2 + $0x120] sm:$0xff]  ;;  %v2610_v33 = vld [vmem:[%s5527_s2 + $0x128] sm:$0xff] }
 0x259   :  { %2950 = vmatprep.subr.bf16.mxu0 %v2949_v22  ;;  %2981 = vmatprep.subr.bf16.mxu1 %v2949_v22 }
 0x25a   :  { %v1345_v24 = vmul.f32 %v1343_v51, %v1343_v51  ;;  %v1350_v56 = vsub.f32 %v4564_v63, %v1343_v51  ;;  %v1351_v0 = vsub.f32 %v4566_v27, %v1343_v51  ;;  %v1352_v40 = vsub.f32 %v4568_v4, %v1343_v51  ;;  %2952 = vmatpush3.bf16.msra.mxu0 %v2949_v22 }
 0x25b   :  { %v1353_v36 = vsub.f32 %v4570_v32, %v1343_v51  ;;  %v1354_v15 = vsub.f32 %v4572_v9, %v1343_v51  ;;  %v1355_v50 = vsub.f32 %v4574_v17, %v1343_v51  ;;  %v1344_v10 = vmul.f32 0.0078125, %v1342_v23  ;;  %2954 = vmatprep.subr.bf16.mxu0 %v2953_v59  ;;  %v2611_v23 = vld [vmem:[%s5527_s2 + $0x130] sm:$0xff] }
 0x25c   :  { %v1356_v25 = vsub.f32 %v4576_v30, %v1343_v51  ;;  %v1357_v2 = vsub.f32 %v4601_v35, %v1343_v51  ;;  %v1358_v49 = vsub.f32 %v4578_v52, %v1343_v51  ;;  %v1359_v43 = vsub.f32 %v4580_v28, %v1343_v51 }
 0x25d   :  { %v1360_v63 = vsub.f32 %v4582_v48, %v1343_v51  ;;  %v1361_v27 = vsub.f32 %v5801_v55, %v1343_v51  ;;  %v1362_v4 = vsub.f32 %v5802_v42, %v1343_v51  ;;  %v1346_v32 = vsub.f32 %v1344_v10, %v1345_v24  ;;  %v2612_v24 = vld [vmem:[%s5527_s2 + $0x138] sm:$0xff] }
 0x25e   :  { %v1363_v9 = vsub.f32 %v5803_v61, %v1343_v51  ;;  %v1364_v17 = vsub.f32 %v5805_v20, %v1343_v51  ;;  %v1365_v41 = vsub.f32 %v4628_v19, %v1343_v51  ;;  %v2957_v51 = vpack.c.bf16 %v2610_v33, %v2609_v1  ;;  %2956 = vmatpush3.bf16.msra.mxu0 %v2953_v59 }
 0x25f   :  { %v1347_v30 = vmax.f32 %v1346_v32, 0.0 }
 0x260   :  { %2958 = vmatprep.subr.bf16.mxu0 %v2957_v51 }
 0x261   :  { %v1348_v44 = vadd.f32 1e-05, %v1347_v30  ;;  %v2620_v30 = vld [vmem:[%s5527_s2 + $0x178] sm:$0xff] }
 0x262   :  { %2960 = vmatpush3.bf16.msra.mxu0 %v2957_v51 }
 0x263   :  { %3004 = vrsqrt.f32 %v1348_v44 }
 0x26d   :  { %v3005_v35 = vpop.eup %3004 }
 0x26e   :  { %v1366_v52 = vmul.f32 %v3005_v35, %v1350_v56  ;;  %v1367_v21 = vmul.f32 %v3005_v35, %v1351_v0  ;;  %v1368_v28 = vmul.f32 %v3005_v35, %v1352_v40  ;;  %v1369_v58 = vmul.f32 %v3005_v35, %v1353_v36  ;;  %v2613_v0 = vld [vmem:[%s5527_s2 + $0x140] sm:$0xff]  ;;  %v2614_v40 = vld [vmem:[%s5527_s2 + $0x148] sm:$0xff] }
 0x26f   :  { %v1370_v48 = vmul.f32 %v3005_v35, %v1354_v15  ;;  %v1371_v38 = vmul.f32 %v3005_v35, %v1355_v50  ;;  %v1372_v55 = vmul.f32 %v3005_v35, %v1356_v25  ;;  %v1373_v14 = vmul.f32 %v3005_v35, %v1357_v2  ;;  %v2615_v15 = vld [vmem:[%s5527_s2 + $0x150] sm:$0xff]  ;;  %v2616_v50 = vld [vmem:[%s5527_s2 + $0x158] sm:$0xff]  ;;  %v2617_v2 = vld [vmem:[%s5527_s2 + $0x160] sm:$0xff] }
 0x270   :  { %v1382_v45 = vmax.f32 %v1366_v52, 0.0  ;;  %v1383_v42 = vmax.f32 %v1367_v21, 0.0  ;;  %v1384_v12 = vmax.f32 %v1368_v28, 0.0  ;;  %v1374_v18 = vmul.f32 %v3005_v35, %v1358_v49  ;;  %v2618_v49 = vld [vmem:[%s5527_s2 + $0x168] sm:$0xff] }
 0x271   :  { %v1375_v8 = vmul.f32 %v3005_v35, %v1359_v43  ;;  %v1376_v61 = vmul.f32 %v3005_v35, %v1360_v63  ;;  %v1377_v62 = vmul.f32 %v3005_v35, %v1361_v27  ;;  %v1378_v16 = vmul.f32 %v3005_v35, %v1362_v4 }
 0x272   :  { %2805 = vmatprep.mubr.f32.mxu1 %v1382_v45  ;;  %v1379_v13 = vmul.f32 %v3005_v35, %v1363_v9  ;;  %v1380_v31 = vmul.f32 %v3005_v35, %v1364_v17  ;;  %v1381_v19 = vmul.f32 %v3005_v35, %v1365_v41  ;;  %v1385_v53 = vmax.f32 %v1369_v58, 0.0  ;;  %v2619_v41 = vld [vmem:[%s5527_s2 + $0x170] sm:$0xff] }
 0x273   :  { %2806 = vmatmul.mubr.f32.vlgmr.msra.gmra.mrb[0].mxu1 %v1383_v42  ;;  %v1386_v20 = vmax.f32 %v1370_v48, 0.0  ;;  %v1387_v6 = vmax.f32 %v1371_v38, 0.0  ;;  %v1388_v47 = vmax.f32 %v1372_v55, 0.0  ;;  %v1389_v54 = vmax.f32 %v1373_v14, 0.0 }
 0x274   :  { %2808 = vmatprep.mubr.f32.mxu1 %v1384_v12  ;;  %v1390_v34 = vmax.f32 %v1374_v18, 0.0  ;;  %v1391_v39 = vmax.f32 %v1375_v8, 0.0  ;;  %v1392_v7 = vmax.f32 %v1376_v61, 0.0  ;;  %v1393_v11 = vmax.f32 %v1377_v62, 0.0  ;;  %2989 = vmatpush3.bf16.msra.mxu1 %v2949_v22 }
 0x275   :  { %v1394_v29 = vmax.f32 %v1378_v16, 0.0  ;;  %v1395_v3 = vmax.f32 %v1379_v13, 0.0  ;;  %v1396_v26 = vmax.f32 %v1380_v31, 0.0  ;;  %v1397_v37 = vmax.f32 %v1381_v19, 0.0  ;;  %2982 = vmatprep.subr.bf16.mxu1 %v2953_v59 }
 0x276   :  { %v2961_v56 = vpack.c.bf16 %v2612_v24, %v2611_v23  ;;  %v2965_v36 = vpack.c.bf16 %v2614_v40, %v2613_v0  ;;  %v2969_v10 = vpack.c.bf16 %v2616_v50, %v2615_v15  ;;  %v2973_v32 = vpack.c.bf16 %v2618_v49, %v2617_v2 }
 0x277   :  { %2809 = vmatmul.mubr.f32.gmra.mrb[2].mxu1 %v1385_v53  ;;  %v2977_v21 = vpack.c.bf16 %v2620_v30, %v2619_v41 }
 0x278   :  { %2811 = vmatprep.mubr.f32.mxu1 %v1386_v20  ;;  %2990 = vmatpush3.bf16.msra.mxu1 %v2953_v59 }
 0x279   :  { %2983 = vmatprep.subr.bf16.mxu1 %v2957_v51  ;;  %2962 = vmatprep.subr.bf16.mxu0 %v2961_v56 }
 0x27a   :  { %2964 = vmatpush3.bf16.msra.mxu0 %v2961_v56 }
 0x27b   :  { %2812 = vmatmul.mubr.f32.gmra.mrb[4].mxu1 %v1387_v6  ;;  %2966 = vmatprep.subr.bf16.mxu0 %v2965_v36 }
 0x27c   :  { %2814 = vmatprep.mubr.f32.mxu1 %v1388_v47  ;;  %2991 = vmatpush3.bf16.msra.mxu1 %v2957_v51 }
 0x27d   :  { %2984 = vmatprep.subr.bf16.mxu1 %v2961_v56 }
 0x27e   :  { %2968 = vmatpush3.bf16.msra.mxu0 %v2965_v36 }
 0x27f   :  { %2815 = vmatmul.mubr.f32.gmra.mrb[6].mxu1 %v1389_v54  ;;  %2970 = vmatprep.subr.bf16.mxu0 %v2969_v10 }
 0x280   :  { %2817 = vmatprep.mubr.f32.mxu1 %v1390_v34  ;;  %2992 = vmatpush3.bf16.msra.mxu1 %v2961_v56 }
 0x281   :  { %2985 = vmatprep.subr.bf16.mxu1 %v2965_v36 }
 0x282   :  { %2972 = vmatpush3.bf16.msra.mxu0 %v2969_v10 }
 0x283   :  { %2818 = vmatmul.mubr.f32.gmra.mrb[8].mxu1 %v1391_v39  ;;  %2974 = vmatprep.subr.bf16.mxu0 %v2973_v32 }
 0x284   :  { %2820 = vmatprep.mubr.f32.mxu1 %v1392_v7  ;;  %2993 = vmatpush3.bf16.msra.mxu1 %v2965_v36 }
 0x285   :  { %2986 = vmatprep.subr.bf16.mxu1 %v2969_v10 }
 0x286   :  { %2976 = vmatpush3.bf16.msra.mxu0 %v2973_v32 }
 0x287   :  { %2821 = vmatmul.mubr.f32.gmra.mrb[10].mxu1 %v1393_v11  ;;  %2978 = vmatprep.subr.bf16.mxu0 %v2977_v21 }
 0x288   :  { %2823 = vmatprep.mubr.f32.mxu1 %v1394_v29  ;;  %2994 = vmatpush3.bf16.msra.mxu1 %v2969_v10 }
 0x289   :  { %2987 = vmatprep.subr.bf16.mxu1 %v2973_v32 }
 0x28a   :  { %2980 = vmatpush3.bf16.msra.mxu0 %v2977_v21 }
 0x28b   :  { %2824 = vmatmul.mubr.f32.gmra.mrb[12].mxu1 %v1395_v3 }
 0x28c   :  { %2826 = vmatprep.mubr.f32.mxu1 %v1396_v26  ;;  %2995 = vmatpush3.bf16.msra.mxu1 %v2973_v32 }
 0x28d   :  { %2988 = vmatprep.subr.bf16.mxu1 %v2977_v21 }
 0x28f   :  { %2827 = vmatmul.mubr.f32.gmra.mrb[14].mxu1 %v1397_v37 }
 0x290   :  { %2996 = vmatpush3.bf16.msra.mxu1 %v2977_v21 }
 0x346   :  { %v4690_v25 = vpop.f32.mrb[0].mxu1 }
 0x347   :  { %v1582_v43 = vmul.f32 %v4690_v25, %v4690_v25  ;;  %v4700_v63 = vpop.f32.mrb[1].mxu1 }
 0x348   :  { %v1560_v27 = vadd.f32 %v4690_v25, %v4700_v63  ;;  %v1581_v4 = vmul.f32 %v4700_v63, %v4700_v63 }
 0x34a   :  { %v1597_v9 = vadd.f32 %v1582_v43, %v1581_v4  ;;  %v4706_v17 = vpop.f32.mrb[2].mxu1 }
 0x34b   :  { %v4714_v44 = vpop.f32.mrb[3].mxu1  ;;  %v1584_v28 = vmul.f32 %v4706_v17, %v4706_v17 }
 0x34c   :  { %v1561_v35 = vadd.f32 %v1560_v27, %v4714_v44  ;;  %v1583_v52 = vmul.f32 %v4714_v44, %v4714_v44 }
 0x34e   :  { %v1598_v58 = vadd.f32 %v1597_v9, %v1583_v52  ;;  %v4721_v48 = vpop.f32.mrb[4].mxu1  ;;  %v1562_v38 = vadd.f32 %v4706_v17, %v1561_v35 }
 0x34f   :  { %v4724_v55 = vpop.f32.mrb[5].mxu1  ;;  %v1586_v12 = vmul.f32 %v4721_v48, %v4721_v48 }
 0x350   :  { %v1563_v14 = vadd.f32 %v1562_v38, %v4724_v55  ;;  %v1585_v45 = vmul.f32 %v4724_v55, %v4724_v55  ;;  %v1599_v42 = vadd.f32 %v1598_v58, %v1584_v28 }
 0x352   :  { %v1600_v18 = vadd.f32 %v1599_v42, %v1585_v45  ;;  %v4731_v8 = vpop.f32.mrb[6].mxu1  ;;  %v1564_v61 = vadd.f32 %v4721_v48, %v1563_v14 }
 0x353   :  { %v4734_v62 = vpop.f32.mrb[7].mxu1  ;;  %v1588_v19 = vmul.f32 %v4731_v8, %v4731_v8 }
 0x354   :  { %v1565_v16 = vadd.f32 %v1564_v61, %v4734_v62  ;;  %v1587_v13 = vmul.f32 %v4734_v62, %v4734_v62  ;;  %v1601_v31 = vadd.f32 %v1600_v18, %v1586_v12 }
 0x356   :  { %v1602_v53 = vadd.f32 %v1601_v31, %v1587_v13  ;;  %v4741_v20 = vpop.f32.mrb[8].mxu1  ;;  %v1566_v6 = vadd.f32 %v4731_v8, %v1565_v16 }
 0x357   :  { %v4744_v47 = vpop.f32.mrb[9].mxu1  ;;  %v1590_v7 = vmul.f32 %v4741_v20, %v4741_v20 }
 0x358   :  { %v1567_v54 = vadd.f32 %v1566_v6, %v4744_v47  ;;  %v1589_v34 = vmul.f32 %v4744_v47, %v4744_v47  ;;  %v1603_v39 = vadd.f32 %v1602_v53, %v1588_v19 }
 0x35a   :  { %v1604_v11 = vadd.f32 %v1603_v39, %v1589_v34  ;;  %v4751_v29 = vpop.f32.mrb[10].mxu1  ;;  %v1568_v3 = vadd.f32 %v4741_v20, %v1567_v54 }
 0x35b   :  { %v4754_v26 = vpop.f32.mrb[11].mxu1  ;;  %v1592_v46 = vmul.f32 %v4751_v29, %v4751_v29 }
 0x35c   :  { %v1569_v37 = vadd.f32 %v1568_v3, %v4754_v26  ;;  %v1591_v57 = vmul.f32 %v4754_v26, %v4754_v26  ;;  %v1605_v5 = vadd.f32 %v1604_v11, %v1590_v7 }
 0x35e   :  { %v1606_v22 = vadd.f32 %v1605_v5, %v1591_v57  ;;  %v4761_v60 = vpop.f32.mrb[12].mxu1  ;;  %v1570_v59 = vadd.f32 %v4751_v29, %v1569_v37  ;;  %v4814_v37 = vld [vmem:[%s5526_s1 + $0x19] ss:$0 sm:$0xff] }
 0x35f   :  { %v4764_v1 = vpop.f32.mrb[13].mxu1  ;;  %v1594_v24 = vmul.f32 %v4761_v60, %v4761_v60 }
 0x360   :  { %v1571_v33 = vadd.f32 %v1570_v59, %v4764_v1  ;;  %v1593_v51 = vmul.f32 %v4764_v1, %v4764_v1  ;;  %v1607_v23 = vadd.f32 %v1606_v22, %v1592_v46  ;;  %v4822_v46 = vmul.f32 0.0, %v4814_v37 }
 0x362   :  { %v1608_v56 = vadd.f32 %v1607_v23, %v1593_v51  ;;  %v2828_v0 = vpop.f32.mrb[14].mxu1  ;;  %v1572_v40 = vadd.f32 %v4761_v60, %v1571_v33 }
 0x363   :  { %v1551_v36 = vpop.f32.mrb[15].mxu1  ;;  %v1596_v2 = vmul.f32 %v2828_v0, %v2828_v0 }
 0x364   :  { %v1573_v15 = vadd.f32 %v1572_v40, %v1551_v36  ;;  %v1595_v50 = vmul.f32 %v1551_v36, %v1551_v36  ;;  %v1609_v10 = vadd.f32 %v1608_v56, %v1594_v24 }
 0x366   :  { %v1574_v49 = vadd.f32 %v2828_v0, %v1573_v15  ;;  %v1610_v43 = vadd.f32 %v1609_v10, %v1595_v50 }
 0x368   :  { %v1575_v27 = vrot.slane %v1574_v49, 4  ;;  %v1611_v4 = vadd.f32 %v1610_v43, %v1596_v2 }
 0x36a   :  { %v1576_v32 = vadd.f32 %v1575_v27, %v1574_v49  ;;  %v1612_v9 = vrot.slane %v1611_v4, 4 }
 0x36c   :  { %v1577_v41 = vrot.slane %v1576_v32, 2  ;;  %v1613_v30 = vadd.f32 %v1612_v9, %v1611_v4 }
 0x36e   :  { %v1578_v35 = vadd.f32 %v1577_v41, %v1576_v32  ;;  %v1614_v52 = vrot.slane %v1613_v30, 2 }
 0x370   :  { %v1579_v21 = vrot.slane %v1578_v35, 1  ;;  %v1615_v28 = vadd.f32 %v1614_v52, %v1613_v30 }
 0x372   :  { %v1580_v58 = vadd.f32 %v1579_v21, %v1578_v35  ;;  %v1616_v38 = vrot.slane %v1615_v28, 1 }
 0x374   :  { %v1617_v14 = vadd.f32 %v1616_v38, %v1615_v28  ;;  %v4772_v45 = vmul.f32 0.0078125, %v1580_v58 }
 0x376   :  { %v1619_v42 = vmul.f32 0.0078125, %v1617_v14  ;;  %v1620_v12 = vmul.f32 %v4772_v45, %v4772_v45  ;;  %v1629_v18 = vsub.f32 %v4724_v55, %v4772_v45  ;;  %v1630_v61 = vsub.f32 %v4721_v48, %v4772_v45 }
 0x377   :  { %v1631_v16 = vsub.f32 %v4734_v62, %v4772_v45  ;;  %v1632_v13 = vsub.f32 %v4731_v8, %v4772_v45  ;;  %v1635_v31 = vsub.f32 %v4754_v26, %v4772_v45  ;;  %v1636_v19 = vsub.f32 %v4751_v29, %v4772_v45  ;;  %v4809_v26 = vld [vmem:[%s5526_s1 + $0x18] ss:$0 sm:$0xff] }
 0x378   :  { %v1621_v53 = vsub.f32 %v1619_v42, %v1620_v12  ;;  %v1637_v6 = vsub.f32 %v4764_v1, %v4772_v45  ;;  %v1638_v55 = vsub.f32 %v4761_v60, %v4772_v45  ;;  %v1639_v48 = vsub.f32 %v1551_v36, %v4772_v45 }
 0x379   :  { %v1640_v62 = vsub.f32 %v2828_v0, %v4772_v45  ;;  %v4819_v5 = vmul.f32 0.0, %v4809_v26 }
 0x37a   :  { %v1622_v39 = vmax.f32 %v1621_v53, 0.0 }
 0x37c   :  { %v1623_v3 = vadd.f32 1e-05, %v1622_v39 }
 0x37e   :  { %3006 = vrsqrt.f32 %v1623_v3 }
 0x388   :  { %v4816_v57 = vpop.eup %3006 }
 0x389   :  { %v1645_v22 = vmul.f32 %v4816_v57, %v1629_v18  ;;  %v1646_v60 = vmul.f32 %v4816_v57, %v1630_v61  ;;  %v1647_v59 = vmul.f32 %v4816_v57, %v1631_v16  ;;  %v1648_v1 = vmul.f32 %v4816_v57, %v1632_v13 }
 0x38a   :  { %v1651_v33 = vmul.f32 %v4816_v57, %v1635_v31  ;;  %v1652_v51 = vmul.f32 %v4816_v57, %v1636_v19  ;;  %v1653_v23 = vmul.f32 %v4816_v57, %v1637_v6  ;;  %v1654_v24 = vmul.f32 %v4816_v57, %v1638_v55 }
 0x38b   :  { %v1655_v56 = vmul.f32 %v4816_v57, %v1639_v48  ;;  %v1656_v0 = vmul.f32 %v4816_v57, %v1640_v62  ;;  %v4834_v40 = vmax.f32 %v1645_v22, 0.0  ;;  %v4836_v36 = vmax.f32 %v1646_v60, 0.0 }
 0x38c   :  { %v4838_v15 = vmax.f32 %v1647_v59, 0.0  ;;  %v4840_v50 = vmax.f32 %v1648_v1, 0.0  ;;  %v4842_v10 = vmax.f32 %v1651_v33, 0.0  ;;  %v4844_v2 = vmax.f32 %v1652_v51, 0.0  ;;  %v4903_v1 = vld [vmem:[%s5526_s1 + $0x12] ss:$0 sm:$0xff] }
 0x38d   :  { %5806 = vst [vmem:[#allocation7_spill] sm:$0xff] %v4834_v40  ;;  %v4846_v49 = vmax.f32 %v1653_v23, 0.0  ;;  %v4848_v43 = vmax.f32 %v1654_v24, 0.0  ;;  %v4850_v27 = vmax.f32 %v1655_v56, 0.0  ;;  %v4852_v4 = vmax.f32 %v1656_v0, 0.0  ;;  %5812 = vst [vmem:[#allocation12_spill] sm:$0xff] %v4903_v1 }
 0x38e   :  { %v1677_v32 = vrot.slane %v4834_v40, 7  ;;  %v1678_v9 = vrot.slane %v4836_v36, 7  ;;  %v1679_v41 = vrot.slane %v4838_v15, 7  ;;  %v1680_v30 = vrot.slane %v4840_v50, 7 }
 0x38f   :  { %v1683_v35 = vrot.slane %v4842_v10, 7  ;;  %v1684_v52 = vrot.slane %v4844_v2, 7  ;;  %v1685_v21 = vrot.slane %v4846_v49, 7  ;;  %v1686_v28 = vrot.slane %v4848_v43, 7 }
 0x390   :  { %v1687_v58 = vrot.slane %v4850_v27, 7  ;;  %v1688_v38 = vrot.slane %v4852_v4, 7  ;;  %v4866_v42 = vsel %vm17_vm0, 0.0, %v1677_v32  ;;  %v4870_v12 = vsel %vm17_vm0, 0.0, %v1678_v9 }
 0x391   :  { %5808 = vst [vmem:[#allocation8_spill] sm:$0xff] %v4866_v42  ;;  %5809 = vst [vmem:[#allocation9_spill] sm:$0xff] %v4870_v12  ;;  %v1695_v18 = vsel %vm17_vm0, 0.0, %v1679_v41  ;;  %v1696_v61 = vsel %vm17_vm0, 0.0, %v1680_v30  ;;  %v4878_v16 = vsel %vm17_vm0, 0.0, %v1683_v35  ;;  %v4882_v13 = vsel %vm17_vm0, 0.0, %v1684_v52 }
 0x392   :  { %5810 = vst [vmem:[#allocation10_spill] sm:$0xff] %v4878_v16  ;;  %5811 = vst [vmem:[#allocation11_spill] sm:$0xff] %v4882_v13  ;;  %v1701_v31 = vsel %vm17_vm0, 0.0, %v1685_v21  ;;  %v1702_v19 = vsel %vm17_vm0, 0.0, %v1686_v28  ;;  %v1703_v53 = vsel %vm17_vm0, 0.0, %v1687_v58  ;;  %v1704_v6 = vsel %vm17_vm0, 0.0, %v1688_v38 }
 0x393   :  { %v1711_v55 = vrot.slane %v4838_v15, 1  ;;  %v1712_v48 = vrot.slane %v4840_v50, 1  ;;  %v1715_v62 = vrot.slane %v4842_v10, 1  ;;  %v1716_v39 = vrot.slane %v4844_v2, 1  ;;  %v4940_v41 = vld [vmem:[%s5526_s1 + $0x15] ss:$0 sm:$0xff] }
 0x394   :  { %v1717_v3 = vrot.slane %v4846_v49, 1  ;;  %v1718_v22 = vrot.slane %v4848_v43, 1  ;;  %v1719_v60 = vrot.slane %v4850_v27, 1  ;;  %v1720_v59 = vrot.slane %v4852_v4, 1  ;;  %5817 = vst [vmem:[#allocation17_spill] sm:$0xff] %v4940_v41 }
 0x395   :  { %v4907_v33 = vsel %vm18_vm1, 0.0, %v1711_v55  ;;  %v4911_v51 = vsel %vm18_vm1, 0.0, %v1712_v48  ;;  %v4915_v23 = vsel %vm18_vm1, 0.0, %v1715_v62  ;;  %v4919_v24 = vsel %vm18_vm1, 0.0, %v1716_v39 }
 0x396   :  { %5813 = vst [vmem:[#allocation13_spill] sm:$0xff] %v4907_v33  ;;  %5814 = vst [vmem:[#allocation14_spill] sm:$0xff] %v4911_v51  ;;  %v4923_v56 = vsel %vm18_vm1, 0.0, %v1717_v3  ;;  %v4927_v0 = vsel %vm18_vm1, 0.0, %v1718_v22  ;;  %v4931_v32 = vsel %vm18_vm1, 0.0, %v1719_v60  ;;  %v4935_v9 = vsel %vm18_vm1, 0.0, %v1720_v59 }
 0x397   :  { %5815 = vst [vmem:[#allocation15_spill] sm:$0xff] %v4915_v23  ;;  %5816 = vst [vmem:[#allocation16_spill] sm:$0xff] %v4919_v24  ;;  %v1747_v30 = vmul.f32 %v4903_v1, %v4866_v42  ;;  %v1748_v35 = vmul.f32 %v4903_v1, %v4870_v12  ;;  %v1749_v52 = vmul.f32 %v4903_v1, %v1695_v18 }
 0x398   :  { %v1752_v21 = vmul.f32 %v4903_v1, %v4878_v16  ;;  %v1753_v28 = vmul.f32 %v4903_v1, %v4882_v13  ;;  %v1754_v58 = vmul.f32 %v4903_v1, %v1701_v31  ;;  %v1755_v38 = vmul.f32 %v4903_v1, %v1702_v19 }
 0x399   :  { %v1756_v55 = vmul.f32 %v4903_v1, %v1703_v53  ;;  %v1767_v48 = vmul.f32 %v4940_v41, %v4870_v12  ;;  %v1768_v62 = vmul.f32 %v4940_v41, %v1695_v18  ;;  %v1769_v39 = vmul.f32 %v4940_v41, %v1696_v61 }
 0x39a   :  { %v1773_v3 = vmul.f32 %v4940_v41, %v4882_v13  ;;  %v1774_v22 = vmul.f32 %v4940_v41, %v1701_v31  ;;  %v1775_v60 = vmul.f32 %v4940_v41, %v1702_v19  ;;  %v1776_v59 = vmul.f32 %v4940_v41, %v1703_v53 }
 0x39b   :  { %v1777_v29 = vmul.f32 %v4940_v41, %v1704_v6  ;;  %v1783_v11 = vadd.f32 %v1767_v48, %v1747_v30  ;;  %v1784_v7 = vadd.f32 %v1768_v62, %v1748_v35  ;;  %v1785_v34 = vadd.f32 %v1769_v39, %v1749_v52  ;;  %v4971_v41 = vld [vmem:[%s5526_s1 + $0x13] ss:$0 sm:$0xff] }
 0x39c   :  { %v1789_v54 = vadd.f32 %v1773_v3, %v1752_v21  ;;  %v1790_v8 = vadd.f32 %v1774_v22, %v1753_v28  ;;  %v1791_v12 = vadd.f32 %v1775_v60, %v1754_v58  ;;  %v1792_v16 = vadd.f32 %v1776_v59, %v1755_v38  ;;  %v5017_v60 = vld [vmem:[%s5526_s1 + $0x14] ss:$0 sm:$0xff] }
 0x39d   :  { %v1793_v42 = vadd.f32 %v1777_v29, %v1756_v55  ;;  %v1804_v40 = vmul.f32 %v4809_v26, %v1695_v18  ;;  %v1805_v13 = vmul.f32 %v4809_v26, %v1696_v61  ;;  %v1810_v14 = vmul.f32 %v4809_v26, %v1701_v31 }
 0x39e   :  { %v1811_v1 = vmul.f32 %v4809_v26, %v1702_v19  ;;  %v1812_v30 = vmul.f32 %v4809_v26, %v1703_v53  ;;  %v1813_v35 = vmul.f32 %v4809_v26, %v1704_v6  ;;  %v1821_v52 = vadd.f32 %v4819_v5, %v1785_v34  ;;  %v4982_v19 = vld [vmem:[%s5526_s1 + $0x16] ss:$0 sm:$0xff] }
 0x39f   :  { %v1829_v29 = vadd.f32 %v4819_v5, %v1793_v42  ;;  %v4977_v18 = vadd.f32 %v1804_v40, %v1783_v11  ;;  %v1820_v61 = vadd.f32 %v1805_v13, %v1784_v7  ;;  %v1825_v21 = vadd.f32 %v1810_v14, %v1789_v54 }
 0x3a0   :  { %v1826_v31 = vadd.f32 %v1811_v1, %v1790_v8  ;;  %v1827_v28 = vadd.f32 %v1812_v30, %v1791_v12  ;;  %v1828_v58 = vadd.f32 %v1813_v35, %v1792_v16  ;;  %v1841_v53 = vmul.f32 %v4971_v41, %v4836_v36 }
 0x3a1   :  { %v1842_v34 = vmul.f32 %v4971_v41, %v4838_v15  ;;  %v1845_v11 = vmul.f32 %v4971_v41, %v4842_v10  ;;  %v1846_v54 = vmul.f32 %v4971_v41, %v4844_v2  ;;  %v1847_v8 = vmul.f32 %v4971_v41, %v4846_v49 }
 0x3a2   :  { %v1848_v7 = vmul.f32 %v4971_v41, %v4848_v43  ;;  %v1849_v5 = vmul.f32 %v4971_v41, %v4850_v27  ;;  %v4998_v40 = vadd.f32 %v1841_v53, %v1820_v61  ;;  %v1878_v42 = vmul.f32 %v4982_v19, %v4840_v50 }
 0x3a3   :  { %v1857_v14 = vadd.f32 %v1842_v34, %v1821_v52  ;;  %v1861_v12 = vadd.f32 %v1845_v11, %v1825_v21  ;;  %v1862_v16 = vadd.f32 %v1846_v54, %v1826_v31  ;;  %v1863_v13 = vadd.f32 %v1847_v8, %v1827_v28  ;;  %v5031_v34 = vld [vmem:[%s5526_s1 + $0x17] ss:$0 sm:$0xff] }
 0x3a4   :  { %v1864_v6 = vadd.f32 %v1848_v7, %v1828_v58  ;;  %v1865_v1 = vadd.f32 %v1849_v5, %v1829_v29  ;;  %v1882_v38 = vmul.f32 %v4982_v19, %v4844_v2  ;;  %v1883_v55 = vmul.f32 %v4982_v19, %v4846_v49  ;;  %5818 = vst [vmem:[#allocation44_spill] sm:$0xff] %v5031_v34 }
 0x3a5   :  { %v1884_v48 = vmul.f32 %v4982_v19, %v4848_v43  ;;  %v1885_v62 = vmul.f32 %v4982_v19, %v4850_v27  ;;  %v1886_v39 = vmul.f32 %v4982_v19, %v4852_v4  ;;  %v1894_v3 = vadd.f32 %v1878_v42, %v1857_v14 }
 0x3a6   :  { %v1919_v22 = vmul.f32 %v4814_v37, %v4846_v49  ;;  %v1898_v59 = vadd.f32 %v1882_v38, %v1861_v12  ;;  %v1899_v30 = vadd.f32 %v1883_v55, %v1862_v16  ;;  %v1920_v52 = vmul.f32 %v4814_v37, %v4848_v43  ;;  %v5051_v16 = vld [vmem:[%s5526_s1 + $0x1a] ss:$0 sm:$0xff]  ;;  %s3036_s1 = smov [#allocation2]  }
 0x3a7   :  { %v1900_v35 = vadd.f32 %v1884_v48, %v1863_v13  ;;  %v1901_v29 = vadd.f32 %v1885_v62, %v1864_v6  ;;  %v1902_v61 = vadd.f32 %v1886_v39, %v1865_v1  ;;  %v1921_v21 = vmul.f32 %v4814_v37, %v4850_v27  ;;  %5819 = vst [vmem:[#allocation45_spill] sm:$0xff] %v5051_v16  ;;  %s2457_s15 = sshll.u32 %s3036_s1, 4  ;;  %s2458_s15 = int_to_ptr.vmem [resolvable:$true] %s2457_s15 }
 0x3a8   :  { %v1922_v31 = vmul.f32 %v4814_v37, %v4852_v4  ;;  %v1930_v49 = vadd.f32 %v4822_v46, %v1894_v3  ;;  %v1934_v28 = vadd.f32 %v1919_v22, %v1898_v59  ;;  %v1935_v58 = vadd.f32 %v1920_v52, %v1899_v30  ;;  %s3012_s16 = scalar_lea.vmem %s2458_s15, 2048  ;;  %p3017_p1 = scmp.lt.s32.totalorder %s2458_s15, %s2458_s15 }
 0x3a9   :  { %v1951_v53 = vmul.f32 %v5017_v60, %v4907_v33  ;;  %v1936_v43 = vadd.f32 %v1921_v21, %v1900_v35  ;;  %v1938_v54 = vadd.f32 %v4822_v46, %v1902_v61  ;;  %v1954_v27 = vmul.f32 %v5017_v60, %v4915_v23  ;;  %p3013_p0 = scmp.ne.s32.totalorder %s2458_s15, %s3012_s16  ;;  %p3018_p2 = scmp.lt.s32.totalorder %s3012_s16, %s3012_s16 }
 0x3aa   :  { %v1937_v11 = vadd.f32 %v1922_v31, %v1901_v29  ;;  %v1955_v4 = vmul.f32 %v5017_v60, %v4919_v24  ;;  %v1956_v8 = vmul.f32 %v5017_v60, %v4923_v56  ;;  %v1957_v7 = vmul.f32 %v5017_v60, %v4927_v0 }
 0x3ab   :  { %v1958_v5 = vmul.f32 %v5017_v60, %v4931_v32  ;;  %v1966_v14 = vadd.f32 %v1951_v53, %v1930_v49  ;;  %v1970_v42 = vadd.f32 %v1954_v27, %v1934_v28  ;;  %v1987_v46 = vmul.f32 %v5031_v34, %v4911_v51  ;;  %p3019_p3 = por %p3018_p2, %p3017_p1 }
 0x3ac   :  { %v1991_v12 = vmul.f32 %v5031_v34, %v4919_v24  ;;  %v1971_v13 = vadd.f32 %v1955_v4, %v1935_v58  ;;  %v1972_v6 = vadd.f32 %v1956_v8, %v1936_v43  ;;  %v1973_v1 = vadd.f32 %v1957_v7, %v1937_v11  ;;  %v5832_v8 = vld [vmem:[#allocation12_spill] sm:$0xff] }
 0x3ad   :  { %v1974_v38 = vadd.f32 %v1958_v5, %v1938_v54  ;;  %v1992_v55 = vmul.f32 %v5031_v34, %v4923_v56  ;;  %v1993_v48 = vmul.f32 %v5031_v34, %v4927_v0  ;;  %v1994_v62 = vmul.f32 %v5031_v34, %v4931_v32  ;;  %p3020_p4 = pnand %p3019_p3, %p3013_p0 }
 0x3ae   :  { %v1995_v39 = vmul.f32 %v5031_v34, %v4935_v9  ;;  %v5061_v3 = vadd.f32 %v1987_v46, %v1966_v14  ;;  %v2007_v22 = vadd.f32 %v1991_v12, %v1970_v42  ;;  %v2028_v59 = vmul.f32 %v5051_v16, %v4923_v56  ;;  %v5838_v34 = vld [vmem:[#allocation9_spill] sm:$0xff] }
 0x3af   :  { %v2029_v30 = vmul.f32 %v5051_v16, %v4927_v0  ;;  %v2008_v35 = vadd.f32 %v1992_v55, %v1971_v13  ;;  %v2009_v52 = vadd.f32 %v1993_v48, %v1972_v6  ;;  %v2010_v29 = vadd.f32 %v1994_v62, %v1973_v1 }
 0x3b0   :  { %5820 = vst [vmem:[#allocation18_spill] sm:$0xff] %v5061_v3  ;;  %v5067_v61 = vadd.f32 %v1995_v39, %v1974_v38  ;;  %v2030_v21 = vmul.f32 %v5051_v16, %v4931_v32  ;;  %v2031_v31 = vmul.f32 %v5051_v16, %v4935_v9  ;;  %v5073_v49 = vadd.f32 %v2028_v59, %v2007_v22 }
 0x3b1   :  { %v5823_v28 = vsub.f32 %v4700_v63, %v4772_v45  ;;  %v5079_v58 = vadd.f32 %v2029_v30, %v2008_v35  ;;  %v5825_v0 = vsub.f32 %v4690_v25, %v4772_v45  ;;  %v5826_v32 = vsub.f32 %v4714_v44, %v4772_v45 }
 0x3b2   :  { %5821 = vst [vmem:[#allocation19_spill] sm:$0xff] %v5067_v61  ;;  %5822 = vst [vmem:[#allocation20_spill] sm:$0xff] %v5073_v49  ;;  %v5089_v9 = vadd.f32 %v2030_v21, %v2009_v52  ;;  %v5091_v11 = vadd.f32 %v2031_v31, %v2010_v29  ;;  %v5829_v63 = vsub.f32 %v4706_v17, %v4772_v45  ;;  %v1742_v7 = vmul.f32 0.0, %v5832_v8  ;;  %v5834_v31 = vld [vmem:[#allocation7_spill] sm:$0xff] }
 0x3b3   :  { %v1641_v56 = vmul.f32 %v4816_v57, %v5823_v28  ;;  %5824 = vst [vmem:[#allocation21_spill] sm:$0xff] %v5079_v58  ;;  %v1642_v53 = vmul.f32 %v4816_v57, %v5825_v0  ;;  %v1643_v43 = vmul.f32 %v4816_v57, %v5826_v32  ;;  %v5830_v27 = vsub.f32 %v4744_v47, %v4772_v45 }
 0x3b4   :  { %5827 = vst [vmem:[#allocation46_spill] sm:$0xff] %v5089_v9  ;;  %5828 = vst [vmem:[#allocation47_spill] sm:$0xff] %v5091_v11  ;;  %v1644_v54 = vmul.f32 %v4816_v57, %v5829_v63  ;;  %v5831_v4 = vsub.f32 %v4741_v20, %v4772_v45  ;;  %v5111_v17 = vmul.f32 0.0, %v4971_v41  ;;  %v5114_v42 = vmul.f32 0.0, %v5017_v60  ;;  %v5837_v11 = vld [vmem:[#allocation10_spill] sm:$0xff] }
 0x3b5   :  { %v1649_v25 = vmul.f32 %v4816_v57, %v5830_v27  ;;  %v5106_v5 = vmax.f32 %v1641_v56, 0.0  ;;  %v5108_v14 = vmax.f32 %v1642_v53, 0.0  ;;  %v5116_v47 = vmax.f32 %v1643_v43, 0.0 }
 0x3b6   :  { %v1650_v44 = vmul.f32 %v4816_v57, %v5831_v4  ;;  %v5118_v46 = vmax.f32 %v1644_v54, 0.0  ;;  %v1709_v28 = vrot.slane %v5834_v31, 1  ;;  %v1710_v56 = vrot.slane %v4836_v36, 1 }
 0x3b7   :  { %v5120_v12 = vmax.f32 %v1649_v25, 0.0  ;;  %v1673_v45 = vrot.slane %v5106_v5, 7  ;;  %v1674_v57 = vrot.slane %v5108_v14, 7  ;;  %v1705_v13 = vrot.slane %v5106_v5, 1 }
 0x3b8   :  { %v5122_v20 = vmax.f32 %v1650_v44, 0.0  ;;  %v1706_v6 = vrot.slane %v5108_v14, 1  ;;  %v1675_v1 = vrot.slane %v5116_v47, 7  ;;  %v1676_v38 = vrot.slane %v5118_v46, 7 }
 0x3b9   :  { %v1681_v55 = vrot.slane %v5120_v12, 7  ;;  %v1689_v39 = vsel %vm17_vm0, 0.0, %v1673_v45  ;;  %v1690_v22 = vsel %vm17_vm0, 0.0, %v1674_v57  ;;  %v1707_v59 = vrot.slane %v5116_v47, 1 }
 0x3ba   :  { %v1682_v48 = vrot.slane %v5122_v20, 7  ;;  %v1708_v30 = vrot.slane %v5118_v46, 1  ;;  %v1691_v35 = vsel %vm17_vm0, 0.0, %v1675_v1  ;;  %v1692_v52 = vsel %vm17_vm0, 0.0, %v1676_v38 }
 0x3bb   :  { %v1697_v29 = vsel %vm17_vm0, 0.0, %v1681_v55  ;;  %v1713_v0 = vrot.slane %v5120_v12, 1  ;;  %v1714_v53 = vrot.slane %v5122_v20, 1  ;;  %v5152_v32 = vsel %vm18_vm1, 0.0, %v1705_v13  ;;  %v5835_v55 = vld [vmem:[#allocation17_spill] sm:$0xff] }
 0x3bc   :  { %v1698_v21 = vsel %vm17_vm0, 0.0, %v1682_v48  ;;  %v5156_v43 = vsel %vm18_vm1, 0.0, %v1706_v6  ;;  %v5160_v63 = vsel %vm18_vm1, 0.0, %v1707_v59  ;;  %v5164_v54 = vsel %vm18_vm1, 0.0, %v1708_v30 }
 0x3bd   :  { %v5168_v27 = vsel %vm18_vm1, 0.0, %v1709_v28  ;;  %v5172_v25 = vsel %vm18_vm1, 0.0, %v1710_v56  ;;  %v5176_v4 = vsel %vm18_vm1, 0.0, %v1713_v0  ;;  %v5180_v44 = vsel %vm18_vm1, 0.0, %v1714_v53  ;;  %v5836_v28 = vld [vmem:[#allocation8_spill] sm:$0xff] }
 0x3be   :  { %v1743_v45 = vmul.f32 %v5832_v8, %v1689_v39  ;;  %v1744_v57 = vmul.f32 %v5832_v8, %v1690_v22  ;;  %v1745_v13 = vmul.f32 %v5832_v8, %v1691_v35  ;;  %v1746_v6 = vmul.f32 %v5832_v8, %v1692_v52 }
 0x3bf   :  { %v1750_v1 = vmul.f32 %v5832_v8, %v1697_v29  ;;  %v1751_v38 = vmul.f32 %v5832_v8, %v1698_v21  ;;  %v1762_v48 = vmul.f32 %v5835_v55, %v1689_v39  ;;  %v1763_v59 = vmul.f32 %v5835_v55, %v1690_v22 }
 0x3c0   :  { %v1764_v62 = vmul.f32 %v5835_v55, %v1691_v35  ;;  %v1765_v30 = vmul.f32 %v5835_v55, %v1692_v52  ;;  %v1766_v56 = vmul.f32 %v5835_v55, %v5836_v28  ;;  %v1770_v0 = vmul.f32 %v5835_v55, %v1697_v29 }
 0x3c1   :  { %v1771_v53 = vmul.f32 %v5835_v55, %v1698_v21  ;;  %v1772_v61 = vmul.f32 %v5835_v55, %v5837_v11  ;;  %v1778_v9 = vadd.f32 %v1762_v48, %v1742_v7  ;;  %v1779_v8 = vadd.f32 %v1763_v59, %v1743_v45 }
 0x3c2   :  { %v1780_v58 = vadd.f32 %v1764_v62, %v1744_v57  ;;  %v1781_v39 = vadd.f32 %v1765_v30, %v1745_v13  ;;  %v1782_v49 = vadd.f32 %v1766_v56, %v1746_v6  ;;  %v1786_v3 = vadd.f32 %v1770_v0, %v1742_v7  ;;  %v5839_v7 = vld [vmem:[#allocation11_spill] sm:$0xff] }
 0x3c3   :  { %v1787_v24 = vadd.f32 %v1771_v53, %v1750_v1  ;;  %v1788_v51 = vadd.f32 %v1772_v61, %v1751_v38  ;;  %v1799_v16 = vmul.f32 %v4809_v26, %v1690_v22  ;;  %v1800_v23 = vmul.f32 %v4809_v26, %v1691_v35 }
 0x3c4   :  { %v1801_v33 = vmul.f32 %v4809_v26, %v1692_v52  ;;  %v1802_v29 = vmul.f32 %v4809_v26, %v5836_v28  ;;  %v1803_v55 = vmul.f32 %v4809_v26, %v5838_v34  ;;  %v1807_v45 = vmul.f32 %v4809_v26, %v1698_v21 }
 0x3c5   :  { %v1808_v57 = vmul.f32 %v4809_v26, %v5837_v11  ;;  %v1809_v61 = vmul.f32 %v4809_v26, %v5839_v7  ;;  %v1814_v13 = vadd.f32 %v1799_v16, %v1778_v9  ;;  %v1815_v22 = vadd.f32 %v1800_v23, %v1779_v8 }
 0x3c6   :  { %v1816_v6 = vadd.f32 %v1801_v33, %v1780_v58  ;;  %v1817_v35 = vadd.f32 %v1802_v29, %v1781_v39  ;;  %v1818_v1 = vadd.f32 %v1803_v55, %v1782_v49  ;;  %v1822_v52 = vadd.f32 %v1807_v45, %v1786_v3 }
 0x3c7   :  { %v1823_v38 = vadd.f32 %v1808_v57, %v1787_v24  ;;  %v1824_v48 = vadd.f32 %v1809_v61, %v1788_v51  ;;  %v1836_v59 = vmul.f32 %v4971_v41, %v5106_v5  ;;  %v1837_v34 = vmul.f32 %v4971_v41, %v5108_v14 }
 0x3c8   :  { %v1838_v11 = vmul.f32 %v4971_v41, %v5116_v47  ;;  %v1839_v26 = vmul.f32 %v4971_v41, %v5118_v46  ;;  %v1840_v33 = vmul.f32 %v4971_v41, %v5834_v31  ;;  %v1843_v23 = vmul.f32 %v4971_v41, %v5120_v12 }
 0x3c9   :  { %v1844_v51 = vmul.f32 %v4971_v41, %v5122_v20  ;;  %v1850_v24 = vadd.f32 %v5111_v17, %v1814_v13  ;;  %v1851_v16 = vadd.f32 %v1836_v59, %v1815_v22  ;;  %v1852_v3 = vadd.f32 %v1837_v34, %v1816_v6 }
 0x3ca   :  { %v1853_v49 = vadd.f32 %v1838_v11, %v1817_v35  ;;  %v1854_v58 = vadd.f32 %v1839_v26, %v1818_v1  ;;  %v1855_v9 = vadd.f32 %v1840_v33, %v4977_v18  ;;  %v1858_v21 = vadd.f32 %v5111_v17, %v1822_v52 }
 0x3cb   :  { %v1859_v62 = vadd.f32 %v1843_v23, %v1823_v38  ;;  %v1860_v30 = vadd.f32 %v1844_v51, %v1824_v48  ;;  %v1871_v28 = vmul.f32 %v4982_v19, %v5106_v5  ;;  %v1872_v56 = vmul.f32 %v4982_v19, %v5108_v14 }
 0x3cc   :  { %v1873_v41 = vmul.f32 %v4982_v19, %v5116_v47  ;;  %v1874_v0 = vmul.f32 %v4982_v19, %v5118_v46  ;;  %v1875_v53 = vmul.f32 %v4982_v19, %v5834_v31  ;;  %v1876_v18 = vmul.f32 %v4982_v19, %v4836_v36 }
 0x3cd   :  { %v1877_v17 = vmul.f32 %v4982_v19, %v4838_v15  ;;  %v1879_v5 = vmul.f32 %v4982_v19, %v5120_v12  ;;  %v1880_v8 = vmul.f32 %v4982_v19, %v5122_v20  ;;  %v1881_v39 = vmul.f32 %v4982_v19, %v4842_v10 }
 0x3ce   :  { %v1887_v29 = vadd.f32 %v1871_v28, %v1850_v24  ;;  %v1888_v55 = vadd.f32 %v1872_v56, %v1851_v16  ;;  %v1889_v45 = vadd.f32 %v1873_v41, %v1852_v3  ;;  %v1890_v57 = vadd.f32 %v1874_v0, %v1853_v49 }
 0x3cf   :  { %v1891_v7 = vadd.f32 %v1875_v53, %v1854_v58  ;;  %v1892_v61 = vadd.f32 %v1876_v18, %v1855_v9  ;;  %v1893_v13 = vadd.f32 %v1877_v17, %v4998_v40  ;;  %v1895_v22 = vadd.f32 %v1879_v5, %v1858_v21  ;;  %v5840_v53 = vld [vmem:[#allocation44_spill] sm:$0xff] }
 0x3d0   :  { %v1896_v6 = vadd.f32 %v1880_v8, %v1859_v62  ;;  %v1897_v35 = vadd.f32 %v1881_v39, %v1860_v30  ;;  %v1908_v12 = vmul.f32 %v4814_v37, %v5108_v14  ;;  %v1909_v1 = vmul.f32 %v4814_v37, %v5116_v47  ;;  %v5841_v39 = vld [vmem:[#allocation13_spill] sm:$0xff] }
 0x3d1   :  { %v1910_v19 = vmul.f32 %v4814_v37, %v5118_v46  ;;  %v1911_v52 = vmul.f32 %v4814_v37, %v5834_v31  ;;  %v1912_v38 = vmul.f32 %v4814_v37, %v4836_v36  ;;  %v1913_v40 = vmul.f32 %v4814_v37, %v4838_v15 }
 0x3d2   :  { %v1914_v48 = vmul.f32 %v4814_v37, %v4840_v50  ;;  %v1916_v14 = vmul.f32 %v4814_v37, %v5122_v20  ;;  %v1917_v47 = vmul.f32 %v4814_v37, %v4842_v10  ;;  %v1918_v46 = vmul.f32 %v4814_v37, %v4844_v2 }
 0x3d3   :  { %v1923_v59 = vadd.f32 %v1908_v12, %v1887_v29  ;;  %v1924_v31 = vadd.f32 %v1909_v1, %v1888_v55  ;;  %v1925_v34 = vadd.f32 %v1910_v19, %v1889_v45  ;;  %v1926_v11 = vadd.f32 %v1911_v52, %v1890_v57  ;;  %v5842_v45 = vld [vmem:[#allocation15_spill] sm:$0xff] }
 0x3d4   :  { %v1927_v36 = vadd.f32 %v1912_v38, %v1891_v7  ;;  %v1928_v26 = vadd.f32 %v1913_v40, %v1892_v61  ;;  %v1929_v33 = vadd.f32 %v1914_v48, %v1893_v13  ;;  %v1931_v15 = vadd.f32 %v1916_v14, %v1895_v22  ;;  %v5843_v38 = vld [vmem:[#allocation45_spill] sm:$0xff] }
 0x3d5   :  { %v1932_v23 = vadd.f32 %v1917_v47, %v1896_v6  ;;  %v1933_v51 = vadd.f32 %v1918_v46, %v1897_v35  ;;  %v1945_v50 = vmul.f32 %v5017_v60, %v5152_v32  ;;  %v1946_v20 = vmul.f32 %v5017_v60, %v5156_v43 }
 0x3d6   :  { %v1947_v10 = vmul.f32 %v5017_v60, %v5160_v63  ;;  %v1948_v37 = vmul.f32 %v5017_v60, %v5164_v54  ;;  %v1949_v2 = vmul.f32 %v5017_v60, %v5168_v27  ;;  %v1950_v24 = vmul.f32 %v5017_v60, %v5172_v25 }
 0x3d7   :  { %v1952_v16 = vmul.f32 %v5017_v60, %v5176_v4  ;;  %v1953_v3 = vmul.f32 %v5017_v60, %v5180_v44  ;;  %v1959_v49 = vadd.f32 %v5114_v42, %v1923_v59  ;;  %v1960_v58 = vadd.f32 %v1945_v50, %v1924_v31  ;;  %v5844_v59 = vld [vmem:[#allocation14_spill] sm:$0xff] }
 0x3d8   :  { %v1961_v9 = vadd.f32 %v1946_v20, %v1925_v34  ;;  %v1962_v21 = vadd.f32 %v1947_v10, %v1926_v11  ;;  %v1963_v62 = vadd.f32 %v1948_v37, %v1927_v36  ;;  %v1964_v30 = vadd.f32 %v1949_v2, %v1928_v26  ;;  %v5845_v34 = vld [vmem:[#allocation16_spill] sm:$0xff] }
 0x3d9   :  { %v1965_v28 = vadd.f32 %v1950_v24, %v1929_v33  ;;  %v1967_v56 = vadd.f32 %v5114_v42, %v1931_v15  ;;  %v1968_v41 = vadd.f32 %v1952_v16, %v1932_v23  ;;  %v1969_v0 = vadd.f32 %v1953_v3, %v1933_v51 }
 0x3da   :  { %v1980_v18 = vmul.f32 %v5840_v53, %v5152_v32  ;;  %v1981_v17 = vmul.f32 %v5840_v53, %v5156_v43  ;;  %v1982_v60 = vmul.f32 %v5840_v53, %v5160_v63  ;;  %v1983_v5 = vmul.f32 %v5840_v53, %v5164_v54 }
 0x3db   :  { %v1984_v8 = vmul.f32 %v5840_v53, %v5168_v27  ;;  %v1985_v42 = vmul.f32 %v5840_v53, %v5172_v25  ;;  %v1986_v29 = vmul.f32 %v5840_v53, %v5841_v39  ;;  %v1988_v32 = vmul.f32 %v5840_v53, %v5176_v4 }
 0x3dc   :  { %v1989_v55 = vmul.f32 %v5840_v53, %v5180_v44  ;;  %v1990_v57 = vmul.f32 %v5840_v53, %v5842_v45  ;;  %v1996_v7 = vadd.f32 %v1980_v18, %v1959_v49  ;;  %v1997_v61 = vadd.f32 %v1981_v17, %v1960_v58 }
 0x3dd   :  { %v1998_v13 = vadd.f32 %v1982_v60, %v1961_v9  ;;  %v1999_v22 = vadd.f32 %v1983_v5, %v1962_v21  ;;  %v2000_v6 = vadd.f32 %v1984_v8, %v1963_v62  ;;  %v2001_v35 = vadd.f32 %v1985_v42, %v1964_v30 }
 0x3de   :  { %v2002_v12 = vadd.f32 %v1986_v29, %v1965_v28  ;;  %v2004_v1 = vadd.f32 %v1988_v32, %v1967_v56  ;;  %v2005_v19 = vadd.f32 %v1989_v55, %v1968_v41  ;;  %v2006_v52 = vadd.f32 %v1990_v57, %v1969_v0  ;;  %v5846_v28 = vld [vmem:[#allocation18_spill] sm:$0xff] }
 0x3df   :  { %v2017_v40 = vmul.f32 %v5843_v38, %v5156_v43  ;;  %v2018_v4 = vmul.f32 %v5843_v38, %v5160_v63  ;;  %v2019_v48 = vmul.f32 %v5843_v38, %v5164_v54  ;;  %v2020_v14 = vmul.f32 %v5843_v38, %v5168_v27 }
 0x3e0   :  { %v2021_v47 = vmul.f32 %v5843_v38, %v5172_v25  ;;  %v2022_v46 = vmul.f32 %v5843_v38, %v5841_v39  ;;  %v2023_v31 = vmul.f32 %v5843_v38, %v5844_v59  ;;  %v2025_v43 = vmul.f32 %v5843_v38, %v5180_v44 }
 0x3e1   :  { %v2026_v63 = vmul.f32 %v5843_v38, %v5842_v45  ;;  %v2027_v54 = vmul.f32 %v5843_v38, %v5845_v34  ;;  %v5326_v11 = vadd.f32 %v2017_v40, %v1996_v7  ;;  %v5328_v27 = vadd.f32 %v2018_v4, %v1997_v61  ;;  %v5850_v4 = vld [vmem:[#allocation19_spill] sm:$0xff] }
 0x3e2   :  { %v5330_v25 = vadd.f32 %v2019_v48, %v1998_v13  ;;  %v5332_v36 = vadd.f32 %v2020_v14, %v1999_v22  ;;  %v5334_v26 = vadd.f32 %v2021_v47, %v2000_v6  ;;  %v5336_v33 = vadd.f32 %v2022_v46, %v2001_v35  ;;  %v5847_v13 = vld [vmem:[#allocation20_spill] sm:$0xff]  ;;  %v5851_v46 = vld [vmem:[#allocation47_spill] sm:$0xff] }
 0x3e3   :  { %v5338_v15 = vadd.f32 %v2023_v31, %v2002_v12  ;;  %v5340_v44 = vadd.f32 %v2025_v43, %v2004_v1  ;;  %v5342_v23 = vadd.f32 %v2026_v63, %v2005_v19  ;;  %v5344_v51 = vadd.f32 %v2027_v54, %v2006_v52  ;;  %v5848_v12 = vld [vmem:[#allocation21_spill] sm:$0xff] }
 0x3e4   :  { %v2048_v50 = vadd.f32 %v5328_v27, %v5326_v11  ;;  %v2069_v20 = vmul.f32 %v5326_v11, %v5326_v11  ;;  %v2070_v10 = vmul.f32 %v5328_v27, %v5328_v27  ;;  %v2071_v2 = vmul.f32 %v5330_v25, %v5330_v25 }
 0x3e5   :  { %v2024_v3 = vmul.f32 0.0, %v5843_v38  ;;  %v2072_v49 = vmul.f32 %v5332_v36, %v5332_v36  ;;  %v2073_v21 = vmul.f32 %v5334_v26, %v5334_v26  ;;  %v2074_v41 = vmul.f32 %v5336_v33, %v5336_v33  ;;  %v5849_v38 = vld [vmem:[#allocation46_spill] sm:$0xff] }
 0x3e6   :  { %v2049_v37 = vadd.f32 %v2048_v50, %v5330_v25  ;;  %v2085_v24 = vadd.f32 %v2070_v10, %v2069_v20  ;;  %v2075_v18 = vmul.f32 %v5338_v15, %v5338_v15  ;;  %v2077_v39 = vmul.f32 %v5340_v44, %v5340_v44 }
 0x3e7   :  { %v5364_v56 = vadd.f32 %v2024_v3, %v5846_v28  ;;  %v2078_v55 = vmul.f32 %v5342_v23, %v5342_v23  ;;  %v2079_v7 = vmul.f32 %v5344_v51, %v5344_v51  ;;  %v2080_v6 = vmul.f32 %v5847_v13, %v5847_v13 }
 0x3e8   :  { %v2050_v16 = vadd.f32 %v2049_v37, %v5332_v36  ;;  %v2086_v58 = vadd.f32 %v2085_v24, %v2071_v2  ;;  %v2081_v19 = vmul.f32 %v5848_v12, %v5848_v12  ;;  %v5391_v48 = vadd.f32 %v2024_v3, %v5850_v4 }
 0x3e9   :  { %v2076_v5 = vmul.f32 %v5364_v56, %v5364_v56  ;;  %v2082_v14 = vmul.f32 %v5849_v38, %v5849_v38  ;;  %v2083_v31 = vmul.f32 %v5851_v46, %v5851_v46 }
 0x3ea   :  { %v2051_v9 = vadd.f32 %v2050_v16, %v5334_v26  ;;  %v2087_v62 = vadd.f32 %v2086_v58, %v2072_v49  ;;  %v2084_v34 = vmul.f32 %v5391_v48, %v5391_v48 }
 0x3ec   :  { %v2052_v30 = vadd.f32 %v2051_v9, %v5336_v33  ;;  %v2088_v0 = vadd.f32 %v2087_v62, %v2073_v21 }
 0x3ee   :  { %v2053_v53 = vadd.f32 %v2052_v30, %v5338_v15  ;;  %v2089_v17 = vadd.f32 %v2088_v0, %v2074_v41 }
 0x3f0   :  { %v2054_v60 = vadd.f32 %v2053_v53, %v5364_v56  ;;  %v2090_v8 = vadd.f32 %v2089_v17, %v2075_v18 }
 0x3f2   :  { %v2055_v42 = vadd.f32 %v2054_v60, %v5340_v44  ;;  %v2091_v29 = vadd.f32 %v2090_v8, %v2076_v5 }
 0x3f4   :  { %v2056_v32 = vadd.f32 %v2055_v42, %v5342_v23  ;;  %v2092_v45 = vadd.f32 %v2091_v29, %v2077_v39 }
 0x3f6   :  { %v2057_v57 = vadd.f32 %v2056_v32, %v5344_v51  ;;  %v2093_v61 = vadd.f32 %v2092_v45, %v2078_v55 }
 0x3f8   :  { %v2058_v22 = vadd.f32 %v2057_v57, %v5847_v13  ;;  %v2094_v35 = vadd.f32 %v2093_v61, %v2079_v7 }
 0x3fa   :  { %v2059_v1 = vadd.f32 %v2058_v22, %v5848_v12  ;;  %v2095_v52 = vadd.f32 %v2094_v35, %v2080_v6 }
 0x3fc   :  { %v2060_v40 = vadd.f32 %v2059_v1, %v5849_v38  ;;  %v2096_v47 = vadd.f32 %v2095_v52, %v2081_v19 }
 0x3fe   :  { %v2061_v59 = vadd.f32 %v2060_v40, %v5851_v46  ;;  %v2097_v43 = vadd.f32 %v2096_v47, %v2082_v14 }
 0x400   :  { %v2062_v63 = vadd.f32 %v2061_v59, %v5391_v48  ;;  %v2098_v54 = vadd.f32 %v2097_v43, %v2083_v31 }
 0x402   :  { %v2063_v50 = vrot.slane %v2062_v63, 4  ;;  %v2099_v20 = vadd.f32 %v2098_v54, %v2084_v34 }
 0x404   :  { %v2064_v10 = vadd.f32 %v2063_v50, %v2062_v63  ;;  %v2100_v37 = vrot.slane %v2099_v20, 4 }
 0x406   :  { %v2065_v2 = vrot.slane %v2064_v10, 2  ;;  %v2101_v24 = vadd.f32 %v2100_v37, %v2099_v20 }
 0x408   :  { %v2066_v16 = vadd.f32 %v2065_v2, %v2064_v10  ;;  %v2102_v3 = vrot.slane %v2101_v24, 2 }
 0x40a   :  { %v2067_v49 = vrot.slane %v2066_v16, 1  ;;  %v2103_v58 = vadd.f32 %v2102_v3, %v2101_v24 }
 0x40c   :  { %v2068_v9 = vadd.f32 %v2067_v49, %v2066_v16  ;;  %v2104_v21 = vrot.slane %v2103_v58, 1 }
 0x40e   :  { %v2106_v62 = vmul.f32 0.0078125, %v2068_v9  ;;  %v2105_v30 = vadd.f32 %v2104_v21, %v2103_v58 }
 0x410   :  { %v2108_v28 = vmul.f32 %v2106_v62, %v2106_v62  ;;  %v2113_v41 = vsub.f32 %v5326_v11, %v2106_v62  ;;  %v2121_v0 = vsub.f32 %v5340_v44, %v2106_v62  ;;  %v2114_v53 = vsub.f32 %v5328_v27, %v2106_v62 }
 0x411   :  { %v2107_v18 = vmul.f32 0.0078125, %v2105_v30  ;;  %v2122_v17 = vsub.f32 %v5342_v23, %v2106_v62  ;;  %v2115_v60 = vsub.f32 %v5330_v25, %v2106_v62  ;;  %v2123_v5 = vsub.f32 %v5344_v51, %v2106_v62 }
 0x412   :  { %v2116_v8 = vsub.f32 %v5332_v36, %v2106_v62  ;;  %v2124_v42 = vsub.f32 %v5847_v13, %v2106_v62  ;;  %v2117_v39 = vsub.f32 %v5334_v26, %v2106_v62  ;;  %v2125_v29 = vsub.f32 %v5848_v12, %v2106_v62 }
 0x413   :  { %v2109_v11 = vsub.f32 %v2107_v18, %v2108_v28  ;;  %v2118_v44 = vsub.f32 %v5336_v33, %v2106_v62  ;;  %v2126_v27 = vsub.f32 %v5849_v38, %v2106_v62  ;;  %v2119_v32 = vsub.f32 %v5338_v15, %v2106_v62 }
 0x414   :  { %v2127_v23 = vsub.f32 %v5851_v46, %v2106_v62  ;;  %v2120_v25 = vsub.f32 %v5364_v56, %v2106_v62  ;;  %v2128_v51 = vsub.f32 %v5391_v48, %v2106_v62 }
 0x415   :  { %v2110_v36 = vmax.f32 %v2109_v11, 0.0 }
 0x417   :  { %v2111_v55 = vadd.f32 1e-05, %v2110_v36 }
 0x419   :  { %3008 = vrsqrt.f32 %v2111_v55 }
 0x423   :  { %v3009_v45 = vpop.eup %3008 }
 0x424   :  { %v2129_v26 = vmul.f32 %v3009_v45, %v2113_v41  ;;  %v2137_v57 = vmul.f32 %v3009_v45, %v2121_v0  ;;  %v2130_v7 = vmul.f32 %v3009_v45, %v2114_v53  ;;  %v2138_v61 = vmul.f32 %v3009_v45, %v2122_v17 }
 0x425   :  { %v2131_v13 = vmul.f32 %v3009_v45, %v2115_v60  ;;  %v2139_v33 = vmul.f32 %v3009_v45, %v2123_v5  ;;  %v2132_v22 = vmul.f32 %v3009_v45, %v2116_v8  ;;  %v2140_v6 = vmul.f32 %v3009_v45, %v2124_v42 }
 0x426   :  { %v2145_v35 = vmax.f32 %v2129_v26, 0.0  ;;  %v2153_v15 = vmax.f32 %v2137_v57, 0.0  ;;  %v2146_v12 = vmax.f32 %v2130_v7, 0.0  ;;  %v2154_v1 = vmax.f32 %v2138_v61, 0.0 }
 0x427   :  { %v2147_v19 = vmax.f32 %v2131_v13, 0.0  ;;  %v2155_v56 = vmax.f32 %v2139_v33, 0.0  ;;  %v2133_v52 = vmul.f32 %v3009_v45, %v2117_v39  ;;  %v2141_v38 = vmul.f32 %v3009_v45, %v2125_v29 }
 0x428   :  { %2861 = vmatprep.mubr.f32.mxu0 %v2145_v35  ;;  %2873 = vmatprep.mubr.f32.mxu1 %v2153_v15  ;;  %v2134_v40 = vmul.f32 %v3009_v45, %v2118_v44  ;;  %v2142_v4 = vmul.f32 %v3009_v45, %v2126_v27  ;;  %v2135_v48 = vmul.f32 %v3009_v45, %v2119_v32  ;;  %v2148_v46 = vmax.f32 %v2132_v22, 0.0 }
 0x429   :  { %2862 = vmatmul.mubr.f32.vlgmr.msra.gmra.mrb[16].mxu0 %v2146_v12  ;;  %2874 = vmatmul.mubr.f32.vlgmr.msra.gmra.mrb[16].mxu1 %v2154_v1  ;;  %v2143_v14 = vmul.f32 %v3009_v45, %v2127_v23  ;;  %v2136_v47 = vmul.f32 %v3009_v45, %v2120_v25  ;;  %v2156_v59 = vmax.f32 %v2140_v6, 0.0  ;;  %v2144_v31 = vmul.f32 %v3009_v45, %v2128_v51 }
 0x42a   :  { %2864 = vmatprep.mubr.f32.mxu0 %v2147_v19  ;;  %2876 = vmatprep.mubr.f32.mxu1 %v2155_v56  ;;  %v2149_v43 = vmax.f32 %v2133_v52, 0.0  ;;  %v2157_v63 = vmax.f32 %v2141_v38, 0.0  ;;  %v2150_v34 = vmax.f32 %v2134_v40, 0.0  ;;  %v2158_v54 = vmax.f32 %v2142_v4, 0.0 }
 0x42b   :  { %v2151_v50 = vmax.f32 %v2135_v48, 0.0  ;;  %v2159_v20 = vmax.f32 %v2143_v14, 0.0  ;;  %v2152_v10 = vmax.f32 %v2136_v47, 0.0  ;;  %v2160_v37 = vmax.f32 %v2144_v31, 0.0 }
 0x42d   :  { %2865 = vmatmul.mubr.f32.gmra.mrb[18].mxu0 %v2148_v46  ;;  %2877 = vmatmul.mubr.f32.gmra.mrb[18].mxu1 %v2156_v59 }
 0x42e   :  { %2867 = vmatprep.mubr.f32.mxu0 %v2149_v43  ;;  %2879 = vmatprep.mubr.f32.mxu1 %v2157_v63 }
 0x431   :  { %2868 = vmatmul.mubr.f32.gmra.mrb[20].mxu0 %v2150_v34  ;;  %2880 = vmatmul.mubr.f32.gmra.mrb[20].mxu1 %v2158_v54 }
 0x432   :  { %2870 = vmatprep.mubr.f32.mxu0 %v2151_v50  ;;  %2882 = vmatprep.mubr.f32.mxu1 %v2159_v20 }
 0x435   :  { %2871 = vmatmul.mubr.f32.gmra.mrb[22].mxu0 %v2152_v10  ;;  %2883 = vmatmul.mubr.f32.gmra.mrb[22].mxu1 %v2160_v37 }
 0x4fc   :  { %v5417_v2 = vpop.f32.mrb[16].mxu0  ;;  %v5419_v24 = vpop.f32.mrb[16].mxu1 }
 0x4fd   :  { %v2345_v16 = vmul.f32 %v5417_v2, %v5417_v2  ;;  %v5423_v3 = vpop.f32.mrb[17].mxu0  ;;  %v5425_v49 = vpop.f32.mrb[17].mxu1  ;;  %v2353_v35 = vmul.f32 %v5419_v24, %v5419_v24 }
 0x4fe   :  { %v2323_v58 = vadd.f32 %v5417_v2, %v5423_v3  ;;  %v2344_v9 = vmul.f32 %v5423_v3, %v5423_v3  ;;  %v2352_v33 = vmul.f32 %v5425_v49, %v5425_v49 }
 0x500   :  { %v2360_v21 = vadd.f32 %v2345_v16, %v2344_v9  ;;  %v5431_v62 = vpop.f32.mrb[18].mxu0  ;;  %v5433_v30 = vpop.f32.mrb[18].mxu1 }
 0x501   :  { %v5435_v28 = vpop.f32.mrb[19].mxu0  ;;  %v5437_v41 = vpop.f32.mrb[19].mxu1  ;;  %v2347_v18 = vmul.f32 %v5431_v62, %v5431_v62  ;;  %v2355_v52 = vmul.f32 %v5433_v30, %v5433_v30 }
 0x502   :  { %v2324_v0 = vadd.f32 %v2323_v58, %v5435_v28  ;;  %v2346_v53 = vmul.f32 %v5435_v28, %v5435_v28  ;;  %v2354_v1 = vmul.f32 %v5437_v41, %v5437_v41 }
 0x504   :  { %v2361_v17 = vadd.f32 %v2360_v21, %v2346_v53  ;;  %v5444_v60 = vpop.f32.mrb[20].mxu0  ;;  %v5446_v5 = vpop.f32.mrb[20].mxu1  ;;  %v2325_v8 = vadd.f32 %v5431_v62, %v2324_v0 }
 0x505   :  { %v5449_v42 = vpop.f32.mrb[21].mxu0  ;;  %v5451_v39 = vpop.f32.mrb[21].mxu1  ;;  %v2349_v27 = vmul.f32 %v5444_v60, %v5444_v60  ;;  %v2357_v47 = vmul.f32 %v5446_v5, %v5446_v5 }
 0x506   :  { %v2326_v29 = vadd.f32 %v2325_v8, %v5449_v42  ;;  %v2348_v11 = vmul.f32 %v5449_v42, %v5449_v42  ;;  %v2362_v44 = vadd.f32 %v2361_v17, %v2347_v18  ;;  %v2356_v4 = vmul.f32 %v5451_v39, %v5451_v39 }
 0x508   :  { %v2363_v32 = vadd.f32 %v2362_v44, %v2348_v11  ;;  %v5458_v23 = vpop.f32.mrb[22].mxu0  ;;  %v5460_v25 = vpop.f32.mrb[22].mxu1  ;;  %v2327_v51 = vadd.f32 %v5444_v60, %v2326_v29 }
 0x509   :  { %v5463_v36 = vpop.f32.mrb[23].mxu0  ;;  %v5465_v55 = vpop.f32.mrb[23].mxu1  ;;  %v2351_v7 = vmul.f32 %v5458_v23, %v5458_v23  ;;  %v2359_v34 = vmul.f32 %v5460_v25, %v5460_v25 }
 0x50a   :  { %v2328_v45 = vadd.f32 %v2327_v51, %v5463_v36  ;;  %v2350_v26 = vmul.f32 %v5463_v36, %v5463_v36  ;;  %v2364_v57 = vadd.f32 %v2363_v32, %v2349_v27  ;;  %v2358_v43 = vmul.f32 %v5465_v55, %v5465_v55 }
 0x50c   :  { %v2329_v61 = vadd.f32 %v5458_v23, %v2328_v45  ;;  %v2365_v13 = vadd.f32 %v2364_v57, %v2350_v26 }
 0x50e   :  { %v2330_v22 = vadd.f32 %v2329_v61, %v5425_v49  ;;  %v2366_v6 = vadd.f32 %v2365_v13, %v2351_v7 }
 0x510   :  { %v2331_v15 = vadd.f32 %v5419_v24, %v2330_v22  ;;  %v2367_v12 = vadd.f32 %v2366_v6, %v2352_v33 }
 0x512   :  { %v2368_v19 = vadd.f32 %v2367_v12, %v2353_v35  ;;  %v2332_v56 = vadd.f32 %v2331_v15, %v5437_v41 }
 0x514   :  { %v2333_v38 = vadd.f32 %v5433_v30, %v2332_v56  ;;  %v2369_v40 = vadd.f32 %v2368_v19, %v2354_v1 }
 0x516   :  { %v2334_v48 = vadd.f32 %v2333_v38, %v5451_v39  ;;  %v2370_v14 = vadd.f32 %v2369_v40, %v2355_v52 }
 0x518   :  { %v2335_v46 = vadd.f32 %v5446_v5, %v2334_v48  ;;  %v2371_v59 = vadd.f32 %v2370_v14, %v2356_v4 }
 0x51a   :  { %v2336_v31 = vadd.f32 %v2335_v46, %v5465_v55  ;;  %v2372_v63 = vadd.f32 %v2371_v59, %v2357_v47 }
 0x51c   :  { %v2337_v54 = vadd.f32 %v5460_v25, %v2336_v31  ;;  %v2373_v50 = vadd.f32 %v2372_v63, %v2358_v43 }
 0x51e   :  { %v2338_v20 = vrot.slane %v2337_v54, 4  ;;  %v2374_v10 = vadd.f32 %v2373_v50, %v2359_v34 }
 0x520   :  { %v2339_v37 = vadd.f32 %v2338_v20, %v2337_v54  ;;  %v2375_v16 = vrot.slane %v2374_v10, 4 }
 0x522   :  { %v2340_v58 = vrot.slane %v2339_v37, 2  ;;  %v2376_v9 = vadd.f32 %v2375_v16, %v2374_v10 }
 0x524   :  { %v2341_v21 = vadd.f32 %v2340_v58, %v2339_v37  ;;  %v2377_v0 = vrot.slane %v2376_v9, 2 }
 0x526   :  { %v2342_v53 = vrot.slane %v2341_v21, 1  ;;  %v2378_v18 = vadd.f32 %v2377_v0, %v2376_v9 }
 0x528   :  { %v2343_v17 = vadd.f32 %v2342_v53, %v2341_v21  ;;  %v2379_v8 = vrot.slane %v2378_v18, 1 }
 0x52a   :  { %v2380_v29 = vadd.f32 %v2379_v8, %v2378_v18  ;;  %v2381_v11 = vmul.f32 0.0078125, %v2343_v17 }
 0x52c   :  { %v2382_v44 = vmul.f32 0.0078125, %v2380_v29  ;;  %v2383_v27 = vmul.f32 %v2381_v11, %v2381_v11  ;;  %v2402_v32 = vsub.f32 %v5465_v55, %v2381_v11  ;;  %v2388_v51 = vsub.f32 %v5423_v3, %v2381_v11 }
 0x52d   :  { %v2389_v45 = vsub.f32 %v5417_v2, %v2381_v11  ;;  %v2390_v26 = vsub.f32 %v5435_v28, %v2381_v11  ;;  %v2391_v57 = vsub.f32 %v5431_v62, %v2381_v11  ;;  %v2392_v7 = vsub.f32 %v5449_v42, %v2381_v11 }
 0x52e   :  { %v2384_v61 = vsub.f32 %v2382_v44, %v2383_v27  ;;  %v2393_v13 = vsub.f32 %v5444_v60, %v2381_v11  ;;  %v2394_v33 = vsub.f32 %v5463_v36, %v2381_v11  ;;  %v2395_v22 = vsub.f32 %v5458_v23, %v2381_v11 }
 0x52f   :  { %v2396_v6 = vsub.f32 %v5425_v49, %v2381_v11  ;;  %v2397_v55 = vsub.f32 %v5419_v24, %v2381_v11  ;;  %v2398_v3 = vsub.f32 %v5437_v41, %v2381_v11  ;;  %v2399_v2 = vsub.f32 %v5433_v30, %v2381_v11 }
 0x530   :  { %v2385_v28 = vmax.f32 %v2384_v61, 0.0  ;;  %v2400_v62 = vsub.f32 %v5451_v39, %v2381_v11  ;;  %v2401_v42 = vsub.f32 %v5446_v5, %v2381_v11  ;;  %v2403_v35 = vsub.f32 %v5460_v25, %v2381_v11 }
 0x532   :  { %v2386_v60 = vadd.f32 1e-05, %v2385_v28 }
 0x534   :  { %3010 = vrsqrt.f32 %v2386_v60 }
 0x53e   :  { %v3011_v36 = vpop.eup %3010 }
 0x53f   :  { %v2418_v15 = vmul.f32 %v3011_v36, %v2402_v32  ;;  %v2404_v23 = vmul.f32 %v3011_v36, %v2388_v51  ;;  %v2405_v12 = vmul.f32 %v3011_v36, %v2389_v45  ;;  %v2406_v49 = vmul.f32 %v3011_v36, %v2390_v26 }
 0x540   :  { %v2407_v1 = vmul.f32 %v3011_v36, %v2391_v57  ;;  %v2408_v24 = vmul.f32 %v3011_v36, %v2392_v7  ;;  %v2409_v19 = vmul.f32 %v3011_v36, %v2393_v13  ;;  %v2410_v41 = vmul.f32 %v3011_v36, %v2394_v33 }
 0x541   :  { %v2434_v56 = vmax.f32 %v2418_v15, 0.0  ;;  %v2411_v30 = vmul.f32 %v3011_v36, %v2395_v22  ;;  %v2412_v52 = vmul.f32 %v3011_v36, %v2396_v6  ;;  %v2413_v38 = vmul.f32 %v3011_v36, %v2397_v55 }
 0x542   :  { %v2414_v39 = vmul.f32 %v3011_v36, %v2398_v3  ;;  %v2415_v40 = vmul.f32 %v3011_v36, %v2399_v2  ;;  %v2416_v5 = vmul.f32 %v3011_v36, %v2400_v62  ;;  %v2417_v4 = vmul.f32 %v3011_v36, %v2401_v42 }
 0x543   :  { %2450 = vst [vmem:[#allocation2 + $0x70] sm:$0xff] %v2434_v56  ;;  %v2419_v25 = vmul.f32 %v3011_v36, %v2403_v35  ;;  %v2420_v48 = vmax.f32 %v2404_v23, 0.0  ;;  %v2421_v14 = vmax.f32 %v2405_v12, 0.0  ;;  %v2422_v47 = vmax.f32 %v2406_v49, 0.0 }
 0x544   :  { %v2423_v46 = vmax.f32 %v2407_v1, 0.0  ;;  %v2424_v59 = vmax.f32 %v2408_v24, 0.0  ;;  %v2425_v31 = vmax.f32 %v2409_v19, 0.0  ;;  %v2426_v43 = vmax.f32 %v2410_v41, 0.0 }
 0x545   :  { %v2427_v63 = vmax.f32 %v2411_v30, 0.0  ;;  %v2428_v34 = vmax.f32 %v2412_v52, 0.0  ;;  %v2429_v54 = vmax.f32 %v2413_v38, 0.0  ;;  %v2430_v50 = vmax.f32 %v2414_v39, 0.0  ;;  %2436 = vst [vmem:[#allocation2] sm:$0xff] %v2420_v48  ;;  %2437 = vst [vmem:[#allocation2 + $0x8] sm:$0xff] %v2421_v14 }
 0x546   :  { %2438 = vst [vmem:[#allocation2 + $0x10] sm:$0xff] %v2422_v47  ;;  %v2431_v20 = vmax.f32 %v2415_v40, 0.0  ;;  %v2432_v10 = vmax.f32 %v2416_v5, 0.0  ;;  %v2433_v37 = vmax.f32 %v2417_v4, 0.0  ;;  %v2435_v16 = vmax.f32 %v2419_v25, 0.0  ;;  %2439 = vst [vmem:[#allocation2 + $0x18] sm:$0xff] %v2423_v46 }
 0x547   :  { %2440 = vst [vmem:[#allocation2 + $0x20] sm:$0xff] %v2424_v59  ;;  %2441 = vst [vmem:[#allocation2 + $0x28] sm:$0xff] %v2425_v31 }
 0x548   :  { %2442 = vst [vmem:[#allocation2 + $0x30] sm:$0xff] %v2426_v43  ;;  %2443 = vst [vmem:[#allocation2 + $0x38] sm:$0xff] %v2427_v63 }
 0x549   :  { %2444 = vst [vmem:[#allocation2 + $0x40] sm:$0xff] %v2428_v34  ;;  %2445 = vst [vmem:[#allocation2 + $0x48] sm:$0xff] %v2429_v54 }
 0x54a   :  { %2446 = vst [vmem:[#allocation2 + $0x50] sm:$0xff] %v2430_v50  ;;  %2447 = vst [vmem:[#allocation2 + $0x58] sm:$0xff] %v2431_v20 }
 0x54b   :  { %2448 = vst [vmem:[#allocation2 + $0x60] sm:$0xff] %v2432_v10  ;;  %2449 = vst [vmem:[#allocation2 + $0x68] sm:$0xff] %v2433_v37 }
 0x54c   :  { %2451 = vst [vmem:[#allocation2 + $0x78] sm:$0xff] %v2435_v16 }
 0x54d   :  { %3023 = shalt.err (!%p3020_p4)
}
 0x54e   :  { %s3024_s19 = scalar_lea.hbm %s5528_s3, 2048 }
 0x54f   :  { %p3025_p5 = scmp.ne.s32.totalorder %s5528_s3, %s3024_s19  ;;  %p3028_p6 = scmp.lt.u32.totalorder %s3024_s19, %s5528_s3 }
 0x551   :  { %p3030_p7 = pnand %p3028_p6, %p3025_p5 }
 0x553   :  { %3033 = shalt.err (!%p3030_p7)
}
 0x554   :  { %s3037_s24 = smov 128   ;;  %s3038_s25 = smov 8  }
 0x555   :  { %2463 = dma.vmem_to_hbm [thread:$0]  %s2458_s15, 2048, %s5528_s3, [#allocation3], %s3037_s24, %s3037_s24, %s3038_s25  }
 0x556   :  { %3034 = dma.done.wait [#allocation3], 2048  }
 0x557   :  { %3035 = vsyncadd [#allocation3], 4294965248 }
 0x558   :  { %2467 = vsyncpa [#allocation3], 1 }

</bundles_post_ra>
